<compile_context>
chip_gen: v6e
topology: v6e:2x2x1
jax: 0.10.0
libtpu: 0.0.40
codegen_flags: <defaults>
</compile_context>

<pallas_src>
import jax
import jax.numpy as jnp
from jax.experimental import pallas as pl
from jax.experimental.pallas import tpu as pltpu

J, C, O, N = 64, 4, 28, 28      # x is viewed as (1, J, C, O, N) by the module
P, L = 8, 32                    # in_2: (P, J) = (8, 64); in_1: (L, C, 3, 3)
ON = O * N                      # 784 lanes per row: (o, n)
JC = J * C                      # 256 stage-1 contraction (rows of x)
CP = C * P                      # 32  stage-1 output rows (c, p)
LP = L * P                      # 256 output rows = final channel l*8+p
NT = 9                          # 3x3 taps of the folded double-unfold
KD = NT * CP                    # 288 stage-2 contraction rows (t, c, p)
GRID = 2                        # split output rows: 2 TCs on v7x, overlap writeback
SHIFT_DIRECTION = 1             # torch picks +/-1 at random; fixed deterministically
# TODO(synk): the module's shift_direction is random at init; kept deterministic (+1).
assert SHIFT_DIRECTION in (1, -1)
assert LP % GRID == 0


# ------------------------------ fused kernel ------------------------------- #
def _fused_kernel(x_ref, w2_ref, w1_ref, o_ref, tx_ref, r_ref):
    """x_ref : (JC, ON)       f32  rows (j, c), lanes (o, n)  (metadata reshape of x)
       w2_ref: (CP, JC)       bf16 block-diagonal stage-1 weight, rows (c, p)
       w1_ref: (LP/GRID, KD)  bf16 stage-2 weight slice, rows (l, p), cols (t, c, p)
       o_ref : (LP/GRID, ON)  f32  final layout: row = channel l*8+p, lanes (o, n)
       tx_ref: (CP, 2*ON)     bf16 stage-1 result duplicated along lanes (roll source)
       r_ref : (KD, ON)       bf16 stage-2 RHS
    """
    # ---- stage 1: single MXU matmul (CP, JC) @ (JC, ON) ----
    xb = x_ref[...].astype(jnp.bfloat16)
    t4 = jnp.dot(w2_ref[...], xb, preferred_element_type=jnp.float32)   # (CP, ON)
    t4b = t4.astype(jnp.bfloat16)

    # Duplicate t4 along lanes so any cyclic lane-roll becomes a static
    # contiguous window read (exact jnp.roll semantics, no pltpu.roll needed).
    tx_ref[:, 0:ON] = t4b
    tx_ref[:, ON:2 * ON] = t4b

    # ---- taps: 9 rolled + masked copies stacked along the K axis of r ----
    # Only the n-shift (unfold zero-padding) needs masking; the o-roll wraps.
    n_idx = jax.lax.broadcasted_iota(jnp.int32, (CP, ON), 1) % N
    mask = {-2: n_idx >= 2, -1: n_idx >= 1, 1: n_idx < N - 1, 2: n_idx < N - 2}

    for t in range(NT):
        j, k = divmod(t, 3)
        s = j + k - 2                                    # total n-shift of this tap
        roll_amt = (SHIFT_DIRECTION * N - s) % ON        # o-roll folded into tap roll
        start = ON - roll_amt
        piece = tx_ref[:, start:start + ON]              # == jnp.roll(t4b, roll_amt, -1)
        # valid iff 0 <= n+k-1 < N and 0 <= n+s < N; the two bounds never oppose
        # in sign, so a single comparison (the dominant offset) suffices.
        offs = (k - 1, s)
        m = min(offs) if max(offs) <= 0 else max(offs)
        if m != 0:
            piece = jnp.where(mask[m], piece, 0.0)
        r_ref[CP * t:CP * (t + 1), :] = piece            # 32 aligned contiguous rows

    # ---- stage 2: (LP/GRID, KD) @ (KD, ON); rows already (l, p), lanes (o, n) ----
    o_ref[...] = jnp.dot(w1_ref[...], r_ref[...], preferred_element_type=jnp.float32)


# --------------------------- one-time weight prep --------------------------- #
def prepare_weights(w1, w2):
    """Repack module parameters once, outside the jitted per-call path.

    w2bd[(c,p), (j,c')] = w2[p, j] * (c == c')          -> (32, 256) bf16
    w1r [(l,p), (t,c,q)] = w1[l, c, j, k] * (p == q)    -> (256, 288) bf16, t = j*3+k
    """
    eye_c = jnp.eye(C, dtype=jnp.float32)
    w2bd = jnp.einsum('pj,ce->cpje', w2.astype(jnp.float32), eye_c)
    w2bd = w2bd.reshape(CP, JC).astype(jnp.bfloat16)

    eye_p = jnp.eye(P, dtype=jnp.float32)
    w1r = jnp.einsum('lcjk,pq->lpjkcq', w1.astype(jnp.float32), eye_p)
    w1r = w1r.reshape(LP, KD).astype(jnp.bfloat16)
    return w1r, w2bd


# --------------------------------- forward --------------------------------- #
@jax.jit
def forward(x, w1r, w2bd):
    x2 = x.reshape(JC, ON)     # metadata-only: rows (j, c), lanes (o, n)

    out = pl.pallas_call(
        _fused_kernel,
        out_shape=jax.ShapeDtypeStruct((LP, ON), jnp.float32),
        grid=(GRID,),
        in_specs=[
            pl.BlockSpec((JC, ON), lambda i: (0, 0)),          # x (broadcast)
            pl.BlockSpec((CP, JC), lambda i: (0, 0)),          # stage-1 weight
            pl.BlockSpec((LP // GRID, KD), lambda i: (i, 0)),  # stage-2 weight slice
        ],
        out_specs=pl.BlockSpec((LP // GRID, ON), lambda i: (i, 0)),
        scratch_shapes=[
            pltpu.VMEM((CP, 2 * ON), jnp.bfloat16),            # duplicated t4
            pltpu.VMEM((KD, ON), jnp.bfloat16),                # stage-2 RHS
        ],
        compiler_params=pltpu.CompilerParams(
            dimension_semantics=("parallel",)),
    )(x2, w2bd, w1r)

    # (LP, ON) row-major is exactly (l*8+p, o, n): free metadata reshape.
    return out.reshape(1, LP, O, N)


# ------------------------ pure-JAX reference (checks) ----------------------- #
def _unfold_3x1_pad1(t):
    # torch.nn.functional.unfold(t, (3,1), padding=(1,0)) for t of shape (1,C,H,1)
    _, c, h, _ = t.shape
    tp = jnp.pad(t[..., 0], ((0, 0), (0, 0), (1, 1)))
    cols = jnp.stack([tp[:, :, a:a + h] for a in range(3)], axis=2)  # (1,C,3,H)
    return cols.reshape(1, c * 3, h)


def reference(x, w1, w2, shift=SHIFT_DIRECTION):
    hp = jax.lax.Precision.HIGHEST
    t3 = x.reshape(1, J, C, O, N)
    t4 = jnp.einsum('kjlmn,ij->kilmn', t3, w2, precision=hp)
    t5 = t4.reshape(1, P * C * O, N, 1)
    t5 = _unfold_3x1_pad1(t5)
    t5 = t5.reshape(1, P, C, O, 3, N)
    t5 = t5.reshape(1, P * C * O * 3, N, 1)
    t5 = _unfold_3x1_pad1(t5)
    t5 = t5.reshape(1, P, C, O, 3, 3, N)
    t6 = jnp.einsum('mpiojkn,lijk->mlpon', t5, w1, precision=hp)
    t7 = t6.reshape(1, L * P, O, N)
    return jnp.roll(t7, shift, axis=2)


if __name__ == "__main__":
    key = jax.random.PRNGKey(0)
    k1, k2, k3 = jax.random.split(key, 3)
    # shapes are hard-coded by the module's reshapes: x must hold 1*64*4*28*28 elems
    x = jax.random.normal(k1, (1, J, C, O, N), dtype=jnp.float32)
    w1 = jax.random.normal(k2, (L, C, 3, 3), dtype=jnp.float32)   # weights[0]
    w2 = jax.random.normal(k3, (P, J), dtype=jnp.float32)         # weights[1]

    w1r, w2bd = prepare_weights(w1, w2)   # one-time repack, outside the jitted path
    y = forward(x, w1r, w2bd)
    y = jax.block_until_ready(y)
    assert y.shape == (1, 256, 28, 28), y.shape

    y_ref = reference(x, w1, w2)
    rel_err = float(jnp.max(jnp.abs(y - y_ref)) / (jnp.max(jnp.abs(y_ref)) + 1e-6))
    # bf16 stage-1 inputs AND bf16 stage-2 operands -> ~1e-2 normalized max error
    # expected; 3e-2 gives margin while still catching layout/mask bugs.
    assert rel_err < 3e-2, f"mismatch vs reference: rel err {rel_err}"

    print("KERNEL_OK")
</pallas_src>

<mosaic_0001>
module attributes {stable_mosaic.version = 11 : i64} {
  func.func @_fused_kernel(%arg0: i32, %arg1: memref<256x784xf32, #tpu.memory_space<vmem>>, %arg2: memref<32x256xbf16, #tpu.memory_space<vmem>>, %arg3: memref<128x288xbf16, #tpu.memory_space<vmem>>, %arg4: memref<128x784xf32, #tpu.memory_space<vmem>>, %arg5: memref<32x1568xbf16, #tpu.memory_space<vmem>>, %arg6: memref<288x784xbf16, #tpu.memory_space<vmem>>) attributes {dimension_semantics = [#tpu.dimension_semantics<parallel>], iteration_bounds = array<i64: 2>, scalar_prefetch = 0 : i64, scratch_operands = 2 : i64, tpu.core_type = #tpu.core_type<tc>, window_params = [{pipeline_mode = #tpu.pipeline_mode<synchronous>, transform_indices = @transform_0, window_bounds = array<i64: 256, 784>}, {pipeline_mode = #tpu.pipeline_mode<synchronous>, transform_indices = @transform_1, window_bounds = array<i64: 32, 256>}, {transform_indices = @transform_2, window_bounds = array<i64: 128, 288>}, {transform_indices = @transform_3, window_bounds = array<i64: 128, 784>}]} {
    %c0 = arith.constant 0 : index
    %c0_0 = arith.constant 0 : index
    %0 = vector.load %arg1[%c0, %c0_0] : memref<256x784xf32, #tpu.memory_space<vmem>>, vector<256x784xf32>
    %1 = arith.truncf %0 : vector<256x784xf32> to vector<256x784xbf16>
    %c0_1 = arith.constant 0 : index
    %c0_2 = arith.constant 0 : index
    %2 = vector.load %arg2[%c0_1, %c0_2] : memref<32x256xbf16, #tpu.memory_space<vmem>>, vector<32x256xbf16>
    %cst = arith.constant dense<0.000000e+00> : vector<32x784xf32>
    %3 = tpu.matmul %2, %1, %cst {dimension_numbers = #tpu.dot_dimension_numbers<[1], [0], [0], [1], [0, 0, 1, 1], [], []>} : vector<32x256xbf16>, vector<256x784xbf16>, vector<32x784xf32> -> vector<32x784xf32>
    %4 = arith.truncf %3 : vector<32x784xf32> to vector<32x784xbf16>
    %c0_3 = arith.constant 0 : index
    %c0_4 = arith.constant 0 : index
    %5 = vector.load %arg5[%c0_3, %c0_4] : memref<32x1568xbf16, #tpu.memory_space<vmem>>, vector<32x784xbf16>
    tpu.vector_store %arg5[%c0_3, %c0_4], %4 {strides = array<i32>} : memref<32x1568xbf16, #tpu.memory_space<vmem>>, vector<32x784xbf16>,
    %c0_5 = arith.constant 0 : index
    %c784 = arith.constant 784 : index
    %6 = vector.load %arg5[%c0_5, %c784] : memref<32x1568xbf16, #tpu.memory_space<vmem>>, vector<32x784xbf16>
    tpu.vector_store %arg5[%c0_5, %c784], %4 {strides = array<i32>} : memref<32x1568xbf16, #tpu.memory_space<vmem>>, vector<32x784xbf16>,
    %7 = tpu.iota {dimensions = array<i32: 1>} : vector<32x784xi32>
    %c28_i32 = arith.constant 28 : i32
    %c0_i32 = arith.constant 0 : i32
    %8 = arith.cmpi eq, %c28_i32, %c0_i32 : i32
    %c1_i32 = arith.constant 1 : i32
    %9 = arith.select %8, %c1_i32, %c28_i32 : i32
    %10 = vector.broadcast %9 : i32 to vector<32x784xi32>
    %11 = arith.remsi %7, %10 : vector<32x784xi32>
    %c0_i32_6 = arith.constant 0 : i32
    %12 = vector.broadcast %c0_i32_6 : i32 to vector<32x784xi32>
    %13 = arith.cmpi ne, %11, %12 : vector<32x784xi32>
    %c0_i32_7 = arith.constant 0 : i32
    %14 = vector.broadcast %c0_i32_7 : i32 to vector<32x784xi32>
    %15 = arith.cmpi slt, %11, %14 : vector<32x784xi32>
    %c0_i32_8 = arith.constant 0 : i32
    %16 = arith.cmpi slt, %9, %c0_i32_8 : i32
    %17 = vector.broadcast %16 : i1 to vector<32x784xi1>
    %18 = vector.broadcast %17 : vector<32x784xi1> to vector<32x784xi1>
    %19 = arith.xori %15, %18 : vector<32x784xi1>
    %20 = arith.andi %19, %13 : vector<32x784xi1>
    %21 = vector.broadcast %9 : i32 to vector<32x784xi32>
    %22 = arith.addi %11, %21 : vector<32x784xi32>
    %23 = arith.select %20, %22, %11 : vector<32x784xi1>, vector<32x784xi32>
    %c2_i32 = arith.constant 2 : i32
    %24 = vector.broadcast %c2_i32 : i32 to vector<32x784xi32>
    %25 = arith.cmpi sge, %23, %24 : vector<32x784xi32>
    %c1_i32_9 = arith.constant 1 : i32
    %26 = vector.broadcast %c1_i32_9 : i32 to vector<32x784xi32>
    %27 = arith.cmpi sge, %23, %26 : vector<32x784xi32>
    %c27_i32 = arith.constant 27 : i32
    %28 = vector.broadcast %c27_i32 : i32 to vector<32x784xi32>
    %29 = arith.cmpi slt, %23, %28 : vector<32x784xi32>
    %c26_i32 = arith.constant 26 : i32
    %30 = vector.broadcast %c26_i32 : i32 to vector<32x784xi32>
    %31 = arith.cmpi slt, %23, %30 : vector<32x784xi32>
    %c0_10 = arith.constant 0 : index
    %c754 = arith.constant 754 : index
    %32 = vector.load %arg5[%c0_10, %c754] : memref<32x1568xbf16, #tpu.memory_space<vmem>>, vector<32x784xbf16>
    %cst_11 = arith.constant 0.000000e+00 : f32
    %33 = arith.truncf %cst_11 : f32 to bf16
    %34 = vector.broadcast %33 : bf16 to vector<32x784xbf16>
    %35 = arith.select %25, %32, %34 : vector<32x784xi1>, vector<32x784xbf16>
    %c0_12 = arith.constant 0 : index
    %c0_13 = arith.constant 0 : index
    %36 = vector.load %arg6[%c0_12, %c0_13] : memref<288x784xbf16, #tpu.memory_space<vmem>>, vector<32x784xbf16>
    tpu.vector_store %arg6[%c0_12, %c0_13], %35 {strides = array<i32>} : memref<288x784xbf16, #tpu.memory_space<vmem>>, vector<32x784xbf16>,
    %c0_14 = arith.constant 0 : index
    %c755 = arith.constant 755 : index
    %37 = vector.load %arg5[%c0_14, %c755] : memref<32x1568xbf16, #tpu.memory_space<vmem>>, vector<32x784xbf16>
    %cst_15 = arith.constant 0.000000e+00 : f32
    %38 = arith.truncf %cst_15 : f32 to bf16
    %39 = vector.broadcast %38 : bf16 to vector<32x784xbf16>
    %40 = arith.select %27, %37, %39 : vector<32x784xi1>, vector<32x784xbf16>
    %c32 = arith.constant 32 : index
    %c0_16 = arith.constant 0 : index
    %41 = vector.load %arg6[%c32, %c0_16] : memref<288x784xbf16, #tpu.memory_space<vmem>>, vector<32x784xbf16>
    tpu.vector_store %arg6[%c32, %c0_16], %40 {strides = array<i32>} : memref<288x784xbf16, #tpu.memory_space<vmem>>, vector<32x784xbf16>,
    %c0_17 = arith.constant 0 : index
    %c756 = arith.constant 756 : index
    %42 = vector.load %arg5[%c0_17, %c756] : memref<32x1568xbf16, #tpu.memory_space<vmem>>, vector<32x784xbf16>
    %cst_18 = arith.constant 0.000000e+00 : f32
    %43 = arith.truncf %cst_18 : f32 to bf16
    %44 = vector.broadcast %43 : bf16 to vector<32x784xbf16>
    %45 = arith.select %29, %42, %44 : vector<32x784xi1>, vector<32x784xbf16>
    %c64 = arith.constant 64 : index
    %c0_19 = arith.constant 0 : index
    %46 = vector.load %arg6[%c64, %c0_19] : memref<288x784xbf16, #tpu.memory_space<vmem>>, vector<32x784xbf16>
    tpu.vector_store %arg6[%c64, %c0_19], %45 {strides = array<i32>} : memref<288x784xbf16, #tpu.memory_space<vmem>>, vector<32x784xbf16>,
    %c0_20 = arith.constant 0 : index
    %c755_21 = arith.constant 755 : index
    %47 = vector.load %arg5[%c0_20, %c755_21] : memref<32x1568xbf16, #tpu.memory_space<vmem>>, vector<32x784xbf16>
    %cst_22 = arith.constant 0.000000e+00 : f32
    %48 = arith.truncf %cst_22 : f32 to bf16
    %49 = vector.broadcast %48 : bf16 to vector<32x784xbf16>
    %50 = arith.select %27, %47, %49 : vector<32x784xi1>, vector<32x784xbf16>
    %c96 = arith.constant 96 : index
    %c0_23 = arith.constant 0 : index
    %51 = vector.load %arg6[%c96, %c0_23] : memref<288x784xbf16, #tpu.memory_space<vmem>>, vector<32x784xbf16>
    tpu.vector_store %arg6[%c96, %c0_23], %50 {strides = array<i32>} : memref<288x784xbf16, #tpu.memory_space<vmem>>, vector<32x784xbf16>,
    %c0_24 = arith.constant 0 : index
    %c756_25 = arith.constant 756 : index
    %52 = vector.load %arg5[%c0_24, %c756_25] : memref<32x1568xbf16, #tpu.memory_space<vmem>>, vector<32x784xbf16>
    %c128 = arith.constant 128 : index
    %c0_26 = arith.constant 0 : index
    %53 = vector.load %arg6[%c128, %c0_26] : memref<288x784xbf16, #tpu.memory_space<vmem>>, vector<32x784xbf16>
    tpu.vector_store %arg6[%c128, %c0_26], %52 {strides = array<i32>} : memref<288x784xbf16, #tpu.memory_space<vmem>>, vector<32x784xbf16>,
    %c0_27 = arith.constant 0 : index
    %c757 = arith.constant 757 : index
    %54 = vector.load %arg5[%c0_27, %c757] : memref<32x1568xbf16, #tpu.memory_space<vmem>>, vector<32x784xbf16>
    %cst_28 = arith.constant 0.000000e+00 : f32
    %55 = arith.truncf %cst_28 : f32 to bf16
    %56 = vector.broadcast %55 : bf16 to vector<32x784xbf16>
    %57 = arith.select %29, %54, %56 : vector<32x784xi1>, vector<32x784xbf16>
    %c160 = arith.constant 160 : index
    %c0_29 = arith.constant 0 : index
    %58 = vector.load %arg6[%c160, %c0_29] : memref<288x784xbf16, #tpu.memory_space<vmem>>, vector<32x784xbf16>
    tpu.vector_store %arg6[%c160, %c0_29], %57 {strides = array<i32>} : memref<288x784xbf16, #tpu.memory_space<vmem>>, vector<32x784xbf16>,
    %c0_30 = arith.constant 0 : index
    %c756_31 = arith.constant 756 : index
    %59 = vector.load %arg5[%c0_30, %c756_31] : memref<32x1568xbf16, #tpu.memory_space<vmem>>, vector<32x784xbf16>
    %cst_32 = arith.constant 0.000000e+00 : f32
    %60 = arith.truncf %cst_32 : f32 to bf16
    %61 = vector.broadcast %60 : bf16 to vector<32x784xbf16>
    %62 = arith.select %27, %59, %61 : vector<32x784xi1>, vector<32x784xbf16>
    %c192 = arith.constant 192 : index
    %c0_33 = arith.constant 0 : index
    %63 = vector.load %arg6[%c192, %c0_33] : memref<288x784xbf16, #tpu.memory_space<vmem>>, vector<32x784xbf16>
    tpu.vector_store %arg6[%c192, %c0_33], %62 {strides = array<i32>} : memref<288x784xbf16, #tpu.memory_space<vmem>>, vector<32x784xbf16>,
    %c0_34 = arith.constant 0 : index
    %c757_35 = arith.constant 757 : index
    %64 = vector.load %arg5[%c0_34, %c757_35] : memref<32x1568xbf16, #tpu.memory_space<vmem>>, vector<32x784xbf16>
    %cst_36 = arith.constant 0.000000e+00 : f32
    %65 = arith.truncf %cst_36 : f32 to bf16
    %66 = vector.broadcast %65 : bf16 to vector<32x784xbf16>
    %67 = arith.select %29, %64, %66 : vector<32x784xi1>, vector<32x784xbf16>
    %c224 = arith.constant 224 : index
    %c0_37 = arith.constant 0 : index
    %68 = vector.load %arg6[%c224, %c0_37] : memref<288x784xbf16, #tpu.memory_space<vmem>>, vector<32x784xbf16>
    tpu.vector_store %arg6[%c224, %c0_37], %67 {strides = array<i32>} : memref<288x784xbf16, #tpu.memory_space<vmem>>, vector<32x784xbf16>,
    %c0_38 = arith.constant 0 : index
    %c758 = arith.constant 758 : index
    %69 = vector.load %arg5[%c0_38, %c758] : memref<32x1568xbf16, #tpu.memory_space<vmem>>, vector<32x784xbf16>
    %cst_39 = arith.constant 0.000000e+00 : f32
    %70 = arith.truncf %cst_39 : f32 to bf16
    %71 = vector.broadcast %70 : bf16 to vector<32x784xbf16>
    %72 = arith.select %31, %69, %71 : vector<32x784xi1>, vector<32x784xbf16>
    %c256 = arith.constant 256 : index
    %c0_40 = arith.constant 0 : index
    %73 = vector.load %arg6[%c256, %c0_40] : memref<288x784xbf16, #tpu.memory_space<vmem>>, vector<32x784xbf16>
    tpu.vector_store %arg6[%c256, %c0_40], %72 {strides = array<i32>} : memref<288x784xbf16, #tpu.memory_space<vmem>>, vector<32x784xbf16>,
    %c0_41 = arith.constant 0 : index
    %c0_42 = arith.constant 0 : index
    %74 = vector.load %arg3[%c0_41, %c0_42] : memref<128x288xbf16, #tpu.memory_space<vmem>>, vector<128x288xbf16>
    %c0_43 = arith.constant 0 : index
    %c0_44 = arith.constant 0 : index
    %75 = vector.load %arg6[%c0_43, %c0_44] : memref<288x784xbf16, #tpu.memory_space<vmem>>, vector<288x784xbf16>
    %cst_45 = arith.constant dense<0.000000e+00> : vector<128x784xf32>
    %76 = tpu.matmul %74, %75, %cst_45 {dimension_numbers = #tpu.dot_dimension_numbers<[1], [0], [0], [1], [0, 0, 1, 1], [], []>} : vector<128x288xbf16>, vector<288x784xbf16>, vector<128x784xf32> -> vector<128x784xf32>
    %c0_46 = arith.constant 0 : index
    %c0_47 = arith.constant 0 : index
    %77 = vector.load %arg4[%c0_46, %c0_47] : memref<128x784xf32, #tpu.memory_space<vmem>>, vector<128x784xf32>
    tpu.vector_store %arg4[%c0_46, %c0_47], %76 {strides = array<i32>} : memref<128x784xf32, #tpu.memory_space<vmem>>, vector<128x784xf32>,
    return
  }
  func.func @transform_0(%arg0: i32) -> (i32, i32) {
    %c0_i32 = arith.constant 0 : i32
    %c0_i32_0 = arith.constant 0 : i32
    %c0_i32_1 = arith.constant 0 : i32
    return %c0_i32, %c0_i32_0 : i32, i32
  }
  func.func @transform_1(%arg0: i32) -> (i32, i32) {
    %c0_i32 = arith.constant 0 : i32
    %c0_i32_0 = arith.constant 0 : i32
    %c0_i32_1 = arith.constant 0 : i32
    return %c0_i32, %c0_i32_0 : i32, i32
  }
  func.func @transform_2(%arg0: i32) -> (i32, i32) {
    %c0_i32 = arith.constant 0 : i32
    %c0_i32_0 = arith.constant 0 : i32
    return %arg0, %c0_i32 : i32, i32
  }
  func.func @transform_3(%arg0: i32) -> (i32, i32) {
    %c0_i32 = arith.constant 0 : i32
    %c0_i32_0 = arith.constant 0 : i32
    return %arg0, %c0_i32 : i32, i32
  }
}

</mosaic_0001>

<bundles_post_ra>
// kernel: forward.1
= control target key start
LH: loop header
LB: loop body
LE: loop exit
PB: predicated region body
PF: predicated region fallthrough
CT: control target
= control target key end

     0   :  { %s5244_s12 = smov 0   ;;  %s8929_s0 = inlined_call_operand.vmem [shape: f32[256,784], index: 0, kind: input, shape index: {}]   ;;  %s8930_s1 = inlined_call_operand.vmem [shape: bf16[32,256], index: 1, kind: input, shape index: {}]   ;;  %s8931_s2 = inlined_call_operand.vmem [shape: bf16[256,288], index: 2, kind: input, shape index: {}]   ;;  %s8932_s3 = inlined_call_operand.vmem [shape: f32[256,784], index: 3, kind: output, shape index: {}]  }
   0x1 LB: > { %s4710_s13 = sadd.s32 4294967295, %s5210_s12   ;;  %p4714_p0 = scmp.ge.s32.totalorder %s5210_s12, 1  ;;  %s5210_s12 = sphi %s5244_s12, %s13_s12  }
   0x2   : > { %p139_p1 = scmp.lt.s32.totalorder %s5210_s12, 3 }
   0x4   : > { %p140_p2 = pnand %p4714_p0, %p139_p1 }
   0x6   : > { %143 = sbr.rel (%p140_p2) target bundleno = 1208 (0x4b8), region = 32 }
   0xb   : > { %v281_v0 = vld [vmem:[%s8929_s0 + $0x318] sm:$0xff]  ;;  %v288_v1 = vld [vmem:[%s8929_s0 + $0x350] sm:$0xff]  ;;  %v283_v2 = vld [vmem:[%s8929_s0 + $0x328] sm:$0xff]  ;;  %s5213_s28 = smov 115   ;;  %s5214_s20 = smov 116  }
   0xc   : > { %v456_v3 = vpack.c.bf16 %v288_v1, %v281_v0  ;;  %v290_v4 = vld [vmem:[%s8929_s0 + $0x360] sm:$0xff]  ;;  %v280_v5 = vld [vmem:[%s8929_s0 + $0x310] sm:$0xff]  ;;  %v287_v6 = vld [vmem:[%s8929_s0 + $0x348] sm:$0xff]  ;;  %s5215_s11 = smov 114   ;;  %s5216_s23 = smov 117  }
   0xd   : > { %v458_v7 = vpack.c.bf16 %v290_v4, %v283_v2  ;;  %v455_v8 = vpack.c.bf16 %v287_v6, %v280_v5  ;;  %v282_v9 = vld [vmem:[%s8929_s0 + $0x320] sm:$0xff]  ;;  %v289_v10 = vld [vmem:[%s8929_s0 + $0x358] sm:$0xff]  ;;  %v267_v11 = vld [vmem:[%s8929_s0 + $0x2a8] sm:$0xff]  ;;  %s5217_s6 = smov 118   ;;  %s5218_s10 = smov 16  }
   0xe   : > { %542 = vmatprep.subr.bf16.mxu0 %v456_v3  ;;  %v457_v12 = vpack.c.bf16 %v289_v10, %v282_v9  ;;  %v274_v13 = vld [vmem:[%s8929_s0 + $0x2e0] sm:$0xff]  ;;  %v269_v14 = vld [vmem:[%s8929_s0 + $0x2b8] sm:$0xff]  ;;  %v276_v15 = vld [vmem:[%s8929_s0 + $0x2f0] sm:$0xff]  ;;  %s5219_s14 = smov 13   ;;  %s5220_s15 = smov 12  }
   0xf   : > { %595 = vmatprep.subr.bf16.mxu1 %v458_v7  ;;  %543 = vmatpush1.bf16.msra.mxu0 %v455_v8  ;;  %v449_v16 = vpack.c.bf16 %v274_v13, %v267_v11  ;;  %v451_v17 = vpack.c.bf16 %v276_v15, %v269_v14  ;;  %v266_v18 = vld [vmem:[%s8929_s0 + $0x2a0] sm:$0xff]  ;;  %v273_v19 = vld [vmem:[%s8929_s0 + $0x2d8] sm:$0xff]  ;;  %v268_v20 = vld [vmem:[%s8929_s0 + $0x2b0] sm:$0xff]  ;;  %s5221_s16 = smov 14   ;;  %s5222_s17 = smov 11  }
  0x10   : > { %596 = vmatpush1.bf16.msra.mxu1 %v457_v12  ;;  %v448_v21 = vpack.c.bf16 %v273_v19, %v266_v18  ;;  %v275_v22 = vld [vmem:[%s8929_s0 + $0x2e8] sm:$0xff]  ;;  %v253_v23 = vld [vmem:[%s8929_s0 + $0x238] sm:$0xff]  ;;  %v260_v24 = vld [vmem:[%s8929_s0 + $0x270] sm:$0xff]  ;;  %s5223_s18 = smov 10  }
  0x11   : > { %544 = vmatprep.subr.bf16.mxu0 %v449_v16  ;;  %597 = vmatprep.subr.bf16.mxu1 %v451_v17  ;;  %v450_v25 = vpack.c.bf16 %v275_v22, %v268_v20  ;;  %v442_v26 = vpack.c.bf16 %v260_v24, %v253_v23  ;;  %v255_v27 = vld [vmem:[%s8929_s0 + $0x248] sm:$0xff]  ;;  %v262_v28 = vld [vmem:[%s8929_s0 + $0x280] sm:$0xff]  ;;  %v252_v29 = vld [vmem:[%s8929_s0 + $0x230] sm:$0xff] }
  0x12   : > { %v444_v30 = vpack.c.bf16 %v262_v28, %v255_v27  ;;  %v259_v31 = vld [vmem:[%s8929_s0 + $0x268] sm:$0xff]  ;;  %v254_v32 = vld [vmem:[%s8929_s0 + $0x240] sm:$0xff]  ;;  %v261_v33 = vld [vmem:[%s8929_s0 + $0x278] sm:$0xff] }
  0x13   : > { %545 = vmatpush1.bf16.msra.mxu0 %v448_v21  ;;  %v441_v34 = vpack.c.bf16 %v259_v31, %v252_v29  ;;  %v239_v35 = vld [vmem:[%s8929_s0 + $0x1c8] sm:$0xff]  ;;  %v246_v36 = vld [vmem:[%s8929_s0 + $0x200] sm:$0xff]  ;;  %v241_v37 = vld [vmem:[%s8929_s0 + $0x1d8] sm:$0xff]  ;;  %v443_v38 = vpack.c.bf16 %v261_v33, %v254_v32 }
  0x14   : > { %598 = vmatpush1.bf16.msra.mxu1 %v450_v25  ;;  %546 = vmatprep.subr.bf16.mxu0 %v442_v26  ;;  %v435_v39 = vpack.c.bf16 %v246_v36, %v239_v35  ;;  %v248_v40 = vld [vmem:[%s8929_s0 + $0x210] sm:$0xff]  ;;  %v238_v41 = vld [vmem:[%s8929_s0 + $0x1c0] sm:$0xff]  ;;  %v245_v42 = vld [vmem:[%s8929_s0 + $0x1f8] sm:$0xff] }
  0x15   : > { %599 = vmatprep.subr.bf16.mxu1 %v444_v30  ;;  %v437_v43 = vpack.c.bf16 %v248_v40, %v241_v37  ;;  %v240_v44 = vld [vmem:[%s8929_s0 + $0x1d0] sm:$0xff]  ;;  %v247_v45 = vld [vmem:[%s8929_s0 + $0x208] sm:$0xff]  ;;  %v225_v46 = vld [vmem:[%s8929_s0 + $0x158] sm:$0xff]  ;;  %v434_v50 = vpack.c.bf16 %v245_v42, %v238_v41 }
  0x16   : > { %v232_v47 = vld [vmem:[%s8929_s0 + $0x190] sm:$0xff]  ;;  %v227_v48 = vld [vmem:[%s8929_s0 + $0x168] sm:$0xff]  ;;  %v234_v49 = vld [vmem:[%s8929_s0 + $0x1a0] sm:$0xff]  ;;  %v436_v51 = vpack.c.bf16 %v247_v45, %v240_v44 }
  0x17   : > { %547 = vmatpush1.bf16.msra.mxu0 %v441_v34  ;;  %v428_v52 = vpack.c.bf16 %v232_v47, %v225_v46  ;;  %v224_v53 = vld [vmem:[%s8929_s0 + $0x150] sm:$0xff]  ;;  %v231_v54 = vld [vmem:[%s8929_s0 + $0x188] sm:$0xff]  ;;  %v226_v55 = vld [vmem:[%s8929_s0 + $0x160] sm:$0xff]  ;;  %v430_v56 = vpack.c.bf16 %v234_v49, %v227_v48  ;;  %v961_v46 = vlaneseq }
  0x18   : > { %600 = vmatpush1.bf16.msra.mxu1 %v443_v38  ;;  %548 = vmatprep.subr.bf16.mxu0 %v435_v39  ;;  %v233_v57 = vld [vmem:[%s8929_s0 + $0x198] sm:$0xff]  ;;  %v211_v58 = vld [vmem:[%s8929_s0 + $0xe8] sm:$0xff]  ;;  %v218_v59 = vld [vmem:[%s8929_s0 + $0x120] sm:$0xff]  ;;  %v427_v62 = vpack.c.bf16 %v231_v54, %v224_v53 }
  0x19   : > { %601 = vmatprep.subr.bf16.mxu1 %v437_v43  ;;  %v213_v60 = vld [vmem:[%s8929_s0 + $0xf8] sm:$0xff]  ;;  %v220_v61 = vld [vmem:[%s8929_s0 + $0x130] sm:$0xff]  ;;  %v429_v63 = vpack.c.bf16 %v233_v57, %v226_v55  ;;  %v421_v0 = vpack.c.bf16 %v218_v59, %v211_v58  ;;  %v210_v1 = vld [vmem:[%s8929_s0 + $0xe0] sm:$0xff]  ;;  %v5504_v59 = vand.u32 127, %v961_v46 }
  0x1a   : > { %v217_v2 = vld [vmem:[%s8929_s0 + $0x118] sm:$0xff]  ;;  %v212_v3 = vld [vmem:[%s8929_s0 + $0xf0] sm:$0xff]  ;;  %v423_v4 = vpack.c.bf16 %v220_v61, %v213_v60  ;;  %v219_v5 = vld [vmem:[%s8929_s0 + $0x128] sm:$0xff] }
  0x1b   : > { %549 = vmatpush1.bf16.msra.mxu0 %v434_v50  ;;  %v197_v6 = vld [vmem:[%s8929_s0 + $0x78] sm:$0xff]  ;;  %v204_v7 = vld [vmem:[%s8929_s0 + $0xb0] sm:$0xff]  ;;  %v199_v8 = vld [vmem:[%s8929_s0 + $0x88] sm:$0xff]  ;;  %v420_v10 = vpack.c.bf16 %v217_v2, %v210_v1  ;;  %v422_v11 = vpack.c.bf16 %v219_v5, %v212_v3 }
  0x1c   : > { %602 = vmatpush1.bf16.msra.mxu1 %v436_v51  ;;  %550 = vmatprep.subr.bf16.mxu0 %v428_v52  ;;  %v206_v9 = vld [vmem:[%s8929_s0 + $0xc0] sm:$0xff]  ;;  %v414_v12 = vpack.c.bf16 %v204_v7, %v197_v6  ;;  %v196_v13 = vld [vmem:[%s8929_s0 + $0x70] sm:$0xff]  ;;  %v203_v14 = vld [vmem:[%s8929_s0 + $0xa8] sm:$0xff] }
  0x1d   : > { %603 = vmatprep.subr.bf16.mxu1 %v430_v56  ;;  %v198_v15 = vld [vmem:[%s8929_s0 + $0x80] sm:$0xff]  ;;  %v416_v16 = vpack.c.bf16 %v206_v9, %v199_v8  ;;  %v205_v17 = vld [vmem:[%s8929_s0 + $0xb8] sm:$0xff]  ;;  %v183_v18 = vld [vmem:[%s8929_s0 + $0x8] sm:$0xff]  ;;  %v413_v22 = vpack.c.bf16 %v203_v14, %v196_v13  ;;  %v5531_v8 = vadd.s32 256, %v5504_v59 }
  0x1e   : > { %v190_v19 = vld [vmem:[%s8929_s0 + $0x40] sm:$0xff]  ;;  %v185_v20 = vld [vmem:[%s8929_s0 + $0x18] sm:$0xff]  ;;  %v192_v21 = vld [vmem:[%s8929_s0 + $0x50] sm:$0xff]  ;;  %v415_v23 = vpack.c.bf16 %v205_v17, %v198_v15  ;;  %v5549_v17 = vadd.s32 384, %v5504_v59 }
  0x1f   : > { %551 = vmatpush1.bf16.msra.mxu0 %v427_v62  ;;  %v407_v24 = vpack.c.bf16 %v190_v19, %v183_v18  ;;  %v182_v25 = vld [vmem:[%s8929_s0] sm:$0xff]  ;;  %v189_v26 = vld [vmem:[%s8929_s0 + $0x38] sm:$0xff]  ;;  %v184_v27 = vld [vmem:[%s8929_s0 + $0x10] sm:$0xff]  ;;  %v409_v28 = vpack.c.bf16 %v192_v21, %v185_v20 }
  0x20   : > { %604 = vmatpush1.bf16.msra.mxu1 %v429_v63  ;;  %552 = vmatprep.subr.bf16.mxu0 %v421_v0  ;;  %v191_v29 = vld [vmem:[%s8929_s0 + $0x48] sm:$0xff]  ;;  %v393_v30 = vld [vmem:[%s8929_s0 + $0x698] sm:$0xff]  ;;  %v400_v31 = vld [vmem:[%s8929_s0 + $0x6d0] sm:$0xff]  ;;  %v406_v34 = vpack.c.bf16 %v189_v26, %v182_v25 }
  0x21   : > { %605 = vmatprep.subr.bf16.mxu1 %v423_v4  ;;  %v395_v32 = vld [vmem:[%s8929_s0 + $0x6a8] sm:$0xff]  ;;  %v402_v33 = vld [vmem:[%s8929_s0 + $0x6e0] sm:$0xff]  ;;  %v408_v35 = vpack.c.bf16 %v191_v29, %v184_v27  ;;  %v512_v36 = vpack.c.bf16 %v400_v31, %v393_v30  ;;  %v392_v37 = vld [vmem:[%s8929_s0 + $0x690] sm:$0xff] }
  0x22   : > { %v399_v38 = vld [vmem:[%s8929_s0 + $0x6c8] sm:$0xff]  ;;  %v394_v39 = vld [vmem:[%s8929_s0 + $0x6a0] sm:$0xff]  ;;  %v514_v40 = vpack.c.bf16 %v402_v33, %v395_v32  ;;  %v401_v41 = vld [vmem:[%s8929_s0 + $0x6d8] sm:$0xff]  ;;  %v5582_v32 = vmul.u32.u64.low 2454267026, %v5549_v17  ;;  %v5583_v33 = vmul.u32.u64.high 2454267026, %v5549_v17, %v5582_v32 }
  0x23   : > { %553 = vmatpush1.bf16.msra.mxu0 %v420_v10  ;;  %v379_v42 = vld [vmem:[%s8929_s0 + $0x628] sm:$0xff]  ;;  %v386_v43 = vld [vmem:[%s8929_s0 + $0x660] sm:$0xff]  ;;  %v381_v44 = vld [vmem:[%s8929_s0 + $0x638] sm:$0xff]  ;;  %v511_v47 = vpack.c.bf16 %v399_v38, %v392_v37  ;;  %v513_v48 = vpack.c.bf16 %v401_v41, %v394_v39  ;;  %v5593_v37 = vadd.s32 128, %v5504_v59 }
  0x24   : > { %606 = vmatpush1.bf16.msra.mxu1 %v422_v11  ;;  %554 = vmatprep.subr.bf16.mxu0 %v414_v12  ;;  %v388_v45 = vld [vmem:[%s8929_s0 + $0x670] sm:$0xff]  ;;  %v505_v49 = vpack.c.bf16 %v386_v43, %v379_v42  ;;  %v378_v50 = vld [vmem:[%s8929_s0 + $0x620] sm:$0xff]  ;;  %v385_v51 = vld [vmem:[%s8929_s0 + $0x658] sm:$0xff]  ;;  %v5603_v41 = vmul.u32.u64.low 2454267026, %v5504_v59  ;;  %v5604_v42 = vmul.u32.u64.high 2454267026, %v5504_v59, %v5603_v41 }
  0x25   : > { %607 = vmatprep.subr.bf16.mxu1 %v416_v16  ;;  %v380_v52 = vld [vmem:[%s8929_s0 + $0x630] sm:$0xff]  ;;  %v507_v53 = vpack.c.bf16 %v388_v45, %v381_v44  ;;  %v387_v54 = vld [vmem:[%s8929_s0 + $0x668] sm:$0xff]  ;;  %v365_v55 = vld [vmem:[%s8929_s0 + $0x5b8] sm:$0xff]  ;;  %v504_v60 = vpack.c.bf16 %v385_v51, %v378_v50  ;;  %vm1017_vm1 = vc.u32 %v5582_v32, 2454267026 }
  0x26   : > { %v372_v56 = vld [vmem:[%s8929_s0 + $0x5f0] sm:$0xff]  ;;  %v367_v57 = vld [vmem:[%s8929_s0 + $0x5c8] sm:$0xff]  ;;  %v374_v58 = vld [vmem:[%s8929_s0 + $0x600] sm:$0xff]  ;;  %v506_v61 = vpack.c.bf16 %v387_v54, %v380_v52  ;;  %v8950_v52 = vmov 0   ;;  %vm975_vm2 = vc.u32 %v5603_v41, 2454267026 }
  0x27   : > { %555 = vmatpush1.bf16.msra.mxu0 %v413_v22  ;;  %v498_v62 = vpack.c.bf16 %v372_v56, %v365_v55  ;;  %v364_v63 = vld [vmem:[%s8929_s0 + $0x5b0] sm:$0xff]  ;;  %v371_v0 = vld [vmem:[%s8929_s0 + $0x5e8] sm:$0xff]  ;;  %v366_v1 = vld [vmem:[%s8929_s0 + $0x5c0] sm:$0xff]  ;;  %v500_v2 = vpack.c.bf16 %v374_v58, %v367_v57  ;;  %v5627_v54 = vmul.u32.u64.low 2454267026, %v5593_v37  ;;  %v5628_v55 = vmul.u32.u64.high 2454267026, %v5593_v37, %v5627_v54 }
  0x28   : > { %608 = vmatpush1.bf16.msra.mxu1 %v415_v23  ;;  %556 = vmatprep.subr.bf16.mxu0 %v407_v24  ;;  %v373_v3 = vld [vmem:[%s8929_s0 + $0x5f8] sm:$0xff]  ;;  %v351_v4 = vld [vmem:[%s8929_s0 + $0x548] sm:$0xff]  ;;  %v358_v5 = vld [vmem:[%s8929_s0 + $0x580] sm:$0xff]  ;;  %v497_v9 = vpack.c.bf16 %v371_v0, %v364_v63  ;;  %v5566_v23 = vmul.u32.u64.low 2454267026, %v5531_v8  ;;  %v5567_v24 = vmul.u32.u64.high 2454267026, %v5531_v8, %v5566_v23 }
  0x29   : > { %609 = vmatprep.subr.bf16.mxu1 %v409_v28  ;;  %v353_v6 = vld [vmem:[%s8929_s0 + $0x558] sm:$0xff]  ;;  %v360_v7 = vld [vmem:[%s8929_s0 + $0x590] sm:$0xff]  ;;  %v350_v10 = vld [vmem:[%s8929_s0 + $0x540] sm:$0xff]  ;;  %v499_v12 = vpack.c.bf16 %v373_v3, %v366_v1  ;;  %v491_v13 = vpack.c.bf16 %v358_v5, %v351_v4  ;;  %vm989_vm3 = vc.u32 %v5627_v54, 2454267026 }
  0x2a   : > { %v357_v11 = vld [vmem:[%s8929_s0 + $0x578] sm:$0xff]  ;;  %v352_v14 = vld [vmem:[%s8929_s0 + $0x550] sm:$0xff]  ;;  %v359_v15 = vld [vmem:[%s8929_s0 + $0x588] sm:$0xff]  ;;  %v493_v18 = vpack.c.bf16 %v360_v7, %v353_v6  ;;  %vm1003_vm0 = vc.u32 %v5566_v23, 2454267026  ;;  %v5658_v7 = vadd.s32 512, %v5504_v59 }
  0x2b   : > { %557 = vmatpush1.bf16.msra.mxu0 %v406_v34  ;;  %v337_v16 = vld [vmem:[%s8929_s0 + $0x4d8] sm:$0xff]  ;;  %v344_v19 = vld [vmem:[%s8929_s0 + $0x510] sm:$0xff]  ;;  %v339_v20 = vld [vmem:[%s8929_s0 + $0x4e8] sm:$0xff]  ;;  %v490_v25 = vpack.c.bf16 %v357_v11, %v350_v10  ;;  %v492_v27 = vpack.c.bf16 %v359_v15, %v352_v14  ;;  %v976_v11 = vsel %vm975_vm2, 1, %v8950_v52  ;;  %v5670_v14 = vadd.s32 640, %v5504_v59 }
  0x2c   : > { %610 = vmatpush1.bf16.msra.mxu1 %v408_v35  ;;  %558 = vmatprep.subr.bf16.mxu0 %v512_v36  ;;  %v346_v21 = vld [vmem:[%s8929_s0 + $0x520] sm:$0xff]  ;;  %v336_v26 = vld [vmem:[%s8929_s0 + $0x4d0] sm:$0xff]  ;;  %v484_v28 = vpack.c.bf16 %v344_v19, %v337_v16  ;;  %v343_v29 = vld [vmem:[%s8929_s0 + $0x508] sm:$0xff]  ;;  %v990_v23 = vsel %vm989_vm3, 1, %v8950_v52 }
  0x2d   : > { %611 = vmatprep.subr.bf16.mxu1 %v514_v40  ;;  %v5563_v22 = vld [vmem:[%s8930_s1 + $0x4] ss:$8 sps:$4 sm:$0xff]   ;;  %v345_v31 = vld [vmem:[%s8929_s0 + $0x518] sm:$0xff]  ;;  %v486_v34 = vpack.c.bf16 %v346_v21, %v339_v20  ;;  %v332_v39 = vld [vmem:[%s8929_s0 + $0x4b0] sm:$0xff]  ;;  %v483_v40 = vpack.c.bf16 %v343_v29, %v336_v26 }
  0x2e   : > { %v338_v30 = vld [vmem:[%s8929_s0 + $0x4e0] sm:$0xff]  ;;  %v323_v35 = vld [vmem:[%s8929_s0 + $0x468] sm:$0xff]  ;;  %574 = vmatprep.mubr.bf16.mxu0 %v5563_v22  ;;  %v325_v38 = vld [vmem:[%s8929_s0 + $0x478] sm:$0xff]  ;;  %627 = vmatprep.mubr.bf16.mxu1 %v5563_v22 }
  0x2f   : > { %559 = vmatpush2.bf16.msra.mxu0 %v511_v47  ;;  %v330_v36 = vld [vmem:[%s8929_s0 + $0x4a0] sm:$0xff]  ;;  %v485_v43 = vpack.c.bf16 %v345_v31, %v338_v30  ;;  %v329_v46 = vld [vmem:[%s8929_s0 + $0x498] sm:$0xff]  ;;  %v324_v47 = vld [vmem:[%s8929_s0 + $0x470] sm:$0xff]  ;;  %v5694_v29 = vmul.u32.u64.low 2454267026, %v5658_v7  ;;  %v5695_v30 = vmul.u32.u64.high 2454267026, %v5658_v7, %v5694_v29 }
  0x30   : > { %612 = vmatpush2.bf16.msra.mxu1 %v513_v48  ;;  %560 = vmatprep.subr.bf16.mxu0 %v505_v49  ;;  %v477_v44 = vpack.c.bf16 %v330_v36, %v323_v35  ;;  %v322_v45 = vld [vmem:[%s8929_s0 + $0x460] sm:$0xff]  ;;  %v479_v48 = vpack.c.bf16 %v332_v39, %v325_v38  ;;  %v331_v49 = vld [vmem:[%s8929_s0 + $0x4a8] sm:$0xff]  ;;  %v309_v50 = vld [vmem:[%s8929_s0 + $0x3f8] sm:$0xff]  ;;  %v5705_v35 = vmul.u32.u64.low 2454267026, %v5670_v14  ;;  %v5706_v36 = vmul.u32.u64.high 2454267026, %v5670_v14, %v5705_v35 }
  0x31   : > { %613 = vmatprep.subr.bf16.mxu1 %v507_v53  ;;  %v316_v51 = vld [vmem:[%s8929_s0 + $0x430] sm:$0xff]  ;;  %v1004_v53 = vsel %vm1003_vm0, 1, %v8950_v52  ;;  %v311_v56 = vld [vmem:[%s8929_s0 + $0x408] sm:$0xff]  ;;  %v318_v57 = vld [vmem:[%s8929_s0 + $0x440] sm:$0xff]  ;;  %v476_v58 = vpack.c.bf16 %v329_v46, %v322_v45  ;;  %vm1031_vm4 = vc.u32 %v5694_v29, 2454267026 }
  0x32   : > { %v315_v63 = vld [vmem:[%s8929_s0 + $0x428] sm:$0xff]  ;;  %v310_v0 = vld [vmem:[%s8929_s0 + $0x400] sm:$0xff]  ;;  %v1005_v1 = vadd.s32 %v5567_v24, %v1004_v53  ;;  %v472_v3 = vpack.c.bf16 %v318_v57, %v311_v56  ;;  %v317_v4 = vld [vmem:[%s8929_s0 + $0x438] sm:$0xff]  ;;  %vm1045_vm5 = vc.u32 %v5705_v35, 2454267026 }
  0x33   : > { %561 = vmatpush2.bf16.msra.mxu0 %v504_v60  ;;  %v478_v60 = vpack.c.bf16 %v331_v49, %v324_v47  ;;  %v295_v5 = vld [vmem:[%s8929_s0 + $0x388] sm:$0xff]  ;;  %v302_v6 = vld [vmem:[%s8929_s0 + $0x3c0] sm:$0xff]  ;;  %v304_v10 = vld [vmem:[%s8929_s0 + $0x3d0] sm:$0xff]  ;;  %v471_v15 = vpack.c.bf16 %v317_v4, %v310_v0 }
  0x34   : > { %614 = vmatpush2.bf16.msra.mxu1 %v506_v61  ;;  %562 = vmatprep.subr.bf16.mxu0 %v498_v62  ;;  %v470_v61 = vpack.c.bf16 %v316_v51, %v309_v50  ;;  %v308_v62 = vld [vmem:[%s8929_s0 + $0x3f0] sm:$0xff]  ;;  %v463_v16 = vpack.c.bf16 %v302_v6, %v295_v5  ;;  %v301_v19 = vld [vmem:[%s8929_s0 + $0x3b8] sm:$0xff]  ;;  %v1006_v21 = vshrl.u32 %v1005_v1, 4  ;;  %v398_v31 = vld [vmem:[%s8929_s0 + $0x6c0] sm:$0xff]  ;;  %v5732_v51 = vadd.s32 768, %v5504_v59 }
  0x35   : > { %615 = vmatprep.subr.bf16.mxu1 %v500_v2  ;;  %v1018_v2 = vsel %vm1017_vm1, 1, %v8950_v52  ;;  %v296_v20 = vld [vmem:[%s8929_s0 + $0x390] sm:$0xff]  ;;  %v285_v26 = vld [vmem:[%s8929_s0 + $0x338] sm:$0xff]  ;;  %v291_v41 = vld [vmem:[%s8929_s0 + $0x368] sm:$0xff] }
  0x36   : > { %v405_v32 = vld [vmem:[%s8929_s0 + $0x6f8] sm:$0xff]  ;;  %v1007_v46 = vmul.u32 28, %v1006_v21  ;;  %v286_v49 = vld [vmem:[%s8929_s0 + $0x340] sm:$0xff]  ;;  %v384_v54 = vld [vmem:[%s8929_s0 + $0x650] sm:$0xff] }
  0x37   : > { %563 = vmatpush2.bf16.msra.mxu0 %v497_v9  ;;  %v297_v9 = vld [vmem:[%s8929_s0 + $0x398] sm:$0xff]  ;;  %v517_v45 = vpack.c.bf16 %v405_v32, %v398_v31  ;;  %v264_v1 = vld [vmem:[%s8929_s0 + $0x290] sm:$0xff]  ;;  %v263_v21 = vld [vmem:[%s8929_s0 + $0x288] sm:$0xff] }
  0x38   : > { %616 = vmatpush2.bf16.msra.mxu1 %v499_v12  ;;  %564 = vmatprep.subr.bf16.mxu0 %v491_v13  ;;  %v469_v12 = vpack.c.bf16 %v315_v63, %v308_v62  ;;  %v1019_v13 = vadd.s32 %v5583_v33, %v1018_v2  ;;  %v465_v24 = vpack.c.bf16 %v304_v10, %v297_v9  ;;  %v293_v50 = vld [vmem:[%s8929_s0 + $0x378] sm:$0xff]  ;;  %v1032_v63 = vsel %vm1031_vm4, 1, %v8950_v52  ;;  %v272_v6 = vld [vmem:[%s8929_s0 + $0x2d0] sm:$0xff]  ;;  %v279_v9 = vld [vmem:[%s8929_s0 + $0x308] sm:$0xff] }
  0x39   : > { %617 = vmatprep.subr.bf16.mxu1 %v493_v18  ;;  %v294_v18 = vld [vmem:[%s8929_s0 + $0x380] sm:$0xff]  ;;  %v257_v0 = vld [vmem:[%s8929_s0 + $0x258] sm:$0xff]  ;;  %v461_v2 = vpack.c.bf16 %v293_v50, %v286_v49  ;;  %v1046_v10 = vsel %vm1045_vm5, 1, %v8950_v52  ;;  %v363_v35 = vld [vmem:[%s8929_s0 + $0x5a8] sm:$0xff] }
  0x3a   : > { %v462_v33 = vpack.c.bf16 %v301_v19, %v294_v18  ;;  %v1033_v18 = vadd.s32 %v5695_v30, %v1032_v63  ;;  %v446_v19 = vpack.c.bf16 %v264_v1, %v257_v0  ;;  %v258_v29 = vld [vmem:[%s8929_s0 + $0x260] sm:$0xff]  ;;  %v265_v30 = vld [vmem:[%s8929_s0 + $0x298] sm:$0xff] }
  0x3b   : > { %565 = vmatpush2.bf16.msra.mxu0 %v490_v25  ;;  %v303_v25 = vld [vmem:[%s8929_s0 + $0x3c8] sm:$0xff]  ;;  %v5872_v50 = vld [vmem:[%s8929_s0 + $0x140] sm:$0xff] }
  0x3c   : > { %618 = vmatpush2.bf16.msra.mxu1 %v492_v27  ;;  %566 = vmatprep.subr.bf16.mxu0 %v484_v28  ;;  %v292_v27 = vld [vmem:[%s8929_s0 + $0x370] sm:$0xff]  ;;  %v977_v28 = vadd.s32 %v5604_v42, %v976_v11  ;;  %v464_v38 = vpack.c.bf16 %v303_v25, %v296_v20  ;;  %v1020_v42 = vshrl.u32 %v1019_v13, 4  ;;  %v370_v13 = vld [vmem:[%s8929_s0 + $0x5e0] sm:$0xff] }
  0x3d   : > { %619 = vmatprep.subr.bf16.mxu1 %v486_v34  ;;  %v991_v34 = vadd.s32 %v5628_v55, %v990_v23  ;;  %v460_v39 = vpack.c.bf16 %v292_v27, %v285_v26  ;;  %v391_v55 = vld [vmem:[%s8929_s0 + $0x688] sm:$0xff]  ;;  %v256_v20 = vld [vmem:[%s8929_s0 + $0x250] sm:$0xff]  ;;  %v250_v25 = vld [vmem:[%s8929_s0 + $0x220] sm:$0xff]  ;;  %v454_v26 = vpack.c.bf16 %v279_v9, %v272_v6  ;;  %v5802_v27 = vadd.s32 %v5706_v36, %v1046_v10 }
  0x3e   : > { %v978_v47 = vshrl.u32 %v977_v28, 4  ;;  %v1021_v62 = vmul.u32 28, %v1020_v42  ;;  %v510_v5 = vpack.c.bf16 %v391_v55, %v384_v54  ;;  %v445_v32 = vpack.c.bf16 %v263_v21, %v256_v20  ;;  %v5852_v42 = vld [vmem:[%s8929_s0 + $0x170] sm:$0xff]  ;;  %v251_v55 = vld [vmem:[%s8929_s0 + $0x228] sm:$0xff]  ;;  %v5900_v1 = vld [vmem:[%s8929_s0 + $0x180] sm:$0xff] }
  0x3f   : > { %567 = vmatpush2.bf16.msra.mxu0 %v483_v40  ;;  %v284_v40 = vld [vmem:[%s8929_s0 + $0x330] sm:$0xff]  ;;  %v992_v56 = vshrl.u32 %v991_v34, 4  ;;  %v1034_v36 = vshrl.u32 %v1033_v18, 4  ;;  %v201_v20 = vld [vmem:[%s8929_s0 + $0x98] sm:$0xff] }
  0x40   : > { %620 = vmatpush2.bf16.msra.mxu1 %v485_v43  ;;  %568 = vmatprep.subr.bf16.mxu0 %v477_v44  ;;  %v271_v43 = vld [vmem:[%s8929_s0 + $0x2c8] sm:$0xff]  ;;  %v278_v44 = vld [vmem:[%s8929_s0 + $0x300] sm:$0xff]  ;;  %v459_v53 = vpack.c.bf16 %v291_v41, %v284_v40  ;;  %v979_v4 = vmul.u32 28, %v978_v47  ;;  %v5791_v23 = vsub.s32 %v5549_v17, %v1021_v62  ;;  %v5807_v17 = vld [vmem:[%s8930_s1 + $0x10] ss:$8 sps:$4 sm:$0xff]   ;;  %v1048_v47 = vshrl.u32 %v5802_v27, 4 }
  0x41   : > { %621 = vmatprep.subr.bf16.mxu1 %v479_v48  ;;  %v5723_v48 = vld [vmem:[%s8930_s1] ss:$8 sps:$4 sm:$0xff]   ;;  %v453_v57 = vpack.c.bf16 %v278_v44, %v271_v43  ;;  %v356_v34 = vld [vmem:[%s8929_s0 + $0x570] sm:$0xff]  ;;  %v5839_v40 = vld [vmem:[%s8929_s0 + $0x178] sm:$0xff]  ;;  %v1035_v62 = vmul.u32 28, %v1034_v36 }
  0x42   : > { %v5816_v31 = vsub.s32 %v5504_v59, %v979_v4  ;;  %v5844_v41 = vld [vmem:[%s8929_s0 + $0x1b0] sm:$0xff]  ;;  %vm1070_vm9 = vcmp.ne.s32.totalorder %v5791_v23, 0  ;;  %vm1077_vm10 = vcmp.lt.s32.totalorder %v5791_v23, 0  ;;  %v5857_v43 = vld [vmem:[%s8929_s0 + $0x1a8] sm:$0xff] }
  0x43   : > { %569 = vmatpush2.bf16.msra.mxu0 %v476_v58  ;;  %v270_v58 = vld [vmem:[%s8929_s0 + $0x2c0] sm:$0xff]  ;;  %v5862_v44 = vld [vmem:[%s8929_s0 + $0x108] sm:$0xff]  ;;  %v244_v54 = vld [vmem:[%s8929_s0 + $0x1f0] sm:$0xff]  ;;  %v432_v63 = vpack.c.bf16 %v5844_v41, %v5839_v40  ;;  %v431_v0 = vpack.c.bf16 %v5857_v43, %v5852_v42 }
  0x44   : > { %622 = vmatpush2.bf16.msra.mxu1 %v478_v60  ;;  %570 = vmatprep.subr.bf16.mxu0 %v470_v61  ;;  %v277_v60 = vld [vmem:[%s8929_s0 + $0x2f8] sm:$0xff]  ;;  %vm1067_vm11 = vcmp.ne.s32.totalorder %v5816_v31, 0  ;;  %vm1074_vm12 = vcmp.lt.s32.totalorder %v5816_v31, 0  ;;  %v425_v6 = vpack.c.bf16 %v5872_v50, %v5862_v44  ;;  %v440_v9 = vpack.c.bf16 %v251_v55, %v244_v54  ;;  %vm1084_vm0 = vmand %vm1077_vm10, %vm1070_vm9  ;;  %v208_v21 = vld [vmem:[%s8929_s0 + $0xd0] sm:$0xff] }
  0x45   : > { %623 = vmatprep.subr.bf16.mxu1 %v472_v3  ;;  %v5749_v61 = vld [vmem:[%s8930_s1 + $0x14] ss:$8 sps:$4 sm:$0xff]   ;;  %v5760_v3 = vsub.s32 %v5531_v8, %v1007_v46  ;;  %v452_v8 = vpack.c.bf16 %v277_v60, %v270_v58  ;;  %v1091_v46 = vadd.s32 28, %v5791_v23  ;;  %v342_v58 = vld [vmem:[%s8929_s0 + $0x500] sm:$0xff]  ;;  %vm1081_vm3 = vmand %vm1074_vm12, %vm1067_vm11 }
  0x46   : > { %v349_v60 = vld [vmem:[%s8929_s0 + $0x538] sm:$0xff]  ;;  %v216_v27 = vld [vmem:[%s8929_s0 + $0x110] sm:$0xff]  ;;  %v194_v40 = vld [vmem:[%s8929_s0 + $0x60] sm:$0xff] }
  0x47   : > { %571 = vmatpush2.bf16.msra.mxu0 %v469_v12  ;;  %v5772_v11 = vmul.u32.u64.low 2454267026, %v5732_v51  ;;  %v5773_v12 = vmul.u32.u64.high 2454267026, %v5732_v51, %v5772_v11  ;;  %vm1069_vm6 = vcmp.ne.s32.totalorder %v5760_v3, 0  ;;  %vm1076_vm8 = vcmp.lt.s32.totalorder %v5760_v3, 0  ;;  %v209_v43 = vld [vmem:[%s8929_s0 + $0xd8] sm:$0xff] }
  0x48   : > { %624 = vmatpush2.bf16.msra.mxu1 %v471_v15  ;;  %572 = vmatprep.subr.bf16.mxu0 %v463_v16  ;;  %v377_v15 = vld [vmem:[%s8929_s0 + $0x618] sm:$0xff]  ;;  %v993_v16 = vmul.u32 28, %v992_v56  ;;  %v1088_v56 = vadd.s32 28, %v5816_v31  ;;  %vm1083_vm15 = vmand %vm1076_vm8, %vm1069_vm6 }
  0x49   : > { %625 = vmatprep.subr.bf16.mxu1 %v465_v24  ;;  %v243_v24 = vld [vmem:[%s8929_s0 + $0x1e8] sm:$0xff]  ;;  %v503_v28 = vpack.c.bf16 %v377_v15, %v370_v13  ;;  %vm1059_vm7 = vc.u32 %v5772_v11, 2454267026  ;;  %v1049_v11 = vmul.u32 28, %v1048_v47  ;;  %v5937_v13 = vsel %vm1084_vm0, %v1091_v46, %v5791_v23  ;;  %v328_v15 = vld [vmem:[%s8929_s0 + $0x490] sm:$0xff]  ;;  %v193_v54 = vld [vmem:[%s8929_s0 + $0x58] sm:$0xff] }
  0x4a   : > { %v5831_v59 = vsub.s32 %v5593_v37, %v993_v16  ;;  %v1090_v37 = vadd.s32 28, %v5760_v3  ;;  %v1060_v49 = vsel %vm1059_vm7, 1, %v8950_v52  ;;  %v335_v16 = vld [vmem:[%s8929_s0 + $0x4c8] sm:$0xff]  ;;  %vm1112_vm4 = vcmp.ge.s32.totalorder %v5937_v13, 1  ;;  %v300_v46 = vld [vmem:[%s8929_s0 + $0x3b0] sm:$0xff] }
  0x4b   : > { %573 = vmatpush2.bf16.msra.mxu0 %v462_v33  ;;  %v5821_v33 = vld [vmem:[%s8929_s0 + $0x1e0] sm:$0xff]  ;;  %vm1119_vm5 = vcmp.lt.s32.totalorder %v5937_v13, 27  ;;  %v5960_v18 = vsel %vm1081_vm3, %v1088_v56, %v5816_v31  ;;  %vm1105_vm10 = vcmp.ge.s32.totalorder %v5937_v13, 2  ;;  %v321_v31 = vld [vmem:[%s8929_s0 + $0x458] sm:$0xff]  ;;  %v6038_v36 = vsub.s32 %v5670_v14, %v1049_v11  ;;  %v307_v47 = vld [vmem:[%s8929_s0 + $0x3e8] sm:$0xff] }
  0x4c   : > { %626 = vmatpush2.bf16.msra.mxu1 %v464_v38  ;;  %648 = vmatprep.subr.bf16.mxu0 %v460_v39  ;;  %v439_v38 = vpack.c.bf16 %v250_v25, %v243_v24  ;;  %v249_v39 = vld [vmem:[%s8929_s0 + $0x218] sm:$0xff]  ;;  %vm1068_vm13 = vcmp.ne.s32.totalorder %v5831_v59, 0  ;;  %vm1075_vm14 = vcmp.lt.s32.totalorder %v5831_v59, 0  ;;  %v1089_v4 = vadd.s32 28, %v5831_v59  ;;  %v202_v14 = vld [vmem:[%s8929_s0 + $0xa0] sm:$0xff]  ;;  %v396_v11 = vld [vmem:[%s8929_s0 + $0x6b0] sm:$0xff] }
  0x4d   : > { %4939 = vmatprep.subr.bf16.mxu1 %v517_v45  ;;  %v447_v45 = vpack.c.bf16 %v265_v30, %v258_v29  ;;  %v5924_v10 = vsel %vm1083_vm15, %v1090_v37, %v5760_v3  ;;  %vm1082_vm6 = vmand %vm1075_vm14, %vm1068_vm13  ;;  %vm1109_vm8 = vcmp.ge.s32.totalorder %v5960_v18, 1  ;;  %vm1116_vm13 = vcmp.lt.s32.totalorder %v5960_v18, 27  ;;  %v314_v30 = vld [vmem:[%s8929_s0 + $0x420] sm:$0xff]  ;;  %v397_v56 = vld [vmem:[%s8929_s0 + $0x6b8] sm:$0xff] }
  0x4e   : > { %575 = vmatmul.mubr.bf16.vlgmr.msra.gmra.mxu0 %v5723_v48  ;;  %vm1111_vm1 = vcmp.ge.s32.totalorder %v5924_v10, 1  ;;  %vm1118_vm2 = vcmp.lt.s32.totalorder %v5924_v10, 27  ;;  %vm1104_vm9 = vcmp.ge.s32.totalorder %v5924_v10, 2  ;;  %v5999_v29 = vsub.s32 %v5658_v7, %v1035_v62  ;;  %v376_v24 = vld [vmem:[%s8929_s0 + $0x610] sm:$0xff] }
  0x4f   : > { %628 = vmatmul.mubr.bf16.vlgmr.msra.gmra.mxu1 %v5723_v48  ;;  %649 = vmatpush1.bf16.msra.mxu0 %v459_v53  ;;  %v496_v53 = vpack.c.bf16 %v363_v35, %v356_v34  ;;  %vm1336_vm7 = vmpackc.low %vm1112_vm4, %vm1111_vm1  ;;  %vm1102_vm1 = vcmp.ge.s32.totalorder %v5960_v18, 2  ;;  %v418_v34 = vpack.c.bf16 %v208_v21, %v201_v20  ;;  %v200_v35 = vld [vmem:[%s8929_s0 + $0x90] sm:$0xff]  ;;  %v475_v42 = vpack.c.bf16 %v321_v31, %v314_v30  ;;  %v382_v20 = vld [vmem:[%s8929_s0 + $0x640] sm:$0xff] }
  0x50   : > { %650 = vmatprep.subr.bf16.mxu0 %v453_v57  ;;  %584 = vmatprep.mubr.bf16.mxu0 %v5749_v61  ;;  %v438_v57 = vpack.c.bf16 %v249_v39, %v5821_v33  ;;  %v5975_v23 = vsel %vm1336_vm7, 65537, %v8950_v52  ;;  %vm5979_vm11 = vmpackc.low %vm1119_vm5, %vm1118_vm2  ;;  %v187_v39 = vld [vmem:[%s8929_s0 + $0x28] sm:$0xff]  ;;  %vm1071_vm5 = vcmp.ne.s32.totalorder %v5999_v29, 0  ;;  %vm1072_vm7 = vcmp.ne.s32.totalorder %v6038_v36, 0  ;;  %v389_v21 = vld [vmem:[%s8929_s0 + $0x678] sm:$0xff] }
  0x51   : > { %637 = vmatprep.mubr.bf16.mxu1 %v5749_v61  ;;  %4940 = vmatpush3.bf16.msra.mxu1 %v461_v2  ;;  %v5905_v2 = vld [vmem:[%s8929_s0 + $0x1b8] sm:$0xff]  ;;  %vm6019_vm0 = vmpackc.low %vm1105_vm10, %vm1104_vm9  ;;  %v411_v50 = vpack.c.bf16 %v194_v40, %v187_v39  ;;  %vm1125_vm9 = vcmp.lt.s32.totalorder %v5924_v10, 26  ;;  %vm1126_vm10 = vcmp.lt.s32.totalorder %v5937_v13, 26  ;;  %v468_v62 = vpack.c.bf16 %v307_v47, %v300_v46  ;;  %v375_v30 = vld [vmem:[%s8929_s0 + $0x608] sm:$0xff] }
  0x52   : > { %4941 = vmatprep.subr.bf16.mxu1 %v510_v5  ;;  %v5914_v5 = vadd.s32 %v5773_v12, %v1060_v49  ;;  %v5929_v12 = vld [vmem:[%s8929_s0 + $0x100] sm:$0xff]  ;;  %v433_v3 = vpack.c.bf16 %v5905_v2, %v5900_v1  ;;  %1345 = vrot.lane.b32.xlu1 %v5975_v23, %s5213_s28  ;;  %v1151_v49 = vsel %vm6019_vm0, 65537, %v8950_v52  ;;  %v1092_v2 = vadd.s32 28, %v5999_v29  ;;  %v355_v31 = vld [vmem:[%s8929_s0 + $0x568] sm:$0xff]  ;;  %v348_v39 = vld [vmem:[%s8929_s0 + $0x530] sm:$0xff] }
  0x53   : > { %651 = vmatpush1.bf16.msra.mxu0 %v452_v8  ;;  %v5934_v8 = vld [vmem:[%s8929_s0 + $0x138] sm:$0xff] }
  0x54   : > { %652 = vmatprep.subr.bf16.mxu0 %v446_v19  ;;  %v5963_v19 = vsel %vm1082_vm6, %v1089_v4, %v5831_v59  ;;  %v424_v25 = vpack.c.bf16 %v5934_v8, %v5929_v12  ;;  %v207_v59 = vld [vmem:[%s8929_s0 + $0xc8] sm:$0xff]  ;;  %vm1078_vm6 = vcmp.lt.s32.totalorder %v5999_v29, 0  ;;  %v1093_v4 = vadd.s32 28, %v6038_v36 }
  0x55   : > { %4942 = vmatpush3.bf16.msra.mxu1 %v454_v26  ;;  %vm1110_vm12 = vcmp.ge.s32.totalorder %v5963_v19, 1  ;;  %vm1117_vm14 = vcmp.lt.s32.totalorder %v5963_v19, 27  ;;  %v482_v26 = vpack.c.bf16 %v335_v16, %v328_v15  ;;  %vm1103_vm2 = vcmp.ge.s32.totalorder %v5963_v19, 2  ;;  %v403_v12 = vld [vmem:[%s8929_s0 + $0x6e8] sm:$0xff] }
  0x56   : > { %585 = vmatmul.mubr.bf16.gmra.mxu0 %v5807_v17  ;;  %4943 = vmatprep.subr.bf16.mxu1 %v503_v28  ;;  %v223_v28 = vld [vmem:[%s8929_s0 + $0x148] sm:$0xff]  ;;  %vm1335_vm15 = vmpackc.low %vm1110_vm12, %vm1109_vm8  ;;  %vm1079_vm8 = vcmp.lt.s32.totalorder %v6038_v36, 0  ;;  %v515_v13 = vpack.c.bf16 %v403_v12, %v396_v11 }
  0x57   : > { %653 = vmatpush1.bf16.msra.mxu0 %v445_v32  ;;  %638 = vmatmul.mubr.bf16.gmra.mxu1 %v5807_v17  ;;  %v6010_v32 = vsel %vm5979_vm11, 65537, %v8950_v52  ;;  %v6013_v33 = vsel %vm1335_vm15, 65537, %v8950_v52  ;;  %vm1524_vm3 = vmpackc.low %vm1117_vm14, %vm1116_vm13  ;;  %v426_v41 = vpack.c.bf16 %v223_v28, %v216_v27  ;;  %vm1123_vm14 = vcmp.lt.s32.totalorder %v5960_v18, 26  ;;  %v369_v18 = vld [vmem:[%s8929_s0 + $0x5d8] sm:$0xff] }
  0x58   : > { %654 = vmatprep.subr.bf16.mxu0 %v439_v38  ;;  %733 = vmatprep.mubr.bf16.mxu1 %v5563_v22  ;;  %v1062_v38 = vshrl.u32 %v5914_v5, 4  ;;  %v6048_v37 = vsel %vm1524_vm3, 65537, %v8950_v52  ;;  %vm6062_vm4 = vmpackc.low %vm1103_vm2, %vm1102_vm1  ;;  %vm1124_vm15 = vcmp.lt.s32.totalorder %v5963_v19, 26  ;;  %v508_v27 = vpack.c.bf16 %v389_v21, %v382_v20 }
  0x59   : > { %4944 = vmatpush3.bf16.msra.mxu1 %v447_v45  ;;  %680 = vmatprep.mubr.bf16.mxu0 %v5563_v22  ;;  %v489_v22 = vpack.c.bf16 %v349_v60, %v342_v58  ;;  %v417_v45 = vpack.c.bf16 %v207_v59, %v200_v35  ;;  %v419_v58 = vpack.c.bf16 %v209_v43, %v202_v14  ;;  %v1150_v60 = vsel %vm6062_vm4, 65537, %v8950_v52  ;;  %vm6109_vm11 = vmand %vm1078_vm6, %vm1071_vm5  ;;  %v347_v14 = vld [vmem:[%s8929_s0 + $0x528] sm:$0xff]  ;;  %v334_v43 = vld [vmem:[%s8929_s0 + $0x4c0] sm:$0xff] }
  0x5a   : > { %4945 = vmatprep.subr.bf16.mxu1 %v496_v53  ;;  %1343 = vrot.lane.b32.xlu0 %v6013_v33, %s5213_s28  ;;  %v186_v53 = vld [vmem:[%s8929_s0 + $0x20] sm:$0xff]  ;;  %v1063_v55 = vmul.u32 28, %v1062_v38  ;;  %vm6119_vm12 = vmand %vm1079_vm8, %vm1072_vm7  ;;  %v6148_v10 = vsel %vm6109_vm11, %v1092_v2, %v5999_v29  ;;  %v502_v28 = vpack.c.bf16 %v376_v24, %v369_v18  ;;  %v368_v29 = vld [vmem:[%s8929_s0 + $0x5d0] sm:$0xff] }
  0x5b   : > { %655 = vmatpush1.bf16.msra.mxu0 %v438_v57  ;;  %1534 = vrot.lane.b32.xlu1 %v6010_v32, %s5214_s20  ;;  %v404_v57 = vld [vmem:[%s8929_s0 + $0x6f0] sm:$0xff]  ;;  %v410_v5 = vpack.c.bf16 %v193_v54, %v186_v53  ;;  %vm2526_vm13 = vmpackc.low %vm1126_vm10, %vm1125_vm9  ;;  %vm1120_vm3 = vcmp.lt.s32.totalorder %v6148_v10, 27  ;;  %vm1113_vm7 = vcmp.ge.s32.totalorder %v6148_v10, 1  ;;  %v361_v38 = vld [vmem:[%s8929_s0 + $0x598] sm:$0xff]  ;;  %vm1106_vm10 = vcmp.ge.s32.totalorder %v6148_v10, 2 }
  0x5c   : > { %656 = vmatprep.subr.bf16.mxu0 %v432_v63  ;;  %v188_v63 = vld [vmem:[%s8929_s0 + $0x30] sm:$0xff]  ;;  %v1064_v8 = vsub.s32 %v5732_v51, %v1063_v55  ;;  %v6153_v51 = vsel %vm6119_vm12, %v1093_v4, %v6038_v36  ;;  %v2530_v16 = vsel %vm2526_vm13, 65537, %v8950_v52  ;;  %vm2525_vm0 = vmpackc.low %vm1124_vm15, %vm1123_vm14  ;;  %v354_v36 = vld [vmem:[%s8929_s0 + $0x560] sm:$0xff] }
  0x5d   : > { %4946 = vmatpush3.bf16.msra.mxu1 %v440_v9  ;;  %v516_v9 = vpack.c.bf16 %v404_v57, %v397_v56  ;;  %vm1121_vm4 = vcmp.lt.s32.totalorder %v6153_v51, 27  ;;  %vm1114_vm8 = vcmp.ge.s32.totalorder %v6153_v51, 1  ;;  %vm1107_vm11 = vcmp.ge.s32.totalorder %v6153_v51, 2  ;;  %v313_v53 = vld [vmem:[%s8929_s0 + $0x418] sm:$0xff]  ;;  %v320_v54 = vld [vmem:[%s8929_s0 + $0x450] sm:$0xff]  ;;  %v298_v2 = vld [vmem:[%s8929_s0 + $0x3a0] sm:$0xff] }
  0x5e   : > { %4947 = vmatprep.subr.bf16.mxu1 %v489_v22  ;;  %1532 = vrot.lane.b32.xlu0 %v6048_v37, %s5214_s20  ;;  %v383_v22 = vld [vmem:[%s8929_s0 + $0x648] sm:$0xff]  ;;  %vm1073_vm1 = vcmp.ne.s32.totalorder %v1064_v8, 0  ;;  %vm1080_vm2 = vcmp.lt.s32.totalorder %v1064_v8, 0  ;;  %vm1526_vm6 = vmpackc.low %vm1121_vm4, %vm1120_vm3  ;;  %v474_v56 = vpack.c.bf16 %v320_v54, %v313_v53  ;;  %v312_v57 = vld [vmem:[%s8929_s0 + $0x410] sm:$0xff]  ;;  %vm8933_vm3 = vcmask 125952  }
  0x5f   : > { %657 = vmatpush1.bf16.msra.mxu0 %v431_v0  ;;  %v195_v0 = vld [vmem:[%s8929_s0 + $0x68] sm:$0xff]  ;;  %1156 = vrot.lane.b32.xlu1 %v1151_v49, %s5215_s11  ;;  %vm1087_vm5 = vmand %vm1080_vm2, %vm1073_vm1  ;;  %v1530_v35 = vsel %vm1526_vm6, 65537, %v8950_v52  ;;  %v326_v49 = vld [vmem:[%s8929_s0 + $0x480] sm:$0xff]  ;;  %vm901_vm1 = vcmask 1043456   ;;  %vm1355_vm2 = vcmask 941056   ;;  %vm941_vm4 = vcmask 1043584  }
  0x60   : > { %658 = vmatprep.subr.bf16.mxu0 %v425_v6  ;;  %v412_v15 = vpack.c.bf16 %v195_v0, %v188_v63  ;;  %vm1337_vm9 = vmpackc.low %vm1114_vm8, %vm1113_vm7  ;;  %v305_v4 = vld [vmem:[%s8929_s0 + $0x3d8] sm:$0xff]  ;;  %vm899_vm6 = vcmask 130048   ;;  %vm1544_vm8 = vcmask 949248  }
  0x61   : > { %4948 = vmatpush3.bf16.msra.mxu1 %v433_v3  ;;  %v390_v3 = vld [vmem:[%s8929_s0 + $0x680] sm:$0xff]  ;;  %v1341_v40 = vsel %vm1337_vm9, 65537, %v8950_v52  ;;  %vm1148_vm13 = vmpackc.low %vm1107_vm11, %vm1106_vm10  ;;  %vm8936_vm9 = vcmask 932864  }
  0x62   : > { %4949 = vmatprep.subr.bf16.mxu1 %v482_v26  ;;  %1154 = vrot.lane.b32.xlu0 %v1150_v60, %s5215_s11  ;;  %v509_v19 = vpack.c.bf16 %v390_v3, %v383_v22  ;;  %v1094_v26 = vadd.s32 28, %v1064_v8  ;;  %v1152_v44 = vsel %vm1148_vm13, 65537, %v8950_v52  ;;  %v299_v60 = vld [vmem:[%s8929_s0 + $0x3a8] sm:$0xff] }
  0x63   : > { %659 = vmatpush1.bf16.msra.mxu0 %v424_v25  ;;  %2011 = vrot.lane.b32.xlu1 %v6010_v32, %s5216_s23  ;;  %v2529_v25 = vsel %vm2525_vm0, 65537, %v8950_v52  ;;  %v362_v32 = vld [vmem:[%s8929_s0 + $0x5a0] sm:$0xff] }
  0x64   : > { %660 = vmatprep.subr.bf16.mxu0 %v418_v34  ;;  %v6195_v7 = vsel %vm1087_vm5, %v1094_v26, %v1064_v8  ;;  %v501_v34 = vpack.c.bf16 %v375_v30, %v368_v29  ;;  %v495_v59 = vpack.c.bf16 %v362_v32, %v355_v31  ;;  %vm942_vm5 = vcmask 1047556  }
  0x65   : > { %4950 = vmatpush3.bf16.msra.mxu1 %v426_v41  ;;  %vm1115_vm12 = vcmp.ge.s32.totalorder %v6195_v7, 1  ;;  %v494_v41 = vpack.c.bf16 %v361_v38, %v354_v36  ;;  %vm1122_vm15 = vcmp.lt.s32.totalorder %v6195_v7, 27  ;;  %vm6347_vm7 = vmor %vm942_vm5, %vm941_vm4 }
  0x66   : > { %4951 = vmatprep.subr.bf16.mxu1 %v475_v42  ;;  %2009 = vrot.lane.b32.xlu0 %v6048_v37, %s5216_s23  ;;  %v340_v42 = vld [vmem:[%s8929_s0 + $0x4f0] sm:$0xff]  ;;  %vm1338_vm14 = vmpackc.low %vm1115_vm12, %vm1115_vm12  ;;  %vm8934_vm12 = vcmask 957440  }
  0x67   : > { %661 = vmatpush1.bf16.msra.mxu0 %v417_v45  ;;  %2535 = vrot.lane.b32.xlu1 %v2530_v16, %s5217_s6  ;;  %v487_v45 = vpack.c.bf16 %v347_v14, %v340_v42  ;;  %v6234_v46 = vsel %vm1338_vm14, 65537, %v8950_v52  ;;  %vm1527_vm0 = vmpackc.low %vm1122_vm15, %vm1122_vm15  ;;  %vm8935_vm14 = vcmask 965632  }
  0x68   : > { %662 = vmatprep.subr.bf16.mxu0 %v411_v50  ;;  %v333_v50 = vld [vmem:[%s8929_s0 + $0x4b8] sm:$0xff]  ;;  %v6266_v63 = vsel %vm1527_vm0, 65537, %v8950_v52 }
  0x69   : > { %4952 = vmatpush3.bf16.msra.mxu1 %v419_v58  ;;  %v480_v55 = vpack.c.bf16 %v333_v50, %v326_v49  ;;  %v319_v58 = vld [vmem:[%s8929_s0 + $0x448] sm:$0xff] }
  0x6a   : > { %4953 = vmatprep.subr.bf16.mxu1 %v468_v62  ;;  %2533 = vrot.lane.b32.xlu0 %v2529_v25, %s5217_s6  ;;  %v306_v62 = vld [vmem:[%s8929_s0 + $0x3e0] sm:$0xff]  ;;  %v473_v0 = vpack.c.bf16 %v319_v58, %v312_v57 }
  0x6b   : > { %663 = vmatpush1.bf16.msra.mxu0 %v410_v5  ;;  %2192 = vrot.lane.b32.xlu1 %v5975_v23, %s5214_s20  ;;  %v341_v23 = vld [vmem:[%s8929_s0 + $0x4f8] sm:$0xff]  ;;  %v467_v1 = vpack.c.bf16 %v306_v62, %v299_v60  ;;  %v466_v5 = vpack.c.bf16 %v305_v4, %v298_v2 }
  0x6c   : > { %664 = vmatprep.subr.bf16.mxu0 %v516_v9  ;;  %v488_v37 = vpack.c.bf16 %v348_v39, %v341_v23 }
  0x6d   : > { %4954 = vmatpush3.bf16.msra.mxu1 %v412_v15 }
  0x6e   : > { %2190 = vrot.lane.b32.xlu0 %v6013_v33, %s5214_s20  ;;  %v327_v33 = vld [vmem:[%s8929_s0 + $0x488] sm:$0xff] }
  0x6f   : > { %665 = vmatpush2.bf16.msra.mxu0 %v515_v13  ;;  %1536 = vrot.lane.b32.xlu1 %v1530_v35, %s5214_s20  ;;  %v481_v47 = vpack.c.bf16 %v334_v43, %v327_v33 }
  0x70   : > { %666 = vmatprep.subr.bf16.mxu0 %v509_v19  ;;  %734 = vmatmul.mubr.bf16.vlgmr.msra.gmra.mxu1 %v5723_v48 }
  0x71   : > { %741 = vmatprep.mubr.bf16.mxu1 %v5749_v61 }
  0x72   : > { %1347 = vrot.lane.b32.xlu0 %v1341_v40, %s5213_s28 }
  0x73   : > { %667 = vmatpush2.bf16.msra.mxu0 %v508_v27  ;;  %2013 = vrot.lane.b32.xlu1 %v1530_v35, %s5216_s23 }
  0x74   : > { %668 = vmatprep.subr.bf16.mxu0 %v502_v28 }
  0x76   : > { %1158 = vrot.lane.b32.xlu0 %v1152_v44, %s5215_s11 }
  0x77   : > { %669 = vmatpush2.bf16.msra.mxu0 %v501_v34  ;;  %1349 = vrot.lane.b32.xlu1 %v6234_v46, %s5213_s28 }
  0x78   : > { %670 = vmatprep.subr.bf16.mxu0 %v495_v59  ;;  %742 = vmatmul.mubr.bf16.gmra.mxu1 %v5807_v17 }
  0x7a   : > { %2194 = vrot.lane.b32.xlu0 %v1341_v40, %s5214_s20 }
  0x7b   : > { %671 = vmatpush2.bf16.msra.mxu0 %v494_v41 }
  0x7c   : > { %672 = vmatprep.subr.bf16.mxu0 %v488_v37 }
  0x7e   : > { %1538 = vrot.lane.b32.xlu0 %v6266_v63, %s5214_s20 }
  0x7f   : > { %673 = vmatpush2.bf16.msra.mxu0 %v487_v45 }
  0x80   : > { %674 = vmatprep.subr.bf16.mxu0 %v481_v47 }
  0x83   : > { %675 = vmatpush2.bf16.msra.mxu0 %v480_v55 }
  0x84   : > { %676 = vmatprep.subr.bf16.mxu0 %v474_v56 }
  0x87   : > { %677 = vmatpush2.bf16.msra.mxu0 %v473_v0 }
  0x88   : > { %678 = vmatprep.subr.bf16.mxu0 %v467_v1 }
  0x8b   : > { %679 = vmatpush2.bf16.msra.mxu0 %v466_v5 }
  0x8e   : > { %681 = vmatmul.mubr.bf16.vlgmr.msra.gmra.mxu0 %v5723_v48 }
  0x8f   : > { %690 = vmatprep.mubr.bf16.mxu0 %v5749_v61 }
  0x96   : > { %691 = vmatmul.mubr.bf16.gmra.mxu0 %v5807_v17 }
  0x97   : > { %3812 = vmatprep.mubr.bf16.mxu0 %v8950_v52 }
  0xc4   : > { %v6280_v6 = vpop.permute.xlu1 %1345 }
  0xc5   : > { %v1352_v21 = vrot.slane %v6280_v6, 4 }
  0xcc   : > { %v6284_v11 = vpop.permute.xlu0 %1343 }
  0xcd   : > { %v6282_v9 = vpop.permute.xlu1 %1534 }
  0xd0   : > { %v6288_v8 = vpop.permute.xlu0 %1532 }
  0xd1   : > { %v6286_v12 = vpop.permute.xlu1 %1156 }
  0xd4   : > { %v6292_v3 = vpop.permute.xlu0 %1154 }
  0xd5   : > { %v6290_v22 = vpop.permute.xlu1 %2011 }
  0xd8   : > { %v6296_v61 = vpop.permute.xlu0 %2009 }
  0xd9   : > { %v6294_v48 = vpop.permute.xlu1 %2535 }
  0xdc   : > { %v6300_v15 = vpop.permute.xlu0 %2533 }
  0xdd   : > { %v6298_v17 = vpop.permute.xlu1 %2192 }
  0xe0   : > { %v6304_v16 = vpop.permute.xlu0 %2190 }
  0xe1   : > { %v6302_v13 = vpop.permute.xlu1 %1536 }
  0xe4   : > { %v1348_v20 = vpop.permute.xlu0 %1347 }
  0xe5   : > { %v6306_v19 = vpop.permute.xlu1 %2013  ;;  %v1353_v18 = vrot.slane %v1348_v20, 4 }
  0xe6   : > { %9092 = vst [vmem:[#allocation4_spill] sm:$0xff] %v6306_v19 }
  0xe7   : > { %v1359_v24 = vsel %vm901_vm1, %v1352_v21, %v1353_v18 }
  0xe8   : > { %v6313_v26 = vsel %vm1355_vm2, %v1359_v24, %v1348_v20 }
  0xe9   : > { %v1350_v25 = vpop.permute.xlu1 %1349 }
  0xea   : > { %v1354_v27 = vrot.slane %v1350_v25, 4 }
  0xec   : > { %v1361_v28 = vsel %vm901_vm1, %v1353_v18, %v1354_v27 }
  0xed   : > { %v6317_v29 = vsel %vm1355_vm2, %v1361_v28, %v1350_v25 }
 0x10e   : > { %v576_v30 = vpop.f32.mrf.mxu0 }
 0x10f   : > { %v629_v31 = vpop.f32.mrf.mxu1 }
 0x110   : > { %v578_v32 = vpop.f32.mrf.mxu0 }
 0x111   : > { %v4923_v34 = vpack.c.bf16 %v578_v32, %v576_v30  ;;  %v631_v35 = vpop.f32.mrf.mxu1 }
 0x112   : > { %v4924_v59 = vpack.c.bf16 %v631_v35, %v629_v31  ;;  %v580_v36 = vpop.f32.mrf.mxu0 }
 0x113   : > { %v633_v38 = vpop.f32.mrf.mxu1  ;;  %855 = vrot.lane.b32.xlu0 %v4923_v34, %s5218_s10 }
 0x114   : > { %857 = vrot.lane.b32.xlu1 %v4924_v59, %s5218_s10  ;;  %v582_v23 = vpop.f32.mrf.mxu0 }
 0x115   : > { %v4927_v39 = vpack.c.bf16 %v582_v23, %v580_v36  ;;  %v635_v40 = vpop.f32.mrf.mxu1 }
 0x116   : > { %v4928_v41 = vpack.c.bf16 %v635_v40, %v633_v38  ;;  %v586_v37 = vpop.f32.mrf.mxu0 }
 0x117   : > { %863 = vrot.lane.b32.xlu0 %v4927_v39, %s5218_s10  ;;  %v639_v42 = vpop.f32.mrf.mxu1 }
 0x118   : > { %865 = vrot.lane.b32.xlu1 %v4928_v41, %s5218_s10  ;;  %v588_v14 = vpop.f32.mrf.mxu0  ;;  %v6339_v41 = vpop.permute.xlu0 %1158 }
 0x119   : > { %v4931_v33 = vpack.c.bf16 %v588_v14, %v586_v37  ;;  %v641_v43 = vpop.f32.mrf.mxu1 }
 0x11a   : > { %v590_v44 = vpop.f32.mrf.mxu0  ;;  %v4932_v45 = vpack.c.bf16 %v641_v43, %v639_v42 }
 0x11b   : > { %871 = vrot.lane.b32.xlu0 %v4931_v33, %s5218_s10  ;;  %v643_v47 = vpop.f32.mrf.mxu1 }
 0x11c   : > { %v592_v49 = vpop.f32.mrf.mxu0  ;;  %v6341_v37 = vpop.permute.xlu0 %2194 }
 0x11d   : > { %v4935_v50 = vpack.c.bf16 %v592_v49, %v590_v44  ;;  %v645_v53 = vpop.f32.mrf.mxu1  ;;  %9093 = vst [vmem:[#allocation5_spill] sm:$0xff] %v6341_v37  ;;  %v1351_v49 = vrot.slane %v6284_v11, 4 }
 0x11e   : > { %v4936_v54 = vpack.c.bf16 %v645_v53, %v643_v47 }
 0x11f   : > { %873 = vrot.lane.b32.xlu0 %v4932_v45, %s5218_s10  ;;  %879 = vrot.lane.b32.xlu1 %v4935_v50, %s5218_s10  ;;  %v1540_v50 = vrot.slane %v6288_v8, 4 }
 0x120   : > { %v6343_v42 = vpop.permute.xlu0 %1538 }
 0x123   : > { %881 = vrot.lane.b32.xlu1 %v4936_v54, %s5218_s10 }
 0x130   : > { %v4955_v55 = vpop.f32.mrf.mxu1 }
 0x132   : > { %v4956_v56 = vpop.f32.mrf.mxu1 }
 0x133   : > { %v4957_v57 = vadd.f32 %v4956_v56, %v4955_v55 }
 0x134   : > { %v4958_v58 = vpop.f32.mrf.mxu1 }
 0x135   : > { %v4926_v60 = vpack.c.bf16 %v4957_v57, %v4957_v57 }
 0x136   : > { %v4959_v62 = vpop.f32.mrf.mxu1 }
 0x137   : > { %842 = vst.msk [vmem:[#allocation2 + $0x18] sm:$0xf] %vm8933_vm3, %v4926_v60  ;;  %v4960_v0 = vadd.f32 %v4959_v62, %v4958_v58  ;;  %861 = vrot.lane.b32.xlu1 %v4926_v60, %s5218_s10  ;;  %v6370_v62 = vsel %vm1355_vm2, %v1351_v49, %v6284_v11 }
 0x138   : > { %v4961_v1 = vpop.f32.mrf.mxu1  ;;  %vm1363_vm10 = vcmp.ne.s16.totalorder %v6370_v62, 0 }
 0x139   : > { %v4930_v2 = vpack.c.bf16 %v4960_v0, %v4960_v0  ;;  %v6374_v0 = vsel %vm1544_vm8, %v1540_v50, %v6288_v8 }
 0x13a   : > { %v4962_v4 = vpop.f32.mrf.mxu1  ;;  %vm1552_vm11 = vcmp.ne.s16.totalorder %v6374_v0, 0 }
 0x13b   : > { %846 = vst.msk [vmem:[#allocation2 + $0x4c] sm:$0xf] %vm8933_vm3, %v4930_v2  ;;  %v4963_v5 = vadd.f32 %v4962_v4, %v4961_v1  ;;  %869 = vrot.lane.b32.xlu0 %v4930_v2, %s5218_s10  ;;  %v1162_v1 = vrot.slane %v6292_v3, 4 }
 0x13c   : > { %v4964_v20 = vpop.f32.mrf.mxu1 }
 0x13d   : > { %v4934_v18 = vpack.c.bf16 %v4963_v5, %v4963_v5 }
 0x13e   : > { %v4965_v24 = vpop.f32.mrf.mxu1 }
 0x13f   : > { %850 = vst.msk [vmem:[#allocation2 + $0x80] sm:$0xf] %vm8933_vm3, %v4934_v18  ;;  %v4966_v25 = vadd.f32 %v4965_v24, %v4964_v20  ;;  %877 = vrot.lane.b32.xlu1 %v4934_v18, %s5218_s10  ;;  %v1541_v18 = vrot.slane %v6282_v9, 4 }
 0x141   : > { %v4938_v27 = vpack.c.bf16 %v4966_v25, %v4966_v25  ;;  %v6392_v25 = vsel %vm8936_vm9, %v1162_v1, %v6292_v3 }
 0x142   : > { %vm1174_vm13 = vcmp.ne.s16.totalorder %v6392_v25, 0 }
 0x143   : > { %854 = vst.msk [vmem:[#allocation2 + $0xb4] sm:$0xf] %vm8933_vm3, %v4938_v27  ;;  %885 = vrot.lane.b32.xlu0 %v4938_v27, %s5218_s10  ;;  %v2017_v27 = vrot.slane %v6296_v61, 4 }
 0x14e   : > { %v682_v28 = vpop.f32.mrf.mxu0 }
 0x150   : > { %v684_v30 = vpop.f32.mrf.mxu0 }
 0x151   : > { %v4925_v31 = vpack.c.bf16 %v684_v30, %v682_v28 }
 0x152   : > { %v686_v32 = vpop.f32.mrf.mxu0 }
 0x153   : > { %840 = vst [vmem:[#allocation2 + $0x10] sm:$0xff] %v4925_v31  ;;  %859 = vrot.lane.b32.xlu0 %v4925_v31, %s5218_s10 }
 0x154   : > { %v688_v34 = vpop.f32.mrf.mxu0 }
 0x155   : > { %v4929_v35 = vpack.c.bf16 %v688_v34, %v686_v32 }
 0x156   : > { %v692_v59 = vpop.f32.mrf.mxu0 }
 0x157   : > { %845 = vst [vmem:[#allocation2 + $0x44] sm:$0xff] %v4929_v35  ;;  %867 = vrot.lane.b32.xlu1 %v4929_v35, %s5218_s10  ;;  %v1546_v35 = vsel %vm901_vm1, %v1540_v50, %v1541_v18 }
 0x158   : > { %v694_v36 = vpop.f32.mrf.mxu0 }
 0x159   : > { %v4933_v38 = vpack.c.bf16 %v694_v36, %v692_v59 }
 0x15a   : > { %v696_v23 = vpop.f32.mrf.mxu0 }
 0x15b   : > { %849 = vst [vmem:[#allocation2 + $0x78] sm:$0xff] %v4933_v38  ;;  %875 = vrot.lane.b32.xlu0 %v4933_v38, %s5218_s10  ;;  %v6418_v38 = vsel %vm8934_vm12, %v2017_v27, %v6296_v61 }
 0x15c   : > { %v698_v39 = vpop.f32.mrf.mxu0  ;;  %vm2029_vm15 = vcmp.ne.s16.totalorder %v6418_v38, 0 }
 0x15d   : > { %v4937_v40 = vpack.c.bf16 %v698_v39, %v696_v23  ;;  %v2541_v23 = vrot.slane %v6300_v15, 4 }
 0x15f   : > { %853 = vst [vmem:[#allocation2 + $0xac] sm:$0xff] %v4937_v40  ;;  %883 = vrot.lane.b32.xlu1 %v4937_v40, %s5218_s10  ;;  %v6444_v50 = vsel %vm8935_vm14, %v2541_v23, %v6300_v15 }
 0x160   : > { %vm2553_vm0 = vcmp.ne.s16.totalorder %v6444_v50, 0 }
 0x185   : > { %v856_v14 = vpop.permute.xlu0 %855 }
 0x186   : > { %v6345_v33 = vpop.permute.xlu1 %857  ;;  %v887_v44 = vrot.slane %v856_v14, 4 }
 0x187   : > { %v888_v45 = vrot.slane %v6345_v33, 4 }
 0x188   : > { %v900_v47 = vsel %vm899_vm6, %v887_v44, %v856_v14 }
 0x189   : > { %v902_v53 = vsel %vm901_vm1, %v887_v44, %v888_v45  ;;  %944 = vst.msk [vmem:[#allocation2 + $0x18] sm:$0xff] %vm6347_vm7, %v900_v47  ;;  %v864_v54 = vpop.permute.xlu0 %863  ;;  %v1163_v44 = vrot.slane %v6286_v12, 4  ;;  %v6440_v47 = vsel %vm1544_vm8, %v1546_v35, %v6282_v9 }
 0x18a   : > { %v903_v55 = vsel %vm899_vm6, %v902_v53, %v6345_v33  ;;  %v6362_v56 = vpop.permute.xlu1 %865  ;;  %v890_v57 = vrot.slane %v864_v54, 4  ;;  %v2198_v53 = vrot.slane %v6304_v16, 4  ;;  %vm1553_vm4 = vcmp.ne.s16.totalorder %v6440_v47, 0 }
 0x18b   : > { %945 = vst [vmem:[#allocation2 + $0x20] sm:$0xff] %v903_v55  ;;  %v891_v58 = vrot.slane %v6362_v56, 4 }
 0x18c   : > { %v907_v60 = vsel %vm899_vm6, %v890_v57, %v864_v54 }
 0x18d   : > { %v908_v2 = vsel %vm901_vm1, %v890_v57, %v891_v58  ;;  %949 = vst.msk [vmem:[#allocation2 + $0x4c] sm:$0xff] %vm6347_vm7, %v907_v60  ;;  %v872_v4 = vpop.permute.xlu0 %871  ;;  %v2018_v57 = vrot.slane %v6290_v22, 4  ;;  %v1168_v60 = vsel %vm901_vm1, %v1162_v1, %v1163_v44 }
 0x18e   : > { %v909_v5 = vsel %vm899_vm6, %v908_v2, %v6362_v56  ;;  %v893_v20 = vrot.slane %v872_v4, 4  ;;  %v6464_v2 = vsel %vm1544_vm8, %v2198_v53, %v6304_v16  ;;  %v8958_v16 = vrot.slane %v6294_v48, 4 }
 0x18f   : > { %950 = vst [vmem:[#allocation2 + $0x54] sm:$0xff] %v909_v5  ;;  %v6474_v5 = vsel %vm8936_vm9, %v1168_v60, %v6286_v12  ;;  %vm2209_vm5 = vcmp.ne.s16.totalorder %v6464_v2, 0  ;;  %vm947_vm9 = vcmask 257024  }
 0x190   : > { %v913_v8 = vsel %vm899_vm6, %v893_v20, %v872_v4  ;;  %v6388_v24 = vld [vmem:[#allocation2 + $0x14] sm:$0xff] }
 0x191   : > { %953 = vst.msk [vmem:[#allocation2 + $0x80] sm:$0xff] %vm6347_vm7, %v913_v8  ;;  %v6397_v28 = vpop.permute.xlu0 %873  ;;  %v880_v30 = vpop.permute.xlu1 %879  ;;  %v1713_v31 = vsel %vm1363_vm10, %v6388_v24, 0  ;;  %v1556_v32 = vsel %vm1552_vm11, %v6388_v24, 0  ;;  %v1178_v14 = vsel %vm1174_vm13, %v6388_v24, 0  ;;  %v2033_v55 = vsel %vm2029_vm15, %v6388_v24, 0 }
 0x192   : > { %v894_v3 = vrot.slane %v6397_v28, 4  ;;  %v896_v34 = vrot.slane %v880_v30, 4  ;;  %1745 = vrot.lane.b32.xlu0 %v1713_v31, %s5219_s14  ;;  %1588 = vrot.lane.b32.xlu1 %v1556_v32, %s5220_s15  ;;  %v6458_v15 = vld [vmem:[#allocation2 + $0x1c] sm:$0xff]  ;;  %v2557_v4 = vsel %vm2553_vm0, %v6388_v24, 0  ;;  %v2023_v8 = vsel %vm901_vm1, %v2017_v27, %v2018_v57 }
 0x193   : > { %v1557_v1 = vsel %vm1553_vm4, %v6458_v15, 0  ;;  %v2213_v27 = vsel %vm2209_vm5, %v6388_v24, 0 }
 0x194   : > { %v914_v59 = vsel %vm901_vm1, %v893_v20, %v894_v3  ;;  %v919_v36 = vsel %vm899_vm6, %v896_v34, %v880_v30  ;;  %v1357_v20 = vsel %vm901_vm1, %v1351_v49, %v1352_v21  ;;  %v6495_v21 = vsel %vm8934_vm12, %v2023_v8, %v6290_v22 }
 0x195   : > { %v915_v39 = vsel %vm899_vm6, %v914_v59, %v6397_v28  ;;  %957 = vst.msk [vmem:[#allocation2 + $0xb4] sm:$0xff] %vm6347_vm7, %v919_v36  ;;  %v6425_v40 = vpop.permute.xlu1 %881  ;;  %vm1175_vm7 = vcmp.ne.s16.totalorder %v6474_v5, 0  ;;  %v6491_v11 = vsel %vm1355_vm2, %v1357_v20, %v6280_v6  ;;  %v2199_v30 = vrot.slane %v6298_v17, 4 }
 0x196   : > { %954 = vst [vmem:[#allocation2 + $0x88] sm:$0xff] %v915_v39  ;;  %v897_v61 = vrot.slane %v6425_v40, 4  ;;  %1399 = vrot.lane.b32.xlu0 %v1713_v31, %s5219_s14  ;;  %1210 = vrot.lane.b32.xlu1 %v1178_v14, %s5221_s16  ;;  %v1179_v49 = vsel %vm1175_vm7, %v6458_v15, 0  ;;  %v2547_v31 = vsel %vm901_vm1, %v2541_v23, %v8958_v16  ;;  %vm1364_vm2 = vcmp.ne.s16.totalorder %v6491_v11, 0  ;;  %v6542_v39 = vld [vmem:[#allocation2 + $0x48] sm:$0xff]  ;;  %v6562_v60 = vld [vmem:[#allocation2 + $0x50] sm:$0xff] }
 0x197   : > { %vm2030_vm3 = vcmp.ne.s16.totalorder %v6495_v21, 0  ;;  %v1714_v32 = vsel %vm1364_vm2, %v6458_v15, 0  ;;  %v2203_v35 = vsel %vm901_vm1, %v2198_v53, %v2199_v30  ;;  %v1717_v14 = vsel %vm1363_vm10, %v6542_v39, 0 }
 0x198   : > { %v920_v43 = vsel %vm901_vm1, %v896_v34, %v897_v61  ;;  %v2370_v6 = vsel %vm2030_vm3, %v6458_v15, 0  ;;  %v6519_v34 = vsel %vm8935_vm14, %v2547_v31, %v6294_v48  ;;  %v6532_v36 = vsel %vm1544_vm8, %v2203_v35, %v6298_v17  ;;  %v6610_v56 = vld [vmem:[#allocation2 + $0x7c] sm:$0xff] }
 0x199   : > { %v921_v54 = vsel %vm899_vm6, %v920_v43, %v6425_v40  ;;  %vm2554_vm12 = vcmp.ne.s16.totalorder %v6519_v34, 0  ;;  %vm2210_vm14 = vcmp.ne.s16.totalorder %v6532_v36, 0  ;;  %v1560_v43 = vsel %vm1552_vm11, %v6542_v39, 0 }
 0x19a   : > { %958 = vst [vmem:[#allocation2 + $0xbc] sm:$0xff] %v921_v54  ;;  %2065 = vrot.lane.b32.xlu0 %v2033_v55, %s5222_s17  ;;  %2401 = vrot.lane.b32.xlu1 %v2033_v55, %s5222_s17  ;;  %v2558_v59 = vsel %vm2554_vm12, %v6458_v15, 0  ;;  %v2214_v23 = vsel %vm2210_vm14, %v6458_v15, 0  ;;  %v1182_v53 = vsel %vm1174_vm13, %v6542_v39, 0  ;;  %v2037_v54 = vsel %vm2029_vm15, %v6542_v39, 0 }
 0x19b   : > { %v1718_v35 = vsel %vm1364_vm2, %v6562_v60, 0  ;;  %v2041_v40 = vsel %vm2029_vm15, %v6610_v56, 0 }
 0x19e   : > { %1590 = vrot.lane.b32.xlu0 %v1557_v1, %s5220_s15  ;;  %2589 = vrot.lane.b32.xlu1 %v2557_v4, %s5223_s18  ;;  %v1561_v1 = vsel %vm1553_vm4, %v6562_v60, 0  ;;  %v2561_v4 = vsel %vm2553_vm0, %v6542_v39, 0 }
 0x1a1   : > { %v6688_v0 = vld [vmem:[#allocation2 + $0xb8] sm:$0xff] }
 0x1a2   : > { %1212 = vrot.lane.b32.xlu0 %v1179_v49, %s5221_s16  ;;  %2245 = vrot.lane.b32.xlu1 %v2213_v27, %s5220_s15  ;;  %v1183_v49 = vsel %vm1175_vm7, %v6562_v60, 0  ;;  %v2217_v27 = vsel %vm2209_vm5, %v6542_v39, 0  ;;  %v1726_v50 = vsel %vm1364_vm2, %v6688_v0, 0  ;;  %v2382_v5 = vsel %vm2030_vm3, %v6688_v0, 0 }
 0x1a6   : > { %2403 = vrot.lane.b32.xlu0 %v2370_v6, %s5222_s17  ;;  %1747 = vrot.lane.b32.xlu1 %v1714_v32, %s5219_s14 }
 0x1a9   : > { %v862_v20 = vpop.permute.xlu1 %861 }
 0x1aa   : > { %2591 = vrot.lane.b32.xlu0 %v2558_v59, %s5223_s18  ;;  %1401 = vrot.lane.b32.xlu1 %v1714_v32, %s5219_s14  ;;  %v2374_v32 = vsel %vm2030_vm3, %v6562_v60, 0 }
 0x1ad   : > { %v870_v55 = vpop.permute.xlu0 %869 }
 0x1ae   : > { %2247 = vrot.lane.b32.xlu0 %v2214_v23, %s5220_s15  ;;  %2067 = vrot.lane.b32.xlu1 %v2370_v6, %s5222_s17 }
 0x1b1   : > { %v878_v31 = vpop.permute.xlu1 %877 }
 0x1b2   : > { %1753 = vrot.lane.b32.xlu0 %v1717_v14, %s5219_s14  ;;  %1596 = vrot.lane.b32.xlu1 %v1560_v43, %s5220_s15 }
 0x1b5   : > { %v886_v8 = vpop.permute.xlu0 %885 }
 0x1b6   : > { %1407 = vrot.lane.b32.xlu0 %v1717_v14, %s5219_s14  ;;  %1218 = vrot.lane.b32.xlu1 %v1182_v53, %s5221_s16 }
 0x1ba   : > { %2073 = vrot.lane.b32.xlu0 %v2037_v54, %s5222_s17  ;;  %2409 = vrot.lane.b32.xlu1 %v2037_v54, %s5222_s17  ;;  %v2562_v54 = vsel %vm2554_vm12, %v6562_v60, 0 }
 0x1be   : > { %1598 = vrot.lane.b32.xlu0 %v1561_v1, %s5220_s15  ;;  %2597 = vrot.lane.b32.xlu1 %v2561_v4, %s5223_s18 }
 0x1c2   : > { %1220 = vrot.lane.b32.xlu0 %v1183_v49, %s5221_s16  ;;  %2253 = vrot.lane.b32.xlu1 %v2217_v27, %s5220_s15  ;;  %v2218_v49 = vsel %vm2210_vm14, %v6562_v60, 0 }
 0x1c5   : > { %v860_v6 = vpop.permute.xlu0 %859 }
 0x1c6   : > { %v889_v59 = vrot.slane %v860_v6, 4  ;;  %2411 = vrot.lane.b32.xlu0 %v2374_v32, %s5222_s17  ;;  %1755 = vrot.lane.b32.xlu1 %v1718_v35, %s5219_s14 }
 0x1c8   : > { %v904_v23 = vsel %vm901_vm1, %v888_v45, %v889_v59  ;;  %v906_v14 = vsel %vm899_vm6, %v889_v59, %v862_v20  ;;  %v1721_v59 = vsel %vm1363_vm10, %v6610_v56, 0 }
 0x1c9   : > { %v905_v43 = vsel %vm899_vm6, %v904_v23, %v860_v6  ;;  %948 = vst.msk [vmem:[#allocation2 + $0x30] sm:$0xf] %vm947_vm9, %v906_v14  ;;  %v868_v53 = vpop.permute.xlu1 %867  ;;  %v1186_v14 = vsel %vm1174_vm13, %v6610_v56, 0 }
 0x1ca   : > { %946 = vst [vmem:[#allocation2 + $0x28] sm:$0xff] %v905_v43  ;;  %v892_v1 = vrot.slane %v868_v53, 4  ;;  %2599 = vrot.lane.b32.xlu0 %v2562_v54, %s5223_s18  ;;  %1409 = vrot.lane.b32.xlu1 %v1718_v35, %s5219_s14  ;;  %v2565_v43 = vsel %vm2553_vm0, %v6610_v56, 0  ;;  %v2221_v54 = vsel %vm2209_vm5, %v6610_v56, 0 }
 0x1cc   : > { %v910_v33 = vsel %vm901_vm1, %v891_v58, %v892_v1  ;;  %v912_v45 = vsel %vm899_vm6, %v892_v1, %v870_v55 }
 0x1cd   : > { %v911_v4 = vsel %vm899_vm6, %v910_v33, %v868_v53  ;;  %952 = vst.msk [vmem:[#allocation2 + $0x64] sm:$0xf] %vm947_vm9, %v912_v45  ;;  %v876_v20 = vpop.permute.xlu0 %875 }
 0x1ce   : > { %951 = vst [vmem:[#allocation2 + $0x5c] sm:$0xff] %v911_v4  ;;  %v895_v27 = vrot.slane %v876_v20, 4  ;;  %2255 = vrot.lane.b32.xlu0 %v2218_v49, %s5220_s15  ;;  %2075 = vrot.lane.b32.xlu1 %v2374_v32, %s5222_s17  ;;  %v1564_v32 = vsel %vm1552_vm11, %v6610_v56, 0 }
 0x1d0   : > { %v916_v58 = vsel %vm901_vm1, %v894_v3, %v895_v27  ;;  %v918_v55 = vsel %vm899_vm6, %v895_v27, %v878_v31 }
 0x1d1   : > { %v917_v6 = vsel %vm899_vm6, %v916_v58, %v876_v20  ;;  %956 = vst.msk [vmem:[#allocation2 + $0x98] sm:$0xf] %vm947_vm9, %v918_v55  ;;  %v884_v35 = vpop.permute.xlu1 %883  ;;  %v1709_v20 = vld [vmem:[#allocation2 + $0xb0] sm:$0xff] }
 0x1d2   : > { %955 = vst [vmem:[#allocation2 + $0x90] sm:$0xff] %v917_v6  ;;  %v898_v23 = vrot.slane %v884_v35, 4  ;;  %1761 = vrot.lane.b32.xlu0 %v1721_v59, %s5219_s14  ;;  %1604 = vrot.lane.b32.xlu1 %v1564_v32, %s5220_s15  ;;  %v1725_v49 = vsel %vm1363_vm10, %v1709_v20, 0  ;;  %v1568_v27 = vsel %vm1552_vm11, %v1709_v20, 0  ;;  %v1190_v58 = vsel %vm1174_vm13, %v1709_v20, 0 }
 0x1d3   : > { %v2045_v55 = vsel %vm2029_vm15, %v1709_v20, 0  ;;  %v2569_v62 = vsel %vm2553_vm0, %v1709_v20, 0  ;;  %v2225_v25 = vsel %vm2209_vm5, %v1709_v20, 0  ;;  %vm1127_vm10 = vcmp.lt.s32.totalorder %v6148_v10, 26 }
 0x1d4   : > { %v922_v28 = vsel %vm901_vm1, %v897_v61, %v898_v23  ;;  %v924_v3 = vsel %vm899_vm6, %v898_v23, %v886_v8  ;;  %v1517_v61 = vld [vmem:[#allocation2 + $0x84] sm:$0xff]  ;;  %vm1128_vm11 = vcmp.lt.s32.totalorder %v6153_v51, 26  ;;  %vm1637_vm0 = vcmask 97280  }
 0x1d5   : > { %v923_v31 = vsel %vm899_vm6, %v922_v28, %v884_v35  ;;  %960 = vst.msk [vmem:[#allocation2 + $0xcc] sm:$0xf] %vm947_vm9, %v924_v3  ;;  %v1565_v8 = vsel %vm1553_vm4, %v1517_v61, 0  ;;  %v1187_v53 = vsel %vm1175_vm7, %v1517_v61, 0  ;;  %v2378_v1 = vsel %vm2030_vm3, %v1517_v61, 0  ;;  %vm2527_vm15 = vmpackc.low %vm1128_vm11, %vm1127_vm10  ;;  %v6812_v36 = vld [vmem:[#allocation2 + $0x58] sm:$0xff] }
 0x1d6   : > { %959 = vst [vmem:[#allocation2 + $0xc4] sm:$0xff] %v923_v31  ;;  %1415 = vrot.lane.b32.xlu0 %v1721_v59, %s5219_s14  ;;  %1226 = vrot.lane.b32.xlu1 %v1186_v14, %s5221_s16  ;;  %v1722_v33 = vsel %vm1364_vm2, %v1517_v61, 0  ;;  %v2566_v45 = vsel %vm2554_vm12, %v1517_v61, 0  ;;  %v2222_v4 = vsel %vm2210_vm14, %v1517_v61, 0  ;;  %vm1108_vm9 = vcmp.ge.s32.totalorder %v6195_v7, 2 }
 0x1d7   : > { %v1569_v59 = vsel %vm1553_vm4, %v6688_v0, 0  ;;  %vm1149_vm13 = vmpackc.low %vm1108_vm9, %vm1108_vm9  ;;  %v2531_v10 = vsel %vm2527_vm15, 65537, %v8950_v52  ;;  %vm1259_vm4 = vcmask 113664   ;;  %vm2114_vm5 = vcmask 89088  }
 0x1d8   : > { %v1153_v47 = vsel %vm1149_vm13, 65537, %v8950_v52  ;;  %vm1448_vm2 = vcmask 105472   ;;  %vm2638_vm3 = vcmask 80896   ;;  %vm9104_vm10 = vcmask 957440  }
 0x1d9   : > { %vm1366_vm15 = vcmp.ne.s16.totalorder %v6317_v29, 0 }
 0x1da   : > { %2081 = vrot.lane.b32.xlu0 %v2041_v40, %s5222_s17  ;;  %2417 = vrot.lane.b32.xlu1 %v2041_v40, %s5222_s17 }
 0x1de   : > { %1606 = vrot.lane.b32.xlu0 %v1565_v8, %s5220_s15  ;;  %2605 = vrot.lane.b32.xlu1 %v2565_v43, %s5223_s18 }
 0x1e2   : > { %1228 = vrot.lane.b32.xlu0 %v1187_v53, %s5221_s16  ;;  %2261 = vrot.lane.b32.xlu1 %v2221_v54, %s5220_s15 }
 0x1e6   : > { %2419 = vrot.lane.b32.xlu0 %v2378_v1, %s5222_s17  ;;  %1763 = vrot.lane.b32.xlu1 %v1722_v33, %s5219_s14 }
 0x1ea   : > { %2607 = vrot.lane.b32.xlu0 %v2566_v45, %s5223_s18  ;;  %1417 = vrot.lane.b32.xlu1 %v1722_v33, %s5219_s14 }
 0x1ee   : > { %2263 = vrot.lane.b32.xlu0 %v2222_v4, %s5220_s15  ;;  %2083 = vrot.lane.b32.xlu1 %v2378_v1, %s5222_s17 }
 0x1f2   : > { %1769 = vrot.lane.b32.xlu0 %v1725_v49, %s5219_s14  ;;  %1612 = vrot.lane.b32.xlu1 %v1568_v27, %s5220_s15 }
 0x1f6   : > { %1423 = vrot.lane.b32.xlu0 %v1725_v49, %s5219_s14  ;;  %1234 = vrot.lane.b32.xlu1 %v1190_v58, %s5221_s16 }
 0x1fa   : > { %2089 = vrot.lane.b32.xlu0 %v2045_v55, %s5222_s17  ;;  %2425 = vrot.lane.b32.xlu1 %v2045_v55, %s5222_s17 }
 0x1fe   : > { %1903 = vrot.lane.b32.xlu0 %v1517_v61, %s5220_s15  ;;  %2613 = vrot.lane.b32.xlu1 %v2569_v62, %s5223_s18  ;;  %v1191_v61 = vsel %vm1175_vm7, %v6688_v0, 0  ;;  %vm9101_vm7 = vcmask 932864  }
 0x202   : > { %1911 = vrot.lane.b32.xlu0 %v6688_v0, %s5220_s15  ;;  %2269 = vrot.lane.b32.xlu1 %v2225_v25, %s5220_s15 }
 0x204   : > { %v1746_v38 = vpop.permute.xlu0 %1745  ;;  %v1589_v6 = vpop.permute.xlu1 %1588 }
 0x205   : > { %v1620_v23 = vrot.slane %v1589_v6, 4  ;;  %v1777_v1 = vrot.slane %v1746_v38, 4 }
 0x206   : > { %1885 = vrot.lane.b32.xlu0 %v6388_v24, %s5220_s15  ;;  %1771 = vrot.lane.b32.xlu1 %v1726_v50, %s5219_s14 }
 0x208   : > { %v6701_v35 = vpop.permute.xlu0 %1399  ;;  %v1211_v2 = vpop.permute.xlu1 %1210 }
 0x209   : > { %v1242_v14 = vrot.slane %v1211_v2, 4  ;;  %v1431_v62 = vrot.slane %v6701_v35, 4 }
 0x20a   : > { %1614 = vrot.lane.b32.xlu0 %v1569_v59, %s5220_s15  ;;  %1901 = vrot.lane.b32.xlu1 %v6610_v56, %s5220_s15 }
 0x20c   : > { %v6712_v24 = vpop.permute.xlu0 %2065  ;;  %v2402_v11 = vpop.permute.xlu1 %2401 }
 0x20d   : > { %v2433_v33 = vrot.slane %v2402_v11, 4 }
 0x20e   : > { %1893 = vrot.lane.b32.xlu0 %v6542_v39, %s5220_s15  ;;  %1909 = vrot.lane.b32.xlu1 %v1709_v20, %s5220_s15 }
 0x210   : > { %v6719_v51 = vpop.permute.xlu0 %1590  ;;  %v2590_v32 = vpop.permute.xlu1 %2589 }
 0x211   : > { %v8946_v56 = vrot.slane %v6719_v51, 4  ;;  %v2621_v25 = vrot.slane %v2590_v32, 4 }
 0x212   : > { %1160 = vrot.lane.b32.xlu0 %v1153_v47, %s5215_s11  ;;  %2537 = vrot.lane.b32.xlu1 %v2531_v10, %s5217_s6  ;;  %s4715_s11 = sshll.u32 %s4710_s13, 4 }
 0x213   : > { %v1636_v39 = vsel %vm901_vm1, %v1620_v23, %v8946_v56  ;;  %v2097_v23 = vrot.slane %v6712_v24, 4  ;;  %p166_p3 = scmp.lt.s32.totalorder %s4715_s11, 31 }
 0x214   : > { %v6728_v28 = vsel %vm1637_vm0, %v1589_v6, %v1636_v39  ;;  %v6730_v3 = vpop.permute.xlu0 %1212  ;;  %v2246_v31 = vpop.permute.xlu1 %2245 }
 0x215   : > { %9096 = vst [vmem:[#allocation6_spill] sm:$0xff] %v6730_v3  ;;  %v8941_v40 = vrot.slane %v6730_v3, 4  ;;  %v2277_v39 = vrot.slane %v2246_v31, 4  ;;  %s9296_s11 = smov (!%p166_p3, %s4715_s11), 31 }
 0x216   : > { %1236 = vrot.lane.b32.xlu0 %v1191_v61, %s5221_s16  ;;  %1425 = vrot.lane.b32.xlu1 %v1726_v50, %s5219_s14  ;;  %v6810_v61 = vld [vmem:[#allocation2 + $0x24] sm:$0xff]  ;;  %s5093_s13 = smul.u32 12, %s9296_s11 }
 0x217   : > { %v1258_v8 = vsel %vm901_vm1, %v1242_v14, %v8941_v40 }
 0x218   : > { %v6742_v43 = vsel %vm1259_vm4, %v1211_v2, %v1258_v8  ;;  %v6744_v53 = vpop.permute.xlu0 %2403  ;;  %v6746_v54 = vpop.permute.xlu1 %1747  ;;  %s6859_s22 = scalar_lea.vmem %s8931_s2, %s5093_s13 }
 0x219   : > { %9097 = vst [vmem:[#allocation7_spill] sm:$0xff] %v6744_v53  ;;  %v8940_v45 = vrot.slane %v6744_v53, 4  ;;  %v8949_v4 = vrot.slane %v6746_v54, 4 }
 0x21a   : > { %2427 = vrot.lane.b32.xlu0 %v2382_v5, %s5222_s17  ;;  %1887 = vrot.lane.b32.xlu1 %v6458_v15, %s5220_s15  ;;  %v2570_v15 = vsel %vm2554_vm12, %v6688_v0, 0  ;;  %vm1365_vm12 = vcmp.ne.s16.totalorder %v6313_v26, 0 }
 0x21b   : > { %v2449_v20 = vsel %vm901_vm1, %v2433_v33, %v8940_v45  ;;  %v1793_v21 = vsel %vm901_vm1, %v1777_v1, %v8949_v4 }
 0x21c   : > { %v2450_v49 = vsel %vm2114_vm5, %v2402_v11, %v2449_v20  ;;  %v6764_v27 = vsel %vm1448_vm2, %v1746_v38, %v1793_v21  ;;  %v6766_v58 = vpop.permute.xlu0 %2591  ;;  %v6768_v55 = vpop.permute.xlu1 %1401  ;;  %v8959_v38 = vrot.slane %v6302_v13, 4  ;;  %v1715_v20 = vsel %vm1365_vm12, %v6810_v61, 0 }
 0x21d   : > { %9098 = vst [vmem:[#allocation8_spill] sm:$0xff] %v6766_v58  ;;  %2493 = vst [vmem:[#allocation3 + $0x310] sm:$0xff] %v2450_v49  ;;  %v8937_v6 = vrot.slane %v6766_v58, 4  ;;  %v8942_v50 = vrot.slane %v6768_v55, 4  ;;  %v1719_v21 = vsel %vm1365_vm12, %v6812_v36, 0 }
 0x21e   : > { %2615 = vrot.lane.b32.xlu0 %v2570_v15, %s5223_s18  ;;  %1895 = vrot.lane.b32.xlu1 %v6562_v60, %s5220_s15  ;;  %v2226_v60 = vsel %vm2210_vm14, %v6688_v0, 0 }
 0x21f   : > { %v2637_v34 = vsel %vm901_vm1, %v2621_v25, %v8937_v6  ;;  %v1447_v2 = vsel %vm901_vm1, %v1431_v62, %v8942_v50  ;;  %v8954_v62 = vrot.slane %v6339_v41, 4 }
 0x220   : > { %v6787_v59 = vsel %vm2638_vm3, %v2590_v32, %v2637_v34  ;;  %v6791_v11 = vsel %vm1448_vm2, %v6701_v35, %v1447_v2  ;;  %v6793_v47 = vpop.permute.xlu0 %2247  ;;  %v6795_v10 = vpop.permute.xlu1 %2067  ;;  %v1548_v35 = vsel %vm901_vm1, %v1541_v18, %v8959_v38  ;;  %v6851_v2 = vld [vmem:[#allocation2 + $0x8c] sm:$0xff] }
 0x221   : > { %9099 = vst [vmem:[#allocation9_spill] sm:$0xff] %v6793_v47  ;;  %9100 = vst [vmem:[#allocation10_spill] sm:$0xff] %v6795_v10  ;;  %v8939_v14 = vrot.slane %v6793_v47, 4  ;;  %v8938_v32 = vrot.slane %v6795_v10, 4  ;;  %v1549_v33 = vsel %vm1544_vm8, %v1548_v35, %v6302_v13  ;;  %v1723_v35 = vsel %vm1365_vm12, %v6851_v2, 0 }
 0x222   : > { %2271 = vrot.lane.b32.xlu0 %v2226_v60, %s5220_s15  ;;  %2091 = vrot.lane.b32.xlu1 %v2382_v5, %s5222_s17  ;;  %vm1554_vm14 = vcmp.ne.s16.totalorder %v1549_v33, 0  ;;  %v1170_v60 = vsel %vm901_vm1, %v1163_v44, %v8954_v62 }
 0x223   : > { %v2293_v0 = vsel %vm901_vm1, %v2277_v39, %v8939_v14  ;;  %v2113_v8 = vsel %vm901_vm1, %v2097_v23, %v8938_v32  ;;  %v1558_v49 = vsel %vm1554_vm14, %v6810_v61, 0  ;;  %v1562_v15 = vsel %vm1554_vm14, %v6812_v36, 0 }
 0x224   : > { %v2294_v9 = vsel %vm1637_vm0, %v2246_v31, %v2293_v0  ;;  %v2115_v18 = vsel %vm2114_vm5, %v6712_v24, %v2113_v8  ;;  %v6824_v5 = vpop.permute.xlu0 %1753  ;;  %v1597_v1 = vpop.permute.xlu1 %1596  ;;  %v1566_v0 = vsel %vm1554_vm14, %v6851_v2, 0  ;;  %v6881_v12 = vsel %vm9101_vm7, %v1170_v60, %v6339_v41 }
 0x225   : > { %2337 = vst [vmem:[#allocation3 + $0x2a0] sm:$0xff] %v2294_v9  ;;  %2158 = vst [vmem:[#allocation3 + $0x230] sm:$0xff] %v2115_v18  ;;  %v1624_v8 = vrot.slane %v1597_v1, 4  ;;  %v6874_v18 = vld [vmem:[#allocation2 + $0xc0] sm:$0xff]  ;;  %vm1176_vm9 = vcmp.ne.s16.totalorder %v6881_v12, 0  ;;  %v1781_v14 = vrot.slane %v6824_v5, 4 }
 0x226   : > { %1749 = vrot.lane.b32.xlu0 %v1715_v20, %s5219_s14  ;;  %1757 = vrot.lane.b32.xlu1 %v1719_v21, %s5219_s14  ;;  %v6896_v6 = vsel %vm1365_vm12, %v6874_v18, 0  ;;  %v1570_v22 = vsel %vm1554_vm14, %v6874_v18, 0  ;;  %vm9125_vm14 = vcmask 965632  }
 0x228   : > { %v6836_v24 = vpop.permute.xlu0 %1407  ;;  %v1219_v31 = vpop.permute.xlu1 %1218 }
 0x22a   : > { %1592 = vrot.lane.b32.xlu0 %v1558_v49, %s5220_s15  ;;  %1600 = vrot.lane.b32.xlu1 %v1562_v15, %s5220_s15 }
 0x22c   : > { %v6849_v25 = vpop.permute.xlu0 %2073  ;;  %v2410_v34 = vpop.permute.xlu1 %2409 }
 0x22e   : > { %1403 = vrot.lane.b32.xlu0 %v1715_v20, %s5219_s14  ;;  %1411 = vrot.lane.b32.xlu1 %v1719_v21, %s5219_s14  ;;  %v8943_v20 = vrot.slane %v6306_v19, 4 }
 0x230   : > { %v6866_v23 = vpop.permute.xlu0 %1598  ;;  %v2598_v39 = vpop.permute.xlu1 %2597  ;;  %v2025_v26 = vsel %vm901_vm1, %v2018_v57, %v8943_v20 }
 0x231   : > { %v8945_v9 = vrot.slane %v6866_v23, 4  ;;  %v2625_v56 = vrot.slane %v2598_v39, 4 }
 0x232   : > { %1765 = vrot.lane.b32.xlu0 %v1723_v35, %s5219_s14  ;;  %1608 = vrot.lane.b32.xlu1 %v1566_v0, %s5220_s15  ;;  %v1246_v0 = vrot.slane %v1219_v31, 4 }
 0x233   : > { %v1644_v44 = vsel %vm901_vm1, %v1624_v8, %v8945_v9  ;;  %v1184_v9 = vsel %vm1176_vm9, %v6812_v36, 0 }
 0x234   : > { %v6887_v21 = vsel %vm1637_vm0, %v1597_v1, %v1644_v44  ;;  %v6889_v49 = vpop.permute.xlu0 %1220  ;;  %v6891_v15 = vpop.permute.xlu1 %2253  ;;  %v1188_v44 = vsel %vm1176_vm9, %v6851_v2, 0 }
 0x235   : > { %9102 = vst [vmem:[#allocation11_spill] sm:$0xff] %v6889_v49  ;;  %v8944_v60 = vrot.slane %v6889_v49, 4  ;;  %v2281_v52 = vrot.slane %v6891_v15, 4 }
 0x236   : > { %1419 = vrot.lane.b32.xlu0 %v1723_v35, %s5219_s14  ;;  %1773 = vrot.lane.b32.xlu1 %v6896_v6, %s5219_s14  ;;  %v2437_v35 = vrot.slane %v2410_v34, 4 }
 0x237   : > { %v1266_v1 = vsel %vm901_vm1, %v1246_v0, %v8944_v60 }
 0x238   : > { %v6920_v45 = vsel %vm1259_vm4, %v1219_v31, %v1266_v1  ;;  %v6922_v40 = vpop.permute.xlu0 %2411  ;;  %v6924_v50 = vpop.permute.xlu1 %1755  ;;  %v6936_v31 = vsel %vm9104_vm10, %v2025_v26, %v6306_v19  ;;  %v1180_v26 = vsel %vm1176_vm9, %v6810_v61, 0  ;;  %vm9130_vm10 = vcmask 932864  }
 0x239   : > { %9103 = vst [vmem:[#allocation12_spill] sm:$0xff] %v6922_v40  ;;  %v8947_v57 = vrot.slane %v6922_v40, 4  ;;  %v8948_v0 = vrot.slane %v6924_v50, 4  ;;  %vm2031_vm11 = vcmp.ne.s16.totalorder %v6936_v31, 0 }
 0x23a   : > { %1616 = vrot.lane.b32.xlu0 %v1570_v22, %s5220_s15  ;;  %1230 = vrot.lane.b32.xlu1 %v1188_v44, %s5221_s16  ;;  %v1435_v22 = vrot.slane %v6836_v24, 4  ;;  %v2375_v17 = vsel %vm2031_vm11, %v6812_v36, 0 }
 0x23b   : > { %v2456_v33 = vsel %vm901_vm1, %v2437_v35, %v8947_v57  ;;  %v1800_v1 = vsel %vm901_vm1, %v1781_v14, %v8948_v0 }
 0x23c   : > { %v6954_v44 = vsel %vm2114_vm5, %v2410_v34, %v2456_v33  ;;  %v6958_v35 = vsel %vm1448_vm2, %v6824_v5, %v1800_v1  ;;  %v6960_v57 = vpop.permute.xlu0 %2599  ;;  %v6962_v14 = vpop.permute.xlu1 %1409  ;;  %v6982_v33 = vsel %vm2031_vm11, %v6851_v2, 0  ;;  %v2101_v1 = vrot.slane %v6849_v25, 4 }
 0x23d   : > { %9105 = vst [vmem:[#allocation13_spill] sm:$0xff] %v6960_v57  ;;  %v8952_v20 = vrot.slane %v6960_v57, 4  ;;  %v8953_v0 = vrot.slane %v6962_v14, 4 }
 0x23e   : > { %1222 = vrot.lane.b32.xlu0 %v1184_v9, %s5221_s16  ;;  %1214 = vrot.lane.b32.xlu1 %v1180_v26, %s5221_s16 }
 0x23f   : > { %v2645_v5 = vsel %vm901_vm1, %v2625_v56, %v8952_v20  ;;  %v1455_v34 = vsel %vm901_vm1, %v1435_v22, %v8953_v0 }
 0x240   : > { %v6987_v9 = vsel %vm2638_vm3, %v2598_v39, %v2645_v5  ;;  %v6991_v26 = vsel %vm1448_vm2, %v6836_v24, %v1455_v34  ;;  %v6993_v56 = vpop.permute.xlu0 %2255  ;;  %v6995_v20 = vpop.permute.xlu1 %2075  ;;  %v8957_v39 = vrot.slane %v6341_v37, 4  ;;  %v2371_v5 = vsel %vm2031_vm11, %v6810_v61, 0 }
 0x241   : > { %9106 = vst [vmem:[#allocation14_spill] sm:$0xff] %v6993_v56  ;;  %9107 = vst [vmem:[#allocation15_spill] sm:$0xff] %v6995_v20  ;;  %v8956_v22 = vrot.slane %v6993_v56, 4  ;;  %v8955_v0 = vrot.slane %v6995_v20, 4 }
 0x242   : > { %2421 = vrot.lane.b32.xlu0 %v6982_v33, %s5222_s17  ;;  %2015 = vrot.lane.b32.xlu1 %v6266_v63, %s5216_s23 }
 0x243   : > { %v2300_v34 = vsel %vm901_vm1, %v2281_v52, %v8956_v22  ;;  %v2121_v62 = vsel %vm901_vm1, %v2101_v1, %v8955_v0  ;;  %v2205_v52 = vsel %vm901_vm1, %v2199_v30, %v8957_v39  ;;  %v1192_v1 = vsel %vm1176_vm9, %v6874_v18, 0  ;;  %v5141_v0 = vld [vmem:[%s6859_s22 + $0x4] ss:$12 sps:$4 sm:$0xff]  }
 0x244   : > { %v7020_v32 = vsel %vm1637_vm0, %v6891_v15, %v2300_v34  ;;  %v7024_v63 = vsel %vm2114_vm5, %v6849_v25, %v2121_v62  ;;  %v1762_v24 = vpop.permute.xlu0 %1761  ;;  %v1605_v8 = vpop.permute.xlu1 %1604  ;;  %v2206_v15 = vsel %vm1544_vm8, %v2205_v52, %v6341_v37  ;;  %3699 = vmatprep.mubr.bf16.mxu1 %v5141_v0  ;;  %vm1129_vm9 = vcmp.lt.s32.totalorder %v6195_v7, 26 }
 0x245   : > { %9108 = vst [vmem:[#allocation16_spill] sm:$0xff] %v7020_v32  ;;  %9109 = vst [vmem:[#allocation17_spill] sm:$0xff] %v7024_v63  ;;  %vm2211_vm13 = vcmp.ne.s16.totalorder %v2206_v15, 0  ;;  %v1628_v22 = vrot.slane %v1605_v8, 4  ;;  %v1785_v31 = vrot.slane %v1762_v24, 4 }
 0x246   : > { %2405 = vrot.lane.b32.xlu0 %v2371_v5, %s5222_s17  ;;  %1427 = vrot.lane.b32.xlu1 %v6896_v6, %s5219_s14  ;;  %v2223_v34 = vsel %vm2211_vm13, %v6851_v2, 0  ;;  %v2219_v39 = vsel %vm2211_vm13, %v6812_v36, 0  ;;  %v2215_v16 = vsel %vm2211_vm13, %v6810_v61, 0 }
 0x248   : > { %v1416_v62 = vpop.permute.xlu0 %1415  ;;  %v1227_v25 = vpop.permute.xlu1 %1226 }
 0x249   : > { %v1250_v38 = vrot.slane %v1227_v25, 4  ;;  %v1439_v10 = vrot.slane %v1416_v62, 4 }
 0x24a   : > { %1238 = vrot.lane.b32.xlu0 %v1192_v1, %s5221_s16  ;;  %2413 = vrot.lane.b32.xlu1 %v2375_v17, %s5222_s17 }
 0x24c   : > { %v7047_v30 = vpop.permute.xlu0 %2081  ;;  %v2418_v6 = vpop.permute.xlu1 %2417 }
 0x24e   : > { %2196 = vrot.lane.b32.xlu0 %v6234_v46, %s5214_s20  ;;  %2265 = vrot.lane.b32.xlu1 %v2223_v34, %s5220_s15  ;;  %s5094_s20 = smul.u32 56, %s9296_s11 }
 0x250   : > { %v7054_v12 = vpop.permute.xlu0 %1606  ;;  %v2606_v52 = vpop.permute.xlu1 %2605  ;;  %s8507_s24 = scalar_lea.vmem %s8932_s3, %s5094_s20 }
 0x251   : > { %9110 = vst [vmem:[#allocation18_spill] sm:$0xff] %v7054_v12  ;;  %v8962_v1 = vrot.slane %v7054_v12, 4 }
 0x252   : > { %2257 = vrot.lane.b32.xlu0 %v2219_v39, %s5220_s15  ;;  %2249 = vrot.lane.b32.xlu1 %v2215_v16, %s5220_s15  ;;  %v2383_v39 = vsel %vm2031_vm11, %v6874_v18, 0  ;;  %vm2528_vm11 = vmpackc.low %vm1129_vm9, %vm1129_vm9 }
 0x253   : > { %v1651_v46 = vsel %vm901_vm1, %v1628_v22, %v8962_v1  ;;  %v2441_v1 = vrot.slane %v2418_v6, 4 }
 0x254   : > { %v7068_v34 = vsel %vm1637_vm0, %v1605_v8, %v1651_v46  ;;  %v7070_v4 = vpop.permute.xlu0 %1228  ;;  %v2262_v60 = vpop.permute.xlu1 %2261  ;;  %v2227_v46 = vsel %vm2211_vm13, %v6874_v18, 0 }
 0x255   : > { %9111 = vst [vmem:[#allocation19_spill] sm:$0xff] %v7070_v4  ;;  %v8965_v58 = vrot.slane %v7070_v4, 4 }
 0x256   : > { %2077 = vrot.lane.b32.xlu0 %v2375_v17, %s5222_s17  ;;  %2429 = vrot.lane.b32.xlu1 %v2383_v39, %s5222_s17 }
 0x257   : > { %v1273_v16 = vsel %vm901_vm1, %v1250_v38, %v8965_v58 }
 0x258   : > { %v7082_v8 = vsel %vm1259_vm4, %v1227_v25, %v1273_v16  ;;  %v7084_v0 = vpop.permute.xlu0 %2419  ;;  %v7086_v22 = vpop.permute.xlu1 %1763 }
 0x259   : > { %9112 = vst [vmem:[#allocation20_spill] sm:$0xff] %v7084_v0  ;;  %9113 = vst [vmem:[#allocation21_spill] sm:$0xff] %v7086_v22  ;;  %v8970_v17 = vrot.slane %v7084_v0, 4  ;;  %v8971_v57 = vrot.slane %v7086_v22, 4 }
 0x25a   : > { %2273 = vrot.lane.b32.xlu0 %v2227_v46, %s5220_s15  ;;  %2085 = vrot.lane.b32.xlu1 %v6982_v33, %s5222_s17  ;;  %v2629_v33 = vrot.slane %v2606_v52, 4 }
 0x25b   : > { %v2463_v38 = vsel %vm901_vm1, %v2441_v1, %v8970_v17  ;;  %v1807_v25 = vsel %vm901_vm1, %v1785_v31, %v8971_v57  ;;  %v2285_v57 = vrot.slane %v2262_v60, 4 }
 0x25c   : > { %v7102_v15 = vsel %vm2114_vm5, %v2418_v6, %v2463_v38  ;;  %v7105_v16 = vsel %vm1448_vm2, %v1762_v24, %v1807_v25  ;;  %v7107_v58 = vpop.permute.xlu0 %2607  ;;  %v7109_v46 = vpop.permute.xlu1 %1417 }
 0x25d   : > { %9114 = vst [vmem:[#allocation22_spill] sm:$0xff] %v7107_v58  ;;  %9115 = vst [vmem:[#allocation23_spill] sm:$0xff] %v7109_v46  ;;  %v8974_v20 = vrot.slane %v7107_v58, 4  ;;  %v8975_v1 = vrot.slane %v7109_v46, 4 }
 0x25e   : > { %1913 = vrot.lane.b32.xlu0 %v6874_v18, %s5220_s15  ;;  %2069 = vrot.lane.b32.xlu1 %v2371_v5, %s5222_s17  ;;  %v2105_v5 = vrot.slane %v7047_v30, 4 }
 0x25f   : > { %v2652_v24 = vsel %vm901_vm1, %v2629_v33, %v8974_v20  ;;  %v1462_v6 = vsel %vm901_vm1, %v1439_v10, %v8975_v1  ;;  %v1543_v20 = vrot.slane %v6343_v42, 4  ;;  %v9119_v1 = vrot.slane %v6302_v13, 4 }
 0x260   : > { %v7123_v31 = vsel %vm2638_vm3, %v2606_v52, %v2652_v24  ;;  %v7126_v38 = vsel %vm1448_vm2, %v1416_v62, %v1462_v6  ;;  %v7128_v25 = vpop.permute.xlu0 %2263  ;;  %v7130_v17 = vpop.permute.xlu1 %2083 }
 0x261   : > { %9116 = vst [vmem:[#allocation24_spill] sm:$0xff] %v7128_v25  ;;  %9117 = vst [vmem:[#allocation25_spill] sm:$0xff] %v7130_v17  ;;  %v8979_v58 = vrot.slane %v7128_v25, 4  ;;  %v8978_v33 = vrot.slane %v7130_v17, 4  ;;  %v1550_v47 = vsel %vm901_vm1, %v9119_v1, %v1543_v20 }
 0x262   : > { %2093 = vrot.lane.b32.xlu0 %v2383_v39, %s5222_s17  ;;  %1905 = vrot.lane.b32.xlu1 %v6851_v2, %s5220_s15  ;;  %v7170_v13 = vsel %vm1544_vm8, %v1550_v47, %v6343_v42 }
 0x263   : > { %v2307_v10 = vsel %vm901_vm1, %v2285_v57, %v8979_v58  ;;  %v2128_v62 = vsel %vm901_vm1, %v2105_v5, %v8978_v33  ;;  %v7159_v57 = vld [vmem:[#allocation2 + $0x60] sm:$0xff]  ;;  %vm1555_vm12 = vcmp.ne.s16.totalorder %v7170_v13, 0  ;;  %v7204_v58 = vld [vmem:[#allocation2 + $0xc8] sm:$0xff] }
 0x264   : > { %v7146_v52 = vsel %vm1637_vm0, %v2262_v60, %v2307_v10  ;;  %v7150_v24 = vsel %vm2114_vm5, %v7047_v30, %v2128_v62  ;;  %v1770_v6 = vpop.permute.xlu0 %1769  ;;  %v1613_v39 = vpop.permute.xlu1 %1612  ;;  %9120 = vst [vmem:[#allocation27_spill] sm:$0xff] %v7159_v57  ;;  %v7161_v60 = vld [vmem:[#allocation2 + $0x94] sm:$0xff]  ;;  %v7175_v20 = vsel %vm1366_vm15, %v7159_v57, 0  ;;  %v7186_v10 = vld [vmem:[#allocation2 + $0x2c] sm:$0xff]  ;;  %v1563_v62 = vsel %vm1555_vm12, %v7159_v57, 0 }
 0x265   : > { %9118 = vst [vmem:[#allocation26_spill] sm:$0xff] %v7150_v24  ;;  %v7180_v1 = vsel %vm1366_vm15, %v7161_v60, 0  ;;  %v7199_v33 = vsel %vm1366_vm15, %v7186_v10, 0  ;;  %v7213_v25 = vsel %vm1366_vm15, %v7204_v58, 0  ;;  %v1567_v37 = vsel %vm1555_vm12, %v7161_v60, 0 }
 0x266   : > { %1897 = vrot.lane.b32.xlu0 %v6812_v36, %s5220_s15  ;;  %1889 = vrot.lane.b32.xlu1 %v6810_v61, %s5220_s15  ;;  %v1571_v53 = vsel %vm1555_vm12, %v7204_v58, 0  ;;  %v1789_v0 = vrot.slane %v1770_v6, 4  ;;  %v1632_v49 = vrot.slane %v1613_v39, 4  ;;  %vm3642_vm15 = vcmask 261120  }
 0x268   : > { %v7164_v30 = vpop.permute.xlu0 %1423  ;;  %v7166_v5 = vpop.permute.xlu1 %1234 }
 0x26a   : > { %1759 = vrot.lane.b32.xlu0 %v7175_v20, %s5219_s14  ;;  %1767 = vrot.lane.b32.xlu1 %v7180_v1, %s5219_s14 }
 0x26c   : > { %v7189_v42 = vpop.permute.xlu0 %2089  ;;  %v7191_v47 = vpop.permute.xlu1 %2425 }
 0x26e   : > { %1602 = vrot.lane.b32.xlu0 %v1563_v62, %s5220_s15  ;;  %1751 = vrot.lane.b32.xlu1 %v7199_v33, %s5219_s14 }
 0x270   : > { %v7206_v17 = vpop.permute.xlu0 %1903  ;;  %v7208_v56 = vpop.permute.xlu1 %2613 }
 0x271   : > { %v9014_v63 = vrot.slane %v7206_v17, 4 }
 0x272   : > { %1775 = vrot.lane.b32.xlu0 %v7213_v25, %s5219_s14  ;;  %1610 = vrot.lane.b32.xlu1 %v1567_v37, %s5220_s15 }
 0x274   : > { %v7221_v62 = vpop.permute.xlu0 %1911  ;;  %v7223_v40 = vpop.permute.xlu1 %2269 }
 0x276   : > { %1618 = vrot.lane.b32.xlu0 %v1571_v53, %s5220_s15 }
 0x278   : > { %v7229_v29 = vpop.permute.xlu0 %1885  ;;  %v7231_v19 = vpop.permute.xlu1 %1771 }
 0x279   : > { %9121 = vst [vmem:[#allocation28_spill] sm:$0xff] %v7231_v19  ;;  %v9011_v3 = vrot.slane %v7231_v19, 4 }
 0x27b   : > { %v1814_v37 = vsel %vm901_vm1, %v1789_v0, %v9011_v3 }
 0x27c   : > { %v1815_v4 = vsel %vm1448_vm2, %v1770_v6, %v1814_v37  ;;  %v7239_v24 = vpop.permute.xlu0 %1614  ;;  %v1902_v46 = vpop.permute.xlu1 %1901 }
 0x27d   : > { %v9017_v53 = vrot.slane %v7239_v24, 4  ;;  %v1925_v32 = vrot.slane %v1902_v46, 4  ;;  %v4812_v12 = vcombine.low %v7105_v16, %v1815_v4  ;;  %v4813_v22 = vcombine.high %v7105_v16, %v1815_v4 }
 0x27e   : > { %v9015_v4 = vrot.slane %v7221_v62, 4 }
 0x27f   : > { %v1658_v19 = vsel %vm901_vm1, %v1632_v49, %v9017_v53  ;;  %v1947_v0 = vsel %vm901_vm1, %v1925_v32, %v9014_v63  ;;  %3667 = vmatprep.subr.bf16.mxu1 %v4813_v22  ;;  %v9122_v49 = vcombine.high %v6764_v27, %v6958_v35 }
 0x280   : > { %v1659_v6 = vsel %vm1637_vm0, %v1613_v39, %v1658_v19  ;;  %v7252_v37 = vsel %vm1637_vm0, %v1902_v46, %v1947_v0  ;;  %v7254_v3 = vpop.permute.xlu0 %1893  ;;  %v1910_v57 = vpop.permute.xlu1 %1909  ;;  %3668 = vmatpush1.bf16.msra.mxu1 %v4812_v12  ;;  %v9123_v12 = vcombine.low %v6764_v27, %v6958_v35  ;;  %v1254_v35 = vrot.slane %v7166_v5, 4 }
 0x281   : > { %v1929_v16 = vrot.slane %v1910_v57, 4  ;;  %3669 = vmatprep.subr.bf16.mxu1 %v9122_v49  ;;  %v4799_v19 = vcombine.high %v7068_v34, %v1659_v6  ;;  %v4798_v49 = vcombine.low %v7068_v34, %v1659_v6 }
 0x283   : > { %v1954_v32 = vsel %vm901_vm1, %v1929_v16, %v9015_v4  ;;  %v9124_v16 = vrot.slane %v6294_v48, 4  ;;  %v9126_v48 = vcombine.high %v6728_v28, %v6887_v21 }
 0x284   : > { %v7265_v22 = vsel %vm1637_vm0, %v1910_v57, %v1954_v32  ;;  %v1161_v46 = vpop.permute.xlu0 %1160  ;;  %v7267_v39 = vpop.permute.xlu1 %2537  ;;  %3670 = vmatpush1.bf16.msra.mxu1 %v9123_v12  ;;  %v1443_v57 = vrot.slane %v7164_v30, 4  ;;  %v2445_v12 = vrot.slane %v7191_v47, 4 }
 0x285   : > { %v9016_v0 = vrot.slane %v7267_v39, 4  ;;  %3671 = vmatprep.subr.bf16.mxu1 %v4799_v19 }
 0x287   : > { %v2549_v63 = vsel %vm901_vm1, %v9124_v16, %v9016_v0 }
 0x288   : > { %v2550_v32 = vsel %vm9125_vm14, %v2549_v63, %v7267_v39  ;;  %v7282_v4 = vpop.permute.xlu0 %1236  ;;  %v7284_v27 = vpop.permute.xlu1 %1425  ;;  %3672 = vmatpush1.bf16.msra.mxu1 %v4798_v49 }
 0x289   : > { %vm2555_vm7 = vcmp.ne.s16.totalorder %v2550_v32, 0  ;;  %v9018_v34 = vrot.slane %v7282_v4, 4  ;;  %v9019_v6 = vrot.slane %v7284_v27, 4  ;;  %3673 = vmatprep.subr.bf16.mxu1 %v9126_v48  ;;  %v1917_v48 = vrot.slane %v7229_v29, 4 }
 0x28a   : > { %v2571_v19 = vsel %vm2555_vm7, %v6874_v18, 0  ;;  %v2567_v63 = vsel %vm2555_vm7, %v6851_v2, 0  ;;  %v1165_v18 = vrot.slane %v1161_v46, 4 }
 0x28b   : > { %v1280_v49 = vsel %vm901_vm1, %v1254_v35, %v9018_v34  ;;  %v1469_v16 = vsel %vm901_vm1, %v1443_v57, %v9019_v6  ;;  %2617 = vrot.lane.b32.xlu0 %v2571_v19, %s5223_s18  ;;  %2609 = vrot.lane.b32.xlu1 %v2567_v63, %s5223_s18  ;;  %v9127_v57 = vcombine.low %v6728_v28, %v6887_v21 }
 0x28c   : > { %v1281_v2 = vsel %vm1259_vm4, %v7166_v5, %v1280_v49  ;;  %v1470_v0 = vsel %vm1448_vm2, %v7164_v30, %v1469_v16  ;;  %v7310_v53 = vpop.permute.xlu0 %2427  ;;  %v7312_v35 = vpop.permute.xlu1 %1887  ;;  %v1559_v30 = vsel %vm1555_vm12, %v7186_v10, 0  ;;  %v2563_v5 = vsel %vm2555_vm7, %v6812_v36, 0 }
 0x28d   : > { %3674 = vmatpush1.bf16.msra.mxu1 %v9127_v57  ;;  %v9042_v19 = vrot.slane %v7310_v53, 4  ;;  %v9035_v63 = vrot.slane %v7312_v35, 4  ;;  %v4784_v34 = vcombine.low %v7126_v38, %v1470_v0  ;;  %v4785_v6 = vcombine.high %v7126_v38, %v1470_v0 }
 0x28e   : > { %v2633_v38 = vrot.slane %v7208_v56, 4  ;;  %v1921_v49 = vrot.slane %v7254_v3, 4  ;;  %v9128_v16 = vrot.slane %v6339_v41, 4  ;;  %v2289_v41 = vrot.slane %v7223_v40, 4 }
 0x28f   : > { %v2470_v28 = vsel %vm901_vm1, %v2445_v12, %v9042_v19  ;;  %v1933_v21 = vsel %vm901_vm1, %v1917_v48, %v9035_v63  ;;  %1594 = vrot.lane.b32.xlu1 %v1559_v30, %s5220_s15  ;;  %2601 = vrot.lane.b32.xlu0 %v2563_v5, %s5223_s18  ;;  %v9129_v30 = vcombine.high %v6791_v11, %v6991_v26  ;;  %vm9167_vm12 = vcmask 957440  }
 0x290   : > { %v7337_v13 = vsel %vm2114_vm5, %v7191_v47, %v2470_v28  ;;  %v7341_v36 = vsel %vm1637_vm0, %v7229_v29, %v1933_v21  ;;  %v7343_v0 = vpop.permute.xlu0 %2615  ;;  %v7345_v12 = vpop.permute.xlu1 %1895  ;;  %3675 = vmatprep.subr.bf16.mxu1 %v4785_v6  ;;  %v1172_v48 = vsel %vm901_vm1, %v9128_v16, %v1165_v18  ;;  %v2559_v29 = vsel %vm2555_vm7, %v6810_v61, 0 }
 0x291   : > { %v9023_v57 = vrot.slane %v7343_v0, 4  ;;  %v9036_v47 = vrot.slane %v7345_v12, 4  ;;  %3676 = vmatpush1.bf16.msra.mxu1 %v4784_v34  ;;  %v2109_v6 = vrot.slane %v7189_v42, 4  ;;  %v7371_v61 = vsel %vm9130_vm10, %v1172_v48, %v1161_v46 }
 0x292   : > { %3677 = vmatprep.subr.bf16.mxu1 %v9129_v30  ;;  %v4771_v21 = vcombine.high %v7082_v8, %v1281_v2  ;;  %v9131_v46 = vcombine.low %v6791_v11, %v6991_v26  ;;  %vm1177_vm13 = vcmp.ne.s16.totalorder %v7371_v61, 0  ;;  %v4770_v11 = vcombine.low %v7082_v8, %v1281_v2  ;;  %v2826_v61 = vld [vmem:[#allocation3 + $0x2a0] sm:$0xff] }
 0x293   : > { %v2659_v18 = vsel %vm901_vm1, %v2633_v38, %v9023_v57  ;;  %v1940_v34 = vsel %vm901_vm1, %v1921_v49, %v9036_v47  ;;  %1429 = vrot.lane.b32.xlu0 %v7213_v25, %s5219_s14  ;;  %2593 = vrot.lane.b32.xlu1 %v2559_v29, %s5223_s18  ;;  %v9132_v30 = vmov 0   ;;  %v9135_v2 = vrot.slane %v6746_v54, 4 }
 0x294   : > { %v2660_v7 = vsel %vm2638_vm3, %v7208_v56, %v2659_v18  ;;  %v7377_v32 = vsel %vm1637_vm0, %v7254_v3, %v1940_v34  ;;  %v7379_v5 = vpop.permute.xlu0 %2271  ;;  %v7381_v28 = vpop.permute.xlu1 %2091  ;;  %v9136_v18 = vrot.slane %v6924_v50, 4 }
 0x295   : > { %v9041_v25 = vrot.slane %v7379_v5, 4  ;;  %v9037_v38 = vrot.slane %v7381_v28, 4  ;;  %3678 = vmatpush1.bf16.msra.mxu1 %v9131_v46  ;;  %v4882_v56 = vcombine.low %v7123_v31, %v2660_v7  ;;  %v4883_v3 = vcombine.high %v7123_v31, %v2660_v7 }
 0x296   : > { %3679 = vmatprep.subr.bf16.mxu1 %v4771_v21 }
 0x297   : > { %v2314_v49 = vsel %vm901_vm1, %v2289_v41, %v9041_v25  ;;  %v2135_v16 = vsel %vm901_vm1, %v2109_v6, %v9037_v38  ;;  %1405 = vrot.lane.b32.xlu0 %v7199_v33, %s5219_s14  ;;  %1421 = vrot.lane.b32.xlu1 %v7180_v1, %s5219_s14  ;;  %v2532_v6 = vsel %vm2528_vm11, 65537, %v9132_v30  ;;  %v9133_v1 = vcombine.high %v6742_v43, %v6920_v45 }
 0x298   : > { %v7405_v26 = vsel %vm1637_vm0, %v7223_v40, %v2314_v49  ;;  %v7409_v31 = vsel %vm2114_vm5, %v7189_v42, %v2135_v16  ;;  %v7411_v48 = vpop.permute.xlu0 %1749  ;;  %v7413_v29 = vpop.permute.xlu1 %1757  ;;  %3792 = vmatprep.subr.bf16.mxu0 %v4883_v3  ;;  %v1189_v40 = vsel %vm1177_vm13, %v7161_v60, 0  ;;  %v9134_v42 = vcombine.high %v6787_v59, %v6987_v9  ;;  %v7454_v49 = vld [vmem:[%s6859_s22 + $0x8] ss:$12 sps:$4 sm:$0xff]  }
 0x299   : > { %v9025_v33 = vrot.slane %v7411_v48, 4  ;;  %v9031_v8 = vrot.slane %v7413_v29, 4  ;;  %3680 = vmatpush1.bf16.msra.mxu1 %v4770_v11  ;;  %3793 = vmatpush1.bf16.msra.mxu0 %v4882_v56  ;;  %v4869_v3 = vcombine.high %v7102_v15, %v7337_v13  ;;  %v4826_v38 = vcombine.low %v7252_v37, %v7265_v22 }
 0x29a   : > { %3681 = vmatprep.subr.bf16.mxu1 %v9133_v1  ;;  %3794 = vmatprep.subr.bf16.mxu0 %v9134_v42 }
 0x29b   : > { %v1795_v41 = vsel %vm901_vm1, %v9135_v2, %v9025_v33  ;;  %v1802_v34 = vsel %vm901_vm1, %v9136_v18, %v9031_v8  ;;  %1232 = vrot.lane.b32.xlu0 %v1189_v40, %s5221_s16  ;;  %2539 = vrot.lane.b32.xlu1 %v2532_v6, %s5217_s6  ;;  %v1181_v6 = vsel %vm1177_vm13, %v7186_v10, 0  ;;  %v9139_v40 = vrot.slane %v6719_v51, 4 }
 0x29c   : > { %v7441_v7 = vsel %vm1448_vm2, %v6746_v54, %v1795_v41  ;;  %v7445_v21 = vsel %vm1448_vm2, %v6924_v50, %v1802_v34  ;;  %v7447_v46 = vpop.permute.xlu0 %1592  ;;  %v7449_v56 = vpop.permute.xlu1 %1600  ;;  %v9137_v54 = vcombine.low %v6742_v43, %v6920_v45  ;;  %v9138_v50 = vcombine.low %v6787_v59, %v6987_v9  ;;  %v2842_v9 = vld [vmem:[#allocation3 + $0x310] sm:$0xff] }
 0x29d   : > { %v9022_v16 = vrot.slane %v7447_v46, 4  ;;  %v9027_v11 = vrot.slane %v7449_v56, 4  ;;  %v9140_v43 = vrot.slane %v6866_v23, 4  ;;  %v4868_v59 = vcombine.low %v7102_v15, %v7337_v13 }
 0x29e   : > { %3682 = vmatpush1.bf16.msra.mxu1 %v9137_v54  ;;  %3795 = vmatpush1.bf16.msra.mxu0 %v9138_v50  ;;  %v4862_v34 = vcombine.high %v2842_v9, %v6954_v44  ;;  %v4861_v50 = vcombine.low %v2842_v9, %v6954_v44  ;;  %v9143_v9 = vld [vmem:[#allocation27_spill] sm:$0xff] }
 0x29f   : > { %3683 = vmatprep.subr.bf16.mxu1 %v4869_v3  ;;  %v1639_v1 = vsel %vm901_vm1, %v9139_v40, %v9022_v16  ;;  %v1646_v45 = vsel %vm901_vm1, %v9140_v43, %v9027_v11  ;;  %1216 = vrot.lane.b32.xlu0 %v1181_v6, %s5221_s16  ;;  %v9142_v3 = vrot.slane %v6962_v14, 4  ;;  %v9148_v16 = vld [vmem:[#allocation16_spill] sm:$0xff] }
 0x2a0   : > { %1413 = vrot.lane.b32.xlu1 %v7175_v20, %s5219_s14  ;;  %v7484_v42 = vsel %vm1637_vm0, %v6719_v51, %v1639_v1  ;;  %v7488_v2 = vsel %vm1637_vm0, %v6866_v23, %v1646_v45  ;;  %v7490_v41 = vpop.permute.xlu0 %1403  ;;  %v7492_v18 = vpop.permute.xlu1 %1411  ;;  %v1193_v51 = vsel %vm1177_vm13, %v7204_v58, 0  ;;  %v9141_v23 = vrot.slane %v6768_v55, 4 }
 0x2a1   : > { %4889 = vmatmul.mubr.msk.bf16.vlgmr.msra.gmra.mxu0 %vm3642_vm15, %v7454_v49  ;;  %v9021_v15 = vrot.slane %v7490_v41, 4  ;;  %v9020_v20 = vrot.slane %v7492_v18, 4  ;;  %v4855_v45 = vcombine.high %v7146_v52, %v7405_v26  ;;  %v4848_v57 = vcombine.high %v2826_v61, %v9148_v16 }
 0x2a2   : > { %3684 = vmatpush2.bf16.msra.mxu1 %v4868_v59  ;;  %3822 = vmatprep.mubr.bf16.mxu0 %v9132_v30  ;;  %v5136_v59 = vld [vmem:[%s6859_s22 + $0x20] ss:$12 sps:$4 sm:$0xff]  }
 0x2a3   : > { %3685 = vmatprep.subr.bf16.mxu1 %v4862_v34  ;;  %v1450_v13 = vsel %vm901_vm1, %v9141_v23, %v9021_v15  ;;  %v1457_v54 = vsel %vm901_vm1, %v9142_v3, %v9020_v20 }
 0x2a4   : > { %1240 = vrot.lane.b32.xlu1 %v1193_v51, %s5221_s16  ;;  %v7517_v6 = vsel %vm1448_vm2, %v6768_v55, %v1450_v13  ;;  %v7521_v40 = vsel %vm1448_vm2, %v6962_v14, %v1457_v54  ;;  %v7523_v1 = vpop.permute.xlu0 %1765  ;;  %v7525_v43 = vpop.permute.xlu1 %1608  ;;  %v1185_v55 = vsel %vm1177_vm13, %v9143_v9, 0  ;;  %v9144_v14 = vld [vmem:[#allocation21_spill] sm:$0xff]  ;;  %v9146_v13 = vld [vmem:[#allocation18_spill] sm:$0xff] }
 0x2a5   : > { %v9029_v34 = vrot.slane %v7523_v1, 4  ;;  %v9024_v44 = vrot.slane %v7525_v43, 4  ;;  %v9145_v51 = vrot.slane %v9144_v14, 4  ;;  %v9147_v3 = vrot.slane %v9146_v13, 4 }
 0x2a6   : > { %3686 = vmatpush2.bf16.msra.mxu1 %v4861_v50  ;;  %v4854_v50 = vcombine.low %v7146_v52, %v7405_v26  ;;  %v9149_v26 = vld [vmem:[#allocation23_spill] sm:$0xff] }
 0x2a7   : > { %3687 = vmatprep.subr.bf16.mxu1 %v4855_v45  ;;  %v1809_v23 = vsel %vm901_vm1, %v9145_v51, %v9029_v34  ;;  %v1653_v54 = vsel %vm901_vm1, %v9147_v3, %v9024_v44 }
 0x2a8   : > { %1224 = vrot.lane.b32.xlu1 %v1185_v55, %s5221_s16  ;;  %v1810_v45 = vsel %vm1448_vm2, %v9144_v14, %v1809_v23  ;;  %v7552_v20 = vsel %vm1637_vm0, %v9146_v13, %v1653_v54  ;;  %v7554_v51 = vpop.permute.xlu0 %1419  ;;  %v7556_v15 = vpop.permute.xlu1 %1773  ;;  %v9150_v14 = vrot.slane %v9149_v26, 4  ;;  %v9151_v13 = vld [vmem:[#allocation28_spill] sm:$0xff]  ;;  %v4847_v54 = vcombine.low %v2826_v61, %v9148_v16 }
 0x2a9   : > { %4890 = vmatmul.mubr.msk.bf16.gmra.mxu0 %vm3642_vm15, %v5136_v59  ;;  %v9026_v55 = vrot.slane %v7554_v51, 4  ;;  %v9028_v52 = vrot.slane %v7556_v15, 4  ;;  %v9152_v3 = vrot.slane %v9151_v13, 4 }
 0x2aa   : > { %3688 = vmatpush2.bf16.msra.mxu1 %v4854_v50  ;;  %3832 = vmatprep.mubr.bf16.mxu0 %v9132_v30 }
 0x2ab   : > { %3689 = vmatprep.subr.bf16.mxu1 %v4848_v57  ;;  %v1464_v23 = vsel %vm901_vm1, %v9150_v14, %v9026_v55  ;;  %v1816_v59 = vsel %vm901_vm1, %v9152_v3, %v9028_v52  ;;  %v9153_v14 = vld [vmem:[#allocation26_spill] sm:$0xff] }
 0x2ac   : > { %v7576_v50 = vsel %vm1448_vm2, %v9149_v26, %v1464_v23  ;;  %v1817_v57 = vsel %vm1448_vm2, %v9151_v13, %v1816_v59  ;;  %v7580_v44 = vpop.permute.xlu0 %1616  ;;  %v7582_v33 = vpop.permute.xlu1 %1230  ;;  %v4841_v55 = vcombine.high %v9153_v14, %v7409_v31  ;;  %v7589_v26 = vld [vmem:[%s6859_s22 + $0x38] ss:$12 sps:$4 sm:$0xff]   ;;  %v9154_v23 = vrot.slane %v7239_v24, 4 }
 0x2ad   : > { %v9030_v11 = vrot.slane %v7580_v44, 4  ;;  %v9032_v3 = vrot.slane %v7582_v33, 4  ;;  %v4814_v16 = vcombine.low %v1810_v45, %v1817_v57  ;;  %v4815_v61 = vcombine.high %v1810_v45, %v1817_v57  ;;  %v9155_v59 = vld [vmem:[#allocation19_spill] sm:$0xff]  ;;  %v2810_v45 = vld [vmem:[#allocation3 + $0x230] sm:$0xff] }
 0x2ae   : > { %3690 = vmatpush2.bf16.msra.mxu1 %v4847_v54  ;;  %v9156_v52 = vrot.slane %v9155_v59, 4  ;;  %v4840_v54 = vcombine.low %v9153_v14, %v7409_v31 }
 0x2af   : > { %3691 = vmatprep.subr.bf16.mxu1 %v4841_v55  ;;  %v1660_v13 = vsel %vm901_vm1, %v9154_v23, %v9030_v11  ;;  %3893 = vmatprep.subr.bf16.mxu0 %v4815_v61  ;;  %v4808_v55 = vcombine.high %v7441_v7, %v7445_v21 }
 0x2b0   : > { %v1275_v34 = vsel %vm901_vm1, %v9156_v52, %v9032_v3  ;;  %v1661_v57 = vsel %vm1637_vm0, %v7239_v24, %v1660_v13  ;;  %v7611_v11 = vpop.permute.xlu0 %1222  ;;  %v7613_v8 = vpop.permute.xlu1 %1214  ;;  %3894 = vmatpush1.bf16.msra.mxu0 %v4814_v16  ;;  %v9157_v52 = vld [vmem:[#allocation17_spill] sm:$0xff]  ;;  %v4807_v24 = vcombine.low %v7441_v7, %v7445_v21  ;;  %v9160_v13 = vld [vmem:[#allocation6_spill] sm:$0xff] }
 0x2b1   : > { %v7609_v23 = vsel %vm1259_vm4, %v9155_v59, %v1275_v34  ;;  %v4834_v3 = vcombine.high %v2810_v45, %v9157_v52  ;;  %v9033_v31 = vrot.slane %v7611_v11, 4  ;;  %v9034_v14 = vrot.slane %v7613_v8, 4  ;;  %3895 = vmatprep.subr.bf16.mxu0 %v4808_v55  ;;  %4891 = vmatmul.mubr.msk.bf16.gmra.mxu0 %vm3642_vm15, %v7589_v26  ;;  %v9158_v34 = vld [vmem:[#allocation11_spill] sm:$0xff] }
 0x2b2   : > { %3692 = vmatpush2.bf16.msra.mxu1 %v4840_v54  ;;  %v9159_v61 = vrot.slane %v9158_v34, 4  ;;  %v9161_v59 = vrot.slane %v9160_v13, 4  ;;  %v4801_v7 = vcombine.high %v7552_v20, %v1661_v57  ;;  %3842 = vmatprep.mubr.bf16.mxu0 %v9132_v30 }
 0x2b3   : > { %3693 = vmatprep.subr.bf16.mxu1 %v4834_v3  ;;  %v4833_v3 = vcombine.low %v2810_v45, %v9157_v52 }
 0x2b4   : > { %v1268_v16 = vsel %vm901_vm1, %v9159_v61, %v9033_v31  ;;  %v1261_v54 = vsel %vm901_vm1, %v9161_v59, %v9034_v14  ;;  %v7643_v61 = vpop.permute.xlu0 %2421  ;;  %v2016_v31 = vpop.permute.xlu1 %2015  ;;  %3896 = vmatpush1.bf16.msra.mxu0 %v4807_v24  ;;  %v4827_v59 = vcombine.high %v7252_v37, %v7265_v22  ;;  %v9165_v24 = vld [vmem:[#allocation4_spill] sm:$0xff] }
 0x2b5   : > { %v7637_v21 = vsel %vm1259_vm4, %v9158_v34, %v1268_v16  ;;  %v7641_v55 = vsel %vm1259_vm4, %v9160_v13, %v1261_v54  ;;  %9162 = vst [vmem:[#allocation27_spill] sm:$0xff] %v7643_v61  ;;  %v9039_v45 = vrot.slane %v7643_v61, 4  ;;  %v2020_v52 = vrot.slane %v2016_v31, 4  ;;  %3897 = vmatprep.subr.bf16.mxu0 %v4801_v7  ;;  %v7650_v16 = vld [vmem:[%s6859_s22 + $0x50] ss:$12 sps:$4 sm:$0xff]   ;;  %v9163_v13 = vld [vmem:[#allocation20_spill] sm:$0xff] }
 0x2b6   : > { %3694 = vmatpush2.bf16.msra.mxu1 %v4833_v3  ;;  %v4800_v34 = vcombine.low %v7552_v20, %v1661_v57  ;;  %v9164_v54 = vrot.slane %v9163_v13, 4  ;;  %v9166_v63 = vrot.slane %v9165_v24, 4  ;;  %v4794_v3 = vcombine.high %v7484_v42, %v7488_v2 }
 0x2b7   : > { %3695 = vmatprep.subr.bf16.mxu1 %v4827_v59 }
 0x2b8   : > { %v2465_v14 = vsel %vm901_vm1, %v9164_v54, %v9039_v45  ;;  %v2027_v47 = vsel %vm901_vm1, %v9166_v63, %v2020_v52  ;;  %v7671_v7 = vpop.permute.xlu0 %2405  ;;  %v7673_v59 = vpop.permute.xlu1 %1427  ;;  %3898 = vmatpush1.bf16.msra.mxu0 %v4800_v34  ;;  %v4820_v63 = vcombine.high %v7341_v36, %v7377_v32 }
 0x2b9   : > { %v7666_v20 = vsel %vm2114_vm5, %v9163_v13, %v2465_v14  ;;  %v7669_v57 = vsel %vm9167_vm12, %v2027_v47, %v2016_v31  ;;  %9168 = vst [vmem:[#allocation21_spill] sm:$0xff] %v7671_v7  ;;  %v9038_v37 = vrot.slane %v7671_v7, 4  ;;  %v9040_v22 = vrot.slane %v7673_v59, 4  ;;  %3899 = vmatprep.subr.bf16.mxu0 %v4794_v3  ;;  %4892 = vmatmul.mubr.msk.bf16.gmra.mxu0 %vm3642_vm15, %v7650_v16 }
 0x2ba   : > { %vm2032_vm14 = vcmp.ne.s16.totalorder %v7669_v57, 0  ;;  %3696 = vmatpush2.bf16.msra.mxu1 %v4826_v38  ;;  %v4793_v14 = vcombine.low %v7484_v42, %v7488_v2  ;;  %v9169_v38 = vld [vmem:[#allocation7_spill] sm:$0xff]  ;;  %v9171_v13 = vrot.slane %v7284_v27, 4  ;;  %v4819_v42 = vcombine.low %v7341_v36, %v7377_v32  ;;  %3852 = vmatprep.mubr.bf16.mxu0 %v9132_v30 }
 0x2bb   : > { %v7683_v47 = vsel %vm2032_vm14, %v7204_v58, 0  ;;  %v7688_v31 = vsel %vm2032_vm14, %v7161_v60, 0  ;;  %3697 = vmatprep.subr.bf16.mxu1 %v4820_v63  ;;  %v9170_v52 = vrot.slane %v9169_v38, 4 }
 0x2bc   : > { %v1471_v54 = vsel %vm901_vm1, %v9171_v13, %v9040_v22  ;;  %2431 = vrot.lane.b32.xlu1 %v7683_v47, %s5222_s17  ;;  %2423 = vrot.lane.b32.xlu0 %v7688_v31, %s5222_s17  ;;  %v7716_v3 = vpop.permute.xlu0 %1238  ;;  %v7718_v63 = vpop.permute.xlu1 %2413 }
 0x2bd   : > { %v2451_v34 = vsel %vm901_vm1, %v9170_v52, %v9038_v37  ;;  %v1472_v24 = vsel %vm1448_vm2, %v7284_v27, %v1471_v54  ;;  %9172 = vst [vmem:[#allocation18_spill] sm:$0xff] %v7718_v63  ;;  %3900 = vmatpush1.bf16.msra.mxu0 %v4793_v14  ;;  %v7722_v52 = vld [vmem:[%s6859_s22] ss:$12 sps:$4 sm:$0xff]   ;;  %v9043_v13 = vrot.slane %v7716_v3, 4  ;;  %v9044_v36 = vrot.slane %v7718_v63, 4 }
 0x2be   : > { %v7712_v2 = vsel %vm2114_vm5, %v9169_v38, %v2451_v34  ;;  %3698 = vmatpush2.bf16.msra.mxu1 %v4819_v42  ;;  %v4786_v32 = vcombine.low %v7576_v50, %v1472_v24  ;;  %v4787_v38 = vcombine.high %v7576_v50, %v1472_v24  ;;  %v7729_v34 = vld [vmem:[%s6859_s22 + $0x1c] ss:$12 sps:$4 sm:$0xff]   ;;  %v2376_v27 = vsel %vm2032_vm14, %v9143_v9, 0  ;;  %v9175_v50 = vld [vmem:[#allocation12_spill] sm:$0xff] }
 0x2bf   : > { %v7737_v14 = vsel %vm2032_vm14, %v7186_v10, 0  ;;  %v7740_v54 = vld [vmem:[%s6859_s22 + $0x68] ss:$12 sps:$4 sm:$0xff]   ;;  %v9174_v42 = vrot.slane %v7282_v4, 4  ;;  %v9176_v24 = vrot.slane %v9175_v50, 4 }
 0x2c0   : > { %9173 = vst [vmem:[#allocation16_spill] sm:$0xff] %v7740_v54  ;;  %2415 = vrot.lane.b32.xlu1 %v2376_v27, %s5222_s17  ;;  %2407 = vrot.lane.b32.xlu0 %v7737_v14, %s5222_s17  ;;  %v2197_v19 = vpop.permute.xlu0 %2196 }
 0x2c1   : > { %v1282_v37 = vsel %vm901_vm1, %v9174_v42, %v9043_v13  ;;  %v2458_v45 = vsel %vm901_vm1, %v9176_v24, %v9044_v36  ;;  %v7761_v42 = vpop.permute.xlu1 %2265  ;;  %3901 = vmatprep.subr.bf16.mxu0 %v4787_v38  ;;  %v4780_v13 = vcombine.high %v7517_v6, %v7521_v40  ;;  %3700 = vmatmul.mubr.bf16.vlgmr.msra.gmra.mxu1 %v7722_v52  ;;  %v2201_v27 = vrot.slane %v2197_v19, 4  ;;  %v9180_v38 = vld [vmem:[#allocation24_spill] sm:$0xff] }
 0x2c2   : > { %v1283_v22 = vsel %vm1259_vm4, %v7282_v4, %v1282_v37  ;;  %v7759_v25 = vsel %vm2114_vm5, %v9175_v50, %v2458_v45  ;;  %9177 = vst [vmem:[#allocation23_spill] sm:$0xff] %v7761_v42  ;;  %v9049_v24 = vrot.slane %v7761_v42, 4  ;;  %3902 = vmatpush1.bf16.msra.mxu0 %v4786_v32  ;;  %3709 = vmatprep.mubr.bf16.mxu1 %v7729_v34  ;;  %v9178_v4 = vld [vmem:[#allocation5_spill] sm:$0xff]  ;;  %v9181_v50 = vrot.slane %v9180_v38, 4  ;;  %v7792_v42 = vld [vmem:[%s6859_s22 + $0x18] ss:$12 sps:$4 sm:$0xff]  }
 0x2c3   : > { %3903 = vmatprep.subr.bf16.mxu0 %v4780_v13  ;;  %4893 = vmatmul.mubr.msk.bf16.gmra.mxu0 %vm3642_vm15, %v7740_v54  ;;  %v9179_v45 = vrot.slane %v9178_v4, 4  ;;  %v4779_v32 = vcombine.low %v7517_v6, %v7521_v40  ;;  %v4863_v57 = vcombine.low %v7712_v2, %v7759_v25 }
 0x2c4   : > { %v2309_v36 = vsel %vm901_vm1, %v9181_v50, %v9049_v24  ;;  %3862 = vmatprep.mubr.bf16.mxu0 %v9132_v30  ;;  %v7786_v4 = vpop.permute.xlu0 %2257  ;;  %v7797_v50 = vld [vmem:[%s6859_s22 + $0x34] ss:$12 sps:$4 sm:$0xff]  }
 0x2c5   : > { %v2207_v37 = vsel %vm901_vm1, %v9179_v45, %v2201_v27  ;;  %v7784_v63 = vsel %vm1637_vm0, %v9180_v38, %v2309_v36  ;;  %9182 = vst [vmem:[#allocation28_spill] sm:$0xff] %v7786_v4  ;;  %v7788_v27 = vpop.permute.xlu1 %2249  ;;  %v4773_v45 = vcombine.high %v7609_v23, %v1283_v22  ;;  %v9057_v6 = vrot.slane %v7786_v4, 4  ;;  %v9183_v38 = vld [vmem:[#allocation14_spill] sm:$0xff] }
 0x2c6   : > { %v2208_v13 = vsel %vm1544_vm8, %v2207_v37, %v2197_v19  ;;  %v9059_v40 = vrot.slane %v7788_v27, 4  ;;  %3904 = vmatpush1.bf16.msra.mxu0 %v4779_v32  ;;  %v7804_v37 = vld [vmem:[%s6859_s22 + $0x80] ss:$12 sps:$4 sm:$0xff]   ;;  %v9184_v24 = vrot.slane %v9183_v38, 4  ;;  %vm9209_vm8 = vcmask 125952  }
 0x2c7   : > { %vm2212_vm7 = vcmp.ne.s16.totalorder %v2208_v13, 0  ;;  %3905 = vmatprep.subr.bf16.mxu0 %v4773_v45  ;;  %v9185_v32 = vld [vmem:[#allocation9_spill] sm:$0xff]  ;;  %vm9210_vm9 = vmmov %vm9209_vm8 }
 0x2c8   : > { %v2228_v19 = vsel %vm2212_vm7, %v7204_v58, 0  ;;  %v2224_v36 = vsel %vm2212_vm7, %v7161_v60, 0  ;;  %v2302_v7 = vsel %vm901_vm1, %v9184_v24, %v9057_v6  ;;  %v9186_v54 = vrot.slane %v9185_v32, 4  ;;  %v7827_v24 = vpop.permute.xlu0 %2077  ;;  %vm9213_vm10 = vmmov %vm9209_vm8 }
 0x2c9   : > { %2275 = vrot.lane.b32.xlu1 %v2228_v19, %s5220_s15  ;;  %2267 = vrot.lane.b32.xlu0 %v2224_v36, %s5220_s15  ;;  %v4772_v60 = vcombine.low %v7609_v23, %v1283_v22  ;;  %v7821_v45 = vsel %vm1637_vm0, %v9183_v38, %v2302_v7  ;;  %9187 = vst [vmem:[#allocation26_spill] sm:$0xff] %v7827_v24  ;;  %v7829_v6 = vpop.permute.xlu1 %2429  ;;  %v9058_v19 = vrot.slane %v7827_v24, 4  ;;  %v2216_v7 = vsel %vm2212_vm7, %v7186_v10, 0  ;;  %v9188_v22 = vld [vmem:[#allocation15_spill] sm:$0xff]  ;;  %vm9214_vm11 = vmmov %vm9209_vm8 }
 0x2ca   : > { %v2295_v61 = vsel %vm901_vm1, %v9186_v54, %v9059_v40  ;;  %v4766_v54 = vcombine.high %v7641_v55, %v7637_v21  ;;  %3710 = vmatmul.mubr.bf16.gmra.mxu1 %v7792_v42  ;;  %v9064_v23 = vrot.slane %v7829_v6, 4  ;;  %v9189_v36 = vrot.slane %v9188_v22, 4  ;;  %vm9217_vm13 = vmmov %vm9209_vm8 }
 0x2cb   : > { %v7825_v4 = vsel %vm1637_vm0, %v9185_v32, %v2295_v61  ;;  %3906 = vmatpush1.bf16.msra.mxu0 %v4772_v60  ;;  %3719 = vmatprep.mubr.bf16.mxu1 %v7797_v50  ;;  %v2220_v61 = vsel %vm2212_vm7, %v9143_v9, 0  ;;  %v9190_v32 = vrot.slane %v7310_v53, 4  ;;  %v4765_v10 = vcombine.low %v7641_v55, %v7637_v21  ;;  %vm9218_vm12 = vmmov %vm9209_vm8 }
 0x2cc   : > { %3907 = vmatprep.subr.bf16.mxu0 %v4766_v54  ;;  %4894 = vmatmul.mubr.msk.bf16.gmra.mxu0 %vm3642_vm15, %v7804_v37  ;;  %v2123_v38 = vsel %vm901_vm1, %v9189_v36, %v9058_v19  ;;  %v7863_v54 = vpop.permute.xlu0 %2273  ;;  %v9192_v19 = vld [vmem:[#allocation25_spill] sm:$0xff]  ;;  %vm9227_vm7 = vmmov %vm9209_vm8 }
 0x2cd   : > { %v2472_v9 = vsel %vm901_vm1, %v9190_v32, %v9064_v23  ;;  %2259 = vrot.lane.b32.xlu1 %v2220_v61, %s5220_s15  ;;  %2251 = vrot.lane.b32.xlu0 %v2216_v7, %s5220_s15  ;;  %v7859_v13 = vsel %vm2114_vm5, %v9188_v22, %v2123_v38  ;;  %v7865_v36 = vpop.permute.xlu1 %2085  ;;  %v7869_v32 = vld [vmem:[%s6859_s22 + $0x30] ss:$12 sps:$4 sm:$0xff]   ;;  %v9060_v61 = vrot.slane %v7863_v54, 4  ;;  %v7876_v22 = vld [vmem:[%s6859_s22 + $0x4c] ss:$12 sps:$4 sm:$0xff]   ;;  %v9191_v38 = vrot.slane %v7379_v5, 4 }
 0x2ce   : > { %v2473_v60 = vsel %vm2114_vm5, %v7310_v53, %v2472_v9  ;;  %3872 = vmatprep.mubr.bf16.mxu0 %v9132_v30  ;;  %v9061_v7 = vrot.slane %v7865_v36, 4  ;;  %v7879_v53 = vld [vmem:[%s6859_s22 + $0x98] ss:$12 sps:$4 sm:$0xff]   ;;  %v9193_v40 = vrot.slane %v9192_v19, 4  ;;  %v9202_v23 = vrot.slane %v7206_v17, 4 }
 0x2cf   : > { %3908 = vmatpush1.bf16.msra.mxu0 %v4765_v10  ;;  %v4870_v21 = vcombine.low %v7666_v20, %v2473_v60  ;;  %v4871_v55 = vcombine.high %v7666_v20, %v2473_v60  ;;  %v2316_v9 = vsel %vm901_vm1, %v9191_v38, %v9060_v61 }
 0x2d0   : > { %v2130_v10 = vsel %vm901_vm1, %v9193_v40, %v9061_v7  ;;  %v2317_v20 = vsel %vm1637_vm0, %v7379_v5, %v2316_v9  ;;  %v7901_v38 = vpop.permute.xlu0 %1913  ;;  %v4864_v40 = vcombine.high %v7712_v2, %v7759_v25  ;;  %v7910_v7 = vld [vmem:[#allocation2 + $0x60] sm:$0xff] }
 0x2d1   : > { %2095 = vrot.lane.b32.xlu1 %v7683_v47, %s5222_s17  ;;  %2087 = vrot.lane.b32.xlu0 %v7688_v31, %s5222_s17  ;;  %v7899_v60 = vsel %vm2114_vm5, %v9192_v19, %v2130_v10  ;;  %9194 = vst [vmem:[#allocation19_spill] sm:$0xff] %v7901_v38  ;;  %v7903_v61 = vpop.permute.xlu1 %2069  ;;  %v9062_v47 = vrot.slane %v7901_v38, 4  ;;  %v2040_v5 = vsel %vm2032_vm14, %v7910_v7, 0  ;;  %v9196_v19 = vrot.slane %v7221_v62, 4  ;;  %vm9220_vm14 = vmmov %vm9209_vm8 }
 0x2d2   : > { %9195 = vst [vmem:[#allocation17_spill] sm:$0xff] %v7903_v61  ;;  %3909 = vmatprep.subr.bf16.mxu0 %v4871_v55  ;;  %3720 = vmatmul.mubr.bf16.gmra.mxu1 %v7869_v32  ;;  %v9063_v31 = vrot.slane %v7903_v61, 4 }
 0x2d3   : > { %3910 = vmatpush2.bf16.msra.mxu0 %v4870_v21  ;;  %3729 = vmatprep.mubr.bf16.mxu1 %v7876_v22  ;;  %v1956_v55 = vsel %vm901_vm1, %v9196_v19, %v9062_v47  ;;  %v9197_v21 = vld [vmem:[#allocation10_spill] sm:$0xff] }
 0x2d4   : > { %3911 = vmatprep.subr.bf16.mxu0 %v4864_v40  ;;  %4895 = vmatmul.mubr.msk.bf16.gmra.mxu0 %vm3642_vm15, %v7879_v53  ;;  %v9198_v9 = vrot.slane %v9197_v21, 4  ;;  %v7935_v40 = vsel %vm1637_vm0, %v7221_v62, %v1956_v55  ;;  %v7941_v47 = vpop.permute.xlu0 %2093  ;;  %v7953_v62 = vld [vmem:[%s6859_s22 + $0x64] ss:$12 sps:$4 sm:$0xff]   ;;  %v7955_v55 = vld [vmem:[#allocation2 + $0x94] sm:$0xff] }
 0x2d5   : > { %2079 = vrot.lane.b32.xlu1 %v2040_v5, %s5222_s17  ;;  %2071 = vrot.lane.b32.xlu0 %v7737_v14, %s5222_s17  ;;  %v4857_v5 = vcombine.high %v7784_v63, %v2317_v20  ;;  %v7948_v14 = vld [vmem:[%s6859_s22 + $0x48] ss:$12 sps:$4 sm:$0xff]   ;;  %v9067_v25 = vrot.slane %v7941_v47, 4 }
 0x2d6   : > { %v2116_v10 = vsel %vm901_vm1, %v9198_v9, %v9063_v31  ;;  %v7943_v9 = vpop.permute.xlu1 %1905  ;;  %3882 = vmatprep.mubr.bf16.mxu0 %v9132_v30 }
 0x2d7   : > { %v7939_v19 = vsel %vm2114_vm5, %v9197_v21, %v2116_v10  ;;  %9199 = vst [vmem:[#allocation11_spill] sm:$0xff] %v7943_v9  ;;  %v9071_v2 = vrot.slane %v7943_v9, 4  ;;  %3912 = vmatpush2.bf16.msra.mxu0 %v4863_v57  ;;  %v7958_v21 = vld [vmem:[%s6859_s22 + $0xb0] ss:$12 sps:$4 sm:$0xff]   ;;  %v9201_v10 = vrot.slane %v7381_v28, 4  ;;  %v4856_v57 = vcombine.low %v7784_v63, %v2317_v20 }
 0x2d8   : > { %3913 = vmatprep.subr.bf16.mxu0 %v4857_v5  ;;  %9200 = vst [vmem:[#allocation6_spill] sm:$0xff] %v7958_v21 }
 0x2d9   : > { %v2137_v31 = vsel %vm901_vm1, %v9201_v10, %v9067_v25  ;;  %v1949_v38 = vsel %vm901_vm1, %v9202_v23, %v9071_v2  ;;  %1915 = vrot.lane.b32.xlu1 %v7204_v58, %s5220_s15  ;;  %1907 = vrot.lane.b32.xlu0 %v7955_v55, %s5220_s15  ;;  %v7981_v25 = vpop.permute.xlu0 %1897  ;;  %v4850_v23 = vcombine.high %v7825_v4, %v7821_v45 }
 0x2da   : > { %v2138_v5 = vsel %vm2114_vm5, %v7381_v28, %v2137_v31  ;;  %v7979_v10 = vsel %vm1637_vm0, %v7206_v17, %v1949_v38  ;;  %9203 = vst [vmem:[#allocation20_spill] sm:$0xff] %v7981_v25  ;;  %v7983_v9 = vpop.permute.xlu1 %1889  ;;  %3730 = vmatmul.mubr.bf16.gmra.mxu1 %v7948_v14  ;;  %v9070_v58 = vrot.slane %v7981_v25, 4  ;;  %v7991_v17 = vld [vmem:[#allocation2 + $0x2c] sm:$0xff]  ;;  %v9205_v28 = vrot.slane %v7345_v12, 4 }
 0x2db   : > { %9204 = vst [vmem:[#allocation4_spill] sm:$0xff] %v7983_v9  ;;  %v9072_v63 = vrot.slane %v7983_v9, 4  ;;  %3914 = vmatpush2.bf16.msra.mxu0 %v4856_v57  ;;  %3739 = vmatprep.mubr.bf16.mxu1 %v7953_v62  ;;  %v9206_v38 = vrot.slane %v7312_v35, 4  ;;  %v4849_v57 = vcombine.low %v7825_v4, %v7821_v45  ;;  %v8025_v25 = vld [vmem:[%s6859_s22 + $0x60] ss:$12 sps:$4 sm:$0xff]  }
 0x2dc   : > { %3915 = vmatprep.subr.bf16.mxu0 %v4850_v23  ;;  %4896 = vmatmul.mubr.msk.bf16.gmra.mxu0 %vm3642_vm15, %v7958_v21  ;;  %v1942_v20 = vsel %vm901_vm1, %v9205_v28, %v9070_v58  ;;  %v8028_v45 = vld [vmem:[%s6859_s22 + $0x7c] ss:$12 sps:$4 sm:$0xff]   ;;  %v9208_v21 = vrot.slane %v7523_v1, 4 }
 0x2dd   : > { %v1935_v31 = vsel %vm901_vm1, %v9206_v38, %v9072_v63  ;;  %1899 = vrot.lane.b32.xlu1 %v7910_v7, %s5220_s15  ;;  %1891 = vrot.lane.b32.xlu0 %v7991_v17, %s5220_s15  ;;  %v8013_v23 = vsel %vm1637_vm0, %v7345_v12, %v1942_v20  ;;  %v1760_v58 = vpop.permute.xlu0 %1759  ;;  %v4843_v38 = vcombine.high %v7899_v60, %v2138_v5  ;;  %v8021_v63 = vld [vmem:[%s6859_s22 + $0x4] ss:$12 sps:$4 sm:$0xff]  }
 0x2de   : > { %v8017_v28 = vsel %vm1637_vm0, %v7312_v35, %v1935_v31  ;;  %v1768_v2 = vpop.permute.xlu1 %1767  ;;  %3925 = vmatprep.mubr.bf16.mxu0 %v8021_v63  ;;  %v1784_v9 = vrot.slane %v1760_v58, 4  ;;  %v4842_v12 = vcombine.low %v7899_v60, %v2138_v5  ;;  %v9207_v35 = vrot.slane %v7413_v29, 4 }
 0x2df   : > { %v1788_v4 = vrot.slane %v1768_v2, 4  ;;  %3916 = vmatpush2.bf16.msra.mxu0 %v4849_v57 }
 0x2e0   : > { %3917 = vmatprep.subr.bf16.mxu0 %v4843_v38  ;;  %v1804_v20 = vsel %vm901_vm1, %v9207_v35, %v1784_v9  ;;  %v1806_v31 = vsel %vm1448_vm2, %v1760_v58, %v1784_v9  ;;  %v4836_v9 = vcombine.high %v7939_v19, %v7859_v13  ;;  %v2718_v58 = vld [vmem:[%s6859_s22 + $0x78] sm:$0xff]  ;;  %v9212_v35 = vrot.slane %v7411_v48, 4 }
 0x2e1   : > { %v1811_v24 = vsel %vm901_vm1, %v9208_v21, %v1788_v4  ;;  %v1813_v61 = vsel %vm1448_vm2, %v1768_v2, %v1788_v4  ;;  %v8041_v57 = vsel %vm1448_vm2, %v7413_v29, %v1804_v20  ;;  %1844 = vst.msk [vmem:[#allocation3 + $0x184] sm:$0xf] %vm9209_vm8, %v1806_v31  ;;  %v1603_v5 = vpop.permute.xlu0 %1602  ;;  %v2720_v29 = vld [vmem:[%s6859_s22 + $0x84] sm:$0xff]  ;;  %v4835_v4 = vcombine.low %v7939_v19, %v7859_v13  ;;  %vm9231_vm8 = vmmov %vm9227_vm7 }
 0x2e2   : > { %v1812_v60 = vsel %vm1448_vm2, %v7523_v1, %v1811_v24  ;;  %1848 = vst.msk [vmem:[#allocation3 + $0x1a0] sm:$0xf] %vm9210_vm9, %v1813_v61  ;;  %v1752_v38 = vpop.permute.xlu1 %1751  ;;  %3740 = vmatmul.mubr.bf16.gmra.mxu1 %v8025_v25  ;;  %v1627_v21 = vrot.slane %v1603_v5, 4  ;;  %v9211_v1 = vrot.slane %v7449_v56, 4  ;;  %vm9234_vm9 = vmmov %vm9227_vm7 }
 0x2e3   : > { %v1780_v2 = vrot.slane %v1752_v38, 4  ;;  %3918 = vmatpush2.bf16.msra.mxu0 %v4842_v12  ;;  %3749 = vmatprep.mubr.bf16.mxu1 %v8028_v45 }
 0x2e4   : > { %3919 = vmatprep.subr.bf16.mxu0 %v4836_v9  ;;  %v1648_v24 = vsel %vm901_vm1, %v9211_v1, %v1627_v21  ;;  %v1650_v61 = vsel %vm1637_vm0, %v1603_v5, %v1627_v21  ;;  %v4829_v5 = vcombine.high %v7979_v10, %v7935_v40  ;;  %v8073_v21 = vcombine.low %v2718_v58, %v2720_v29 }
 0x2e5   : > { %v1797_v20 = vsel %vm901_vm1, %v9212_v35, %v1780_v2  ;;  %v1799_v12 = vsel %vm1448_vm2, %v1752_v38, %v1780_v2  ;;  %v8065_v31 = vsel %vm1637_vm0, %v7449_v56, %v1648_v24  ;;  %1688 = vst.msk [vmem:[#allocation3 + $0x114] sm:$0xf] %vm9213_vm10, %v1650_v61  ;;  %v1776_v19 = vpop.permute.xlu0 %1775  ;;  %v8076_v2 = vld [vmem:[%s6859_s22 + $0x94] ss:$12 sps:$4 sm:$0xff]   ;;  %v4828_v56 = vcombine.low %v7979_v10, %v7935_v40  ;;  %vm9235_vm10 = vmmov %vm9227_vm7 }
 0x2e6   : > { %v1798_v13 = vsel %vm1448_vm2, %v7411_v48, %v1797_v20  ;;  %1840 = vst.msk [vmem:[#allocation3 + $0x168] sm:$0xf] %vm9214_vm11, %v1799_v12  ;;  %v1611_v9 = vpop.permute.xlu1 %1610  ;;  %v1792_v1 = vrot.slane %v1776_v19, 4  ;;  %v9215_v48 = vrot.slane %v7556_v15, 4  ;;  %v9216_v58 = vrot.slane %v7525_v43, 4  ;;  %vm9238_vm11 = vmmov %vm9227_vm7 }
 0x2e7   : > { %v1631_v38 = vrot.slane %v1611_v9, 4  ;;  %3920 = vmatpush2.bf16.msra.mxu0 %v4835_v4  ;;  %v4822_v20 = vcombine.high %v8017_v28, %v8013_v23 }
 0x2e8   : > { %3921 = vmatprep.subr.bf16.mxu0 %v4829_v5  ;;  %v1818_v24 = vsel %vm901_vm1, %v9215_v48, %v1792_v1  ;;  %v1820_v61 = vsel %vm1448_vm2, %v1776_v19, %v1792_v1  ;;  %v2722_v19 = vld [vmem:[%s6859_s22 + $0x90] sm:$0xff]  ;;  %v4821_v1 = vcombine.low %v8017_v28, %v8013_v23  ;;  %v8121_v23 = vcombine.high %v1798_v13, %v8041_v57 }
 0x2e9   : > { %v1655_v29 = vsel %vm901_vm1, %v9216_v58, %v1631_v38  ;;  %v1657_v4 = vsel %vm1637_vm0, %v1611_v9, %v1631_v38  ;;  %v1819_v35 = vsel %vm1448_vm2, %v7556_v15, %v1818_v24  ;;  %1852 = vst.msk [vmem:[#allocation3 + $0x1bc] sm:$0xf] %vm9217_vm13, %v1820_v61  ;;  %v1619_v10 = vpop.permute.xlu0 %1618  ;;  %v2724_v9 = vld [vmem:[%s6859_s22 + $0x9c] sm:$0xff]  ;;  %v9219_v15 = vrot.slane %v7580_v44, 4  ;;  %v8114_v24 = vld [vmem:[%s6859_s22 + $0xac] ss:$12 sps:$4 sm:$0xff]  }
 0x2ea   : > { %v1656_v40 = vsel %vm1637_vm0, %v7525_v43, %v1655_v29  ;;  %1692 = vst.msk [vmem:[#allocation3 + $0x130] sm:$0xf] %vm9218_vm12, %v1657_v4  ;;  %3750 = vmatmul.mubr.bf16.gmra.mxu1 %v8073_v21  ;;  %v1635_v12 = vrot.slane %v1619_v10, 4  ;;  %v8111_v48 = vcombine.low %v2722_v19, %v2724_v9  ;;  %v8117_v61 = vcombine.low %v1812_v60, %v1819_v35  ;;  %v2728_v28 = vld [vmem:[%s6859_s22 + $0xb4] sm:$0xff] }
 0x2eb   : > { %3922 = vmatpush2.bf16.msra.mxu0 %v4828_v56  ;;  %3759 = vmatprep.mubr.bf16.mxu1 %v8076_v2  ;;  %v8109_v56 = vcombine.high %v1812_v60, %v1819_v35  ;;  %v8131_v60 = vcombine.low %v1798_v13, %v8041_v57  ;;  %v9221_v35 = vrot.slane %v7343_v0, 4  ;;  %vm9239_vm13 = vcmask 965632  }
 0x2ec   : > { %3923 = vmatprep.subr.bf16.mxu0 %v4822_v20  ;;  %v1662_v43 = vsel %vm901_vm1, %v9219_v15, %v1635_v12  ;;  %v1664_v5 = vsel %vm1637_vm0, %v1619_v10, %v1635_v12 }
 0x2ed   : > { %v1663_v38 = vsel %vm1637_vm0, %v7580_v44, %v1662_v43  ;;  %1696 = vst.msk [vmem:[#allocation3 + $0x14c] sm:$0xf] %vm9220_vm14, %v1664_v5  ;;  %v2726_v44 = vld [vmem:[%s6859_s22 + $0xa8] sm:$0xff]  ;;  %vm9242_vm14 = vmmov %vm9227_vm7 }
 0x2ee   : > { %v8133_v58 = vcombine.high %v1656_v40, %v1663_v38  ;;  %v8139_v29 = vcombine.low %v1656_v40, %v1663_v38  ;;  %v9222_v40 = vld [vmem:[#allocation22_spill] sm:$0xff]  ;;  %v9224_v38 = vld [vmem:[#allocation13_spill] sm:$0xff] }
 0x2ef   : > { %3924 = vmatpush2.bf16.msra.mxu0 %v4821_v1  ;;  %v9223_v10 = vrot.slane %v9222_v40, 4 }
 0x2f0   : > { %4119 = vmatprep.subr.bf16.mxu0 %v8109_v56 }
 0x2f2   : > { %3926 = vmatmul.mubr.bf16.vlgmr.msra.gmra.mxu0 %v7722_v52  ;;  %3760 = vmatmul.mubr.bf16.gmra.mxu1 %v8111_v48  ;;  %v8135_v52 = vcombine.low %v2726_v44, %v2728_v28 }
 0x2f3   : > { %4120 = vmatpush1.bf16.msra.mxu0 %v8117_v61  ;;  %3769 = vmatprep.mubr.bf16.mxu1 %v8114_v24 }
 0x2f4   : > { %4121 = vmatprep.subr.bf16.mxu0 %v8121_v23  ;;  %3935 = vmatprep.mubr.bf16.mxu0 %v7729_v34 }
 0x2f7   : > { %4122 = vmatpush1.bf16.msra.mxu0 %v8131_v60 }
 0x2f8   : > { %4123 = vmatprep.subr.bf16.mxu0 %v8133_v58 }
 0x2fa   : > { %3770 = vmatmul.mubr.bf16.gmra.mxu1 %v8135_v52  ;;  %3936 = vmatmul.mubr.bf16.gmra.mxu0 %v7792_v42 }
 0x2fb   : > { %4124 = vmatpush1.bf16.msra.mxu0 %v8139_v29  ;;  %4038 = vmatprep.mubr.bf16.mxu1 %v9132_v30 }
 0x2fc   : > { %3945 = vmatprep.mubr.bf16.mxu0 %v7797_v50 }
 0x2fd   : > { %v8146_v34 = vpop.permute.xlu0 %2617  ;;  %v8148_v57 = vpop.permute.xlu1 %2609 }
 0x2fe   : > { %v2635_v13 = vrot.slane %v8146_v34, 4  ;;  %v2631_v4 = vrot.slane %v8148_v57, 4 }
 0x300   : > { %v2661_v42 = vsel %vm901_vm1, %v9221_v35, %v2635_v13  ;;  %v2654_v50 = vsel %vm901_vm1, %v9223_v10, %v2631_v4 }
 0x301   : > { %v2662_v20 = vsel %vm2638_vm3, %v7343_v0, %v2661_v42  ;;  %v2655_v12 = vsel %vm2638_vm3, %v9222_v40, %v2654_v50  ;;  %v8167_v19 = vpop.permute.xlu0 %2601  ;;  %v1595_v9 = vpop.permute.xlu1 %1594  ;;  %v9226_v0 = vrot.slane %v7447_v46, 4 }
 0x302   : > { %3946 = vmatmul.mubr.bf16.gmra.mxu0 %v7869_v32  ;;  %v2627_v15 = vrot.slane %v8167_v19, 4  ;;  %v1623_v43 = vrot.slane %v1595_v9, 4  ;;  %v4884_v5 = vcombine.low %v2655_v12, %v2662_v20  ;;  %v4885_v1 = vcombine.high %v2655_v12, %v2662_v20 }
 0x303   : > { %3955 = vmatprep.mubr.bf16.mxu0 %v7876_v22  ;;  %v9225_v32 = vrot.slane %v9224_v38, 4 }
 0x304   : > { %v1641_v28 = vsel %vm901_vm1, %v9226_v0, %v1623_v43  ;;  %v1643_v35 = vsel %vm1637_vm0, %v1595_v9, %v1623_v43  ;;  %4018 = vmatprep.subr.bf16.mxu1 %v4885_v1  ;;  %v9228_v43 = vrot.slane %v7673_v59, 4 }
 0x305   : > { %v2647_v44 = vsel %vm901_vm1, %v9225_v32, %v2627_v15  ;;  %v1642_v42 = vsel %vm1637_vm0, %v7447_v46, %v1641_v28  ;;  %1684 = vst.msk [vmem:[#allocation3 + $0xf8] sm:$0xf] %vm9227_vm7, %v1643_v35  ;;  %v1430_v40 = vpop.permute.xlu0 %1429  ;;  %v8185_v10 = vpop.permute.xlu1 %2593  ;;  %4019 = vmatpush1.bf16.msra.mxu1 %v4884_v5 }
 0x306   : > { %v2648_v22 = vsel %vm2638_vm3, %v9224_v38, %v2647_v44  ;;  %v1446_v50 = vrot.slane %v1430_v40, 4  ;;  %v2623_v20 = vrot.slane %v8185_v10, 4  ;;  %v8189_v12 = vcombine.low %v1642_v42, %v8065_v31  ;;  %v9229_v38 = vld [vmem:[#allocation8_spill] sm:$0xff] }
 0x307   : > { %v8192_v9 = vcombine.high %v1642_v42, %v8065_v31  ;;  %v9230_v32 = vrot.slane %v9229_v38, 4 }
 0x308   : > { %v1473_v1 = vsel %vm901_vm1, %v9228_v43, %v1446_v50  ;;  %v1475_v46 = vsel %vm1448_vm2, %v1430_v40, %v1446_v50 }
 0x309   : > { %v2640_v5 = vsel %vm901_vm1, %v9230_v32, %v2623_v20  ;;  %4125 = vmatprep.subr.bf16.mxu0 %v8192_v9  ;;  %v1474_v31 = vsel %vm1448_vm2, %v7673_v59, %v1473_v1  ;;  %1507 = vst.msk [vmem:[#allocation3 + $0xdc] sm:$0xf] %vm9231_vm8, %v1475_v46  ;;  %v1406_v0 = vpop.permute.xlu0 %1405  ;;  %v1422_v28 = vpop.permute.xlu1 %1421  ;;  %v9233_v1 = vrot.slane %v7554_v51, 4 }
 0x30a   : > { %3956 = vmatmul.mubr.bf16.gmra.mxu0 %v7948_v14  ;;  %v2641_v44 = vsel %vm2638_vm3, %v9229_v38, %v2640_v5  ;;  %v1434_v35 = vrot.slane %v1406_v0, 4  ;;  %v1442_v42 = vrot.slane %v1422_v28, 4  ;;  %v9232_v14 = vrot.slane %v7490_v41, 4 }
 0x30b   : > { %4126 = vmatpush1.bf16.msra.mxu0 %v8189_v12  ;;  %3965 = vmatprep.mubr.bf16.mxu0 %v7953_v62  ;;  %v4877_v40 = vcombine.low %v2641_v44, %v2648_v22  ;;  %v4878_v50 = vcombine.high %v2641_v44, %v2648_v22 }
 0x30c   : > { %v1452_v43 = vsel %vm901_vm1, %v9232_v14, %v1434_v35  ;;  %v1454_v59 = vsel %vm1448_vm2, %v1406_v0, %v1434_v35  ;;  %v1466_v46 = vsel %vm901_vm1, %v9233_v1, %v1442_v42  ;;  %v1468_v38 = vsel %vm1448_vm2, %v1422_v28, %v1442_v42  ;;  %v2524_v1 = vld [vmem:[#allocation2 + $0xc8] sm:$0xff] }
 0x30d   : > { %4020 = vmatprep.subr.bf16.mxu1 %v4878_v50  ;;  %v1453_v62 = vsel %vm1448_vm2, %v7490_v41, %v1452_v43  ;;  %1495 = vst.msk [vmem:[#allocation3 + $0x88] sm:$0xf] %vm9234_vm9, %v1454_v59  ;;  %v1467_v22 = vsel %vm1448_vm2, %v7554_v51, %v1466_v46  ;;  %v1233_v32 = vpop.permute.xlu0 %1232  ;;  %v2540_v5 = vpop.permute.xlu1 %2539  ;;  %v9236_v41 = vrot.slane %v7582_v33, 4  ;;  %v9237_v51 = vrot.slane %v7267_v39, 4 }
 0x30e   : > { %1503 = vst.msk [vmem:[#allocation3 + $0xc0] sm:$0xf] %vm9235_vm10, %v1468_v38  ;;  %4021 = vmatpush1.bf16.msra.mxu1 %v4877_v40  ;;  %v1253_v44 = vrot.slane %v1233_v32, 4  ;;  %v2544_v0 = vrot.slane %v2540_v5, 4  ;;  %v8227_v35 = vcombine.low %v1467_v22, %v1474_v31  ;;  %v8229_v28 = vcombine.high %v1467_v22, %v1474_v31 }
 0x30f   : > { %5061 = vmatprep.subr.bf16.mxu1 %v8109_v56  ;;  %v9241_v22 = vrot.slane %v7492_v18, 4 }
 0x310   : > { %v1277_v42 = vsel %vm901_vm1, %v9236_v41, %v1253_v44  ;;  %v1279_v50 = vsel %vm1259_vm4, %v1233_v32, %v1253_v44  ;;  %v2551_v14 = vsel %vm901_vm1, %v9237_v51, %v2544_v0  ;;  %4127 = vmatprep.subr.bf16.mxu0 %v8229_v28  ;;  %v9243_v41 = vrot.slane %v7716_v3, 4 }
 0x311   : > { %4897 = vmatmul.mubr.msk.bf16.vlgmr.msra.gmra.mxu1 %vm3642_vm15, %v7454_v49  ;;  %v1278_v56 = vsel %vm1259_vm4, %v7582_v33, %v1277_v42  ;;  %1314 = vst.msk [vmem:[#allocation3 + $0x50] sm:$0xf] %vm9238_vm11, %v1279_v50  ;;  %v2552_v31 = vsel %vm9239_vm13, %v2551_v14, %v2540_v5  ;;  %v1217_v40 = vpop.permute.xlu0 %1216  ;;  %4128 = vmatpush1.bf16.msra.mxu0 %v8227_v35  ;;  %v8288_v14 = vld [vmem:[%s6859_s22 + $0x20] ss:$12 sps:$4 sm:$0xff]  }
 0x312   : > { %v1414_v43 = vpop.permute.xlu1 %1413  ;;  %5077 = vmatpush1.bf16.msra.mxu1 %v8117_v61  ;;  %vm2556_vm12 = vcmp.ne.s16.totalorder %v2552_v31, 0  ;;  %v1245_v39 = vrot.slane %v1217_v40, 4  ;;  %3966 = vmatmul.mubr.bf16.gmra.mxu0 %v8025_v25  ;;  %v9240_v61 = vrot.slane %v7613_v8, 4 }
 0x313   : > { %v1438_v59 = vrot.slane %v1414_v43, 4  ;;  %5062 = vmatprep.subr.bf16.mxu1 %v8121_v23  ;;  %v2572_v33 = vsel %vm2556_vm12, %v2524_v1, 0  ;;  %v2568_v49 = vsel %vm2556_vm12, %v7955_v55, 0  ;;  %4048 = vmatprep.mubr.bf16.mxu1 %v9132_v30 }
 0x314   : > { %3975 = vmatprep.mubr.bf16.mxu0 %v8028_v45  ;;  %v1263_v46 = vsel %vm901_vm1, %v9240_v61, %v1245_v39  ;;  %v1265_v38 = vsel %vm1259_vm4, %v1217_v40, %v1245_v39  ;;  %2619 = vrot.lane.b32.xlu1 %v2572_v33, %s5223_s18 }
 0x315   : > { %v1459_v23 = vsel %vm901_vm1, %v9241_v22, %v1438_v59  ;;  %v1461_v25 = vsel %vm1448_vm2, %v1414_v43, %v1438_v59  ;;  %v1264_v55 = vsel %vm1259_vm4, %v7613_v8, %v1263_v46  ;;  %1306 = vst.msk [vmem:[#allocation3 + $0x18] sm:$0xf] %vm9242_vm14, %v1265_v38  ;;  %2611 = vrot.lane.b32.xlu0 %v2568_v49, %s5223_s18  ;;  %v2564_v8 = vsel %vm2556_vm12, %v7910_v7, 0 }
 0x316   : > { %v1460_v45 = vsel %vm1448_vm2, %v7492_v18, %v1459_v23  ;;  %1499 = vst.msk [vmem:[#allocation3 + $0xa4] sm:$0xf] %vm9227_vm7, %v1461_v25  ;;  %v1241_v32 = vpop.permute.xlu1 %1240  ;;  %5078 = vmatpush1.bf16.msra.mxu1 %v8131_v60  ;;  %v2560_v60 = vsel %vm2556_vm12, %v7991_v17, 0  ;;  %vm9244_vm2 = vmmov %vm9227_vm7  ;;  %v9249_v59 = vrot.slane %v7829_v6, 4  ;;  %v9252_v25 = vld [vmem:[#allocation16_spill] sm:$0xff] }
 0x317   : > { %v1257_v5 = vrot.slane %v1241_v32, 4  ;;  %5063 = vmatprep.subr.bf16.mxu1 %v8133_v58  ;;  %v4781_v44 = vcombine.low %v1453_v62, %v1460_v45  ;;  %v4782_v0 = vcombine.high %v1453_v62, %v1460_v45  ;;  %vm9246_vm8 = vmmov %vm9244_vm2 }
 0x318   : > { %2603 = vrot.lane.b32.xlu1 %v2564_v8, %s5223_s18  ;;  %vm9251_vm9 = vmmov %vm9244_vm2 }
 0x319   : > { %v1284_v18 = vsel %vm901_vm1, %v9243_v41, %v1257_v5  ;;  %v1286_v42 = vsel %vm1259_vm4, %v1241_v32, %v1257_v5  ;;  %4129 = vmatprep.subr.bf16.mxu0 %v4782_v0  ;;  %2595 = vrot.lane.b32.xlu0 %v2560_v60, %s5223_s18  ;;  %vm9257_vm10 = vmmov %vm9244_vm2 }
 0x31a   : > { %v1285_v58 = vsel %vm1259_vm4, %v7716_v3, %v1284_v18  ;;  %1318 = vst.msk [vmem:[#allocation3 + $0x6c] sm:$0xf] %vm9244_vm2, %v1286_v42  ;;  %v1225_v7 = vpop.permute.xlu1 %1224  ;;  %5079 = vmatpush1.bf16.msra.mxu1 %v8139_v29  ;;  %4130 = vmatpush1.bf16.msra.mxu0 %v4781_v44  ;;  %v9245_v3 = vrot.slane %v7611_v11, 4  ;;  %vm9258_vm11 = vmmov %vm9244_vm2 }
 0x31b   : > { %v1249_v62 = vrot.slane %v1225_v7, 4  ;;  %5064 = vmatprep.subr.bf16.mxu1 %v8192_v9  ;;  %v4774_v50 = vcombine.low %v1278_v56, %v1285_v58  ;;  %v4775_v51 = vcombine.high %v1278_v56, %v1285_v58  ;;  %4898 = vmatmul.mubr.msk.bf16.gmra.mxu1 %vm3642_vm15, %v8288_v14  ;;  %vm9262_vm13 = vmmov %vm9244_vm2 }
 0x31c   : > { %3976 = vmatmul.mubr.bf16.gmra.mxu0 %v8073_v21  ;;  %4058 = vmatprep.mubr.bf16.mxu1 %v9132_v30  ;;  %vm9263_vm12 = vmmov %vm9244_vm2 }
 0x31d   : > { %v1270_v17 = vsel %vm901_vm1, %v9245_v3, %v1249_v62  ;;  %v1272_v31 = vsel %vm1259_vm4, %v1225_v7, %v1249_v62  ;;  %4131 = vmatprep.subr.bf16.mxu0 %v4775_v51  ;;  %3985 = vmatprep.mubr.bf16.mxu0 %v8076_v2  ;;  %vm9267_vm14 = vmmov %vm9244_vm2 }
 0x31e   : > { %v1271_v29 = vsel %vm1259_vm4, %v7611_v11, %v1270_v17  ;;  %1310 = vst.msk [vmem:[#allocation3 + $0x34] sm:$0xf] %vm9246_vm8, %v1272_v31  ;;  %5080 = vmatpush1.bf16.msra.mxu1 %v8189_v12  ;;  %4132 = vmatpush1.bf16.msra.mxu0 %v4774_v50  ;;  %vm9250_vm4 = vmmov %vm9244_vm2 }
 0x31f   : > { %5065 = vmatprep.subr.bf16.mxu1 %v8229_v28  ;;  %v4767_v9 = vcombine.low %v1264_v55, %v1271_v29  ;;  %v4768_v56 = vcombine.high %v1264_v55, %v1271_v29  ;;  %v9247_v28 = vld [vmem:[#allocation27_spill] sm:$0xff]  ;;  %v9253_v55 = vld [vmem:[#allocation21_spill] sm:$0xff]  ;;  %v9261_v29 = vrot.slane %v7863_v54, 4  ;;  %vm9268_vm7 = vmmov %vm9244_vm2 }
 0x320   : > { %v9248_v40 = vrot.slane %v9247_v28, 4  ;;  %v9254_v45 = vrot.slane %v9253_v55, 4  ;;  %vm9271_vm8 = vmmov %vm9244_vm2 }
 0x321   : > { %4133 = vmatprep.subr.bf16.mxu0 %v4768_v56 }
 0x322   : > { %5081 = vmatpush1.bf16.msra.mxu1 %v8227_v35  ;;  %4134 = vmatpush1.bf16.msra.mxu0 %v4767_v9 }
 0x323   : > { %5066 = vmatprep.subr.bf16.mxu1 %v4782_v0  ;;  %4899 = vmatmul.mubr.msk.bf16.gmra.mxu1 %vm3642_vm15, %v7589_v26 }
 0x324   : > { %3986 = vmatmul.mubr.bf16.gmra.mxu0 %v8111_v48  ;;  %4068 = vmatprep.mubr.bf16.mxu1 %v9132_v30 }
 0x325   : > { %3995 = vmatprep.mubr.bf16.mxu0 %v8114_v24 }
 0x326   : > { %5082 = vmatpush1.bf16.msra.mxu1 %v4781_v44  ;;  %v9255_v44 = vld [vmem:[#allocation18_spill] sm:$0xff] }
 0x327   : > { %5067 = vmatprep.subr.bf16.mxu1 %v4775_v51  ;;  %v9256_v0 = vrot.slane %v9255_v44, 4  ;;  %v9259_v51 = vld [vmem:[#allocation23_spill] sm:$0xff] }
 0x328   : > { %v9260_v3 = vrot.slane %v9259_v51, 4 }
 0x32a   : > { %5083 = vmatpush1.bf16.msra.mxu1 %v4774_v50 }
 0x32b   : > { %5068 = vmatprep.subr.bf16.mxu1 %v4768_v56  ;;  %4900 = vmatmul.mubr.msk.bf16.gmra.mxu1 %vm3642_vm15, %v7650_v16 }
 0x32c   : > { %3996 = vmatmul.mubr.bf16.gmra.mxu0 %v8135_v52  ;;  %4078 = vmatprep.mubr.bf16.mxu1 %v9132_v30 }
 0x32d   : > { %4151 = vmatprep.mubr.bf16.mxu0 %v8021_v63 }
 0x32e   : > { %v2424_v11 = vpop.permute.xlu0 %2423  ;;  %v2432_v26 = vpop.permute.xlu1 %2431  ;;  %5084 = vmatpush1.bf16.msra.mxu1 %v4767_v9 }
 0x32f   : > { %v2444_v12 = vrot.slane %v2424_v11, 4  ;;  %v2448_v35 = vrot.slane %v2432_v26, 4 }
 0x331   : > { %v2467_v43 = vsel %vm901_vm1, %v9248_v40, %v2444_v12  ;;  %v2469_v39 = vsel %vm2114_vm5, %v2424_v11, %v2444_v12  ;;  %v2474_v16 = vsel %vm901_vm1, %v9249_v59, %v2448_v35  ;;  %v2476_v1 = vsel %vm2114_vm5, %v2432_v26, %v2448_v35 }
 0x332   : > { %v2468_v63 = vsel %vm2114_vm5, %v9247_v28, %v2467_v43  ;;  %2504 = vst.msk [vmem:[#allocation3 + $0x360] sm:$0xf] %vm9250_vm4, %v2469_v39  ;;  %v2475_v33 = vsel %vm2114_vm5, %v7829_v6, %v2474_v16  ;;  %v2408_v49 = vpop.permute.xlu0 %2407  ;;  %v2416_v61 = vpop.permute.xlu1 %2415  ;;  %v9264_v39 = vrot.slane %v7788_v27, 4  ;;  %vm9276_vm4 = vmmov %vm9244_vm2 }
 0x333   : > { %2508 = vst.msk [vmem:[#allocation3 + $0x37c] sm:$0xf] %vm9251_vm9, %v2476_v1  ;;  %v2436_v46 = vrot.slane %v2408_v49, 4  ;;  %v2440_v38 = vrot.slane %v2416_v61, 4  ;;  %v4872_v22 = vcombine.low %v2468_v63, %v2475_v33  ;;  %v4873_v23 = vcombine.high %v2468_v63, %v2475_v33  ;;  %4901 = vmatmul.mubr.msk.bf16.gmra.mxu1 %vm3642_vm15, %v9252_v25  ;;  %v9265_v1 = vld [vmem:[#allocation28_spill] sm:$0xff]  ;;  %vm9277_vm9 = vmmov %vm9244_vm2 }
 0x334   : > { %4088 = vmatprep.mubr.bf16.mxu1 %v9132_v30  ;;  %v9266_v63 = vrot.slane %v9265_v1, 4 }
 0x335   : > { %v2453_v32 = vsel %vm901_vm1, %v9254_v45, %v2436_v46  ;;  %v2455_v5 = vsel %vm2114_vm5, %v2408_v49, %v2436_v46  ;;  %v2460_v6 = vsel %vm901_vm1, %v9256_v0, %v2440_v38  ;;  %v2462_v8 = vsel %vm2114_vm5, %v2416_v61, %v2440_v38  ;;  %4135 = vmatprep.subr.bf16.mxu0 %v4873_v23 }
 0x336   : > { %v2454_v41 = vsel %vm2114_vm5, %v9253_v55, %v2453_v32  ;;  %2496 = vst.msk [vmem:[#allocation3 + $0x328] sm:$0xf] %vm9257_vm10, %v2455_v5  ;;  %v2461_v18 = vsel %vm2114_vm5, %v9255_v44, %v2460_v6  ;;  %5069 = vmatprep.subr.bf16.mxu1 %v4873_v23  ;;  %4136 = vmatpush2.bf16.msra.mxu0 %v4872_v22  ;;  %v9270_v5 = vrot.slane %v7941_v47, 4  ;;  %vm9284_vm10 = vmmov %vm9244_vm2 }
 0x337   : > { %2500 = vst.msk [vmem:[#allocation3 + $0x344] sm:$0xf] %vm9258_vm11, %v2462_v8  ;;  %5085 = vmatpush2.bf16.msra.mxu1 %v4872_v22  ;;  %v4865_v42 = vcombine.low %v2454_v41, %v2461_v18  ;;  %v4866_v60 = vcombine.high %v2454_v41, %v2461_v18  ;;  %vm9289_vm11 = vmmov %vm9244_vm2 }
 0x339   : > { %4137 = vmatprep.subr.bf16.mxu0 %v4866_v60  ;;  %5070 = vmatprep.subr.bf16.mxu1 %v4866_v60 }
 0x33a   : > { %4138 = vmatpush2.bf16.msra.mxu0 %v4865_v42 }
 0x33b   : > { %v2268_v58 = vpop.permute.xlu0 %2267  ;;  %v2276_v7 = vpop.permute.xlu1 %2275  ;;  %5086 = vmatpush2.bf16.msra.mxu1 %v4865_v42 }
 0x33c   : > { %v2288_v62 = vrot.slane %v2268_v58, 4  ;;  %v2292_v50 = vrot.slane %v2276_v7, 4  ;;  %4902 = vmatmul.mubr.msk.bf16.gmra.mxu1 %vm3642_vm15, %v7804_v37 }
 0x33d   : > { %4098 = vmatprep.mubr.bf16.mxu1 %v9132_v30 }
 0x33e   : > { %v2311_v17 = vsel %vm901_vm1, %v9260_v3, %v2288_v62  ;;  %v2313_v31 = vsel %vm1637_vm0, %v2268_v58, %v2288_v62  ;;  %v2318_v9 = vsel %vm901_vm1, %v9261_v29, %v2292_v50  ;;  %v2320_v56 = vsel %vm1637_vm0, %v2276_v7, %v2292_v50  ;;  %v9272_v7 = vld [vmem:[#allocation17_spill] sm:$0xff] }
 0x33f   : > { %v2312_v11 = vsel %vm1637_vm0, %v9259_v51, %v2311_v17  ;;  %2348 = vst.msk [vmem:[#allocation3 + $0x2f0] sm:$0xf] %vm9262_vm13, %v2313_v31  ;;  %v2319_v37 = vsel %vm1637_vm0, %v7863_v54, %v2318_v9  ;;  %v2252_v26 = vpop.permute.xlu0 %2251  ;;  %v2260_v12 = vpop.permute.xlu1 %2259  ;;  %vm9290_vm13 = vmmov %vm9244_vm2 }
 0x340   : > { %2352 = vst.msk [vmem:[#allocation3 + $0x30c] sm:$0xf] %vm9263_vm12, %v2320_v56  ;;  %v2280_v35 = vrot.slane %v2252_v26, 4  ;;  %v2284_v28 = vrot.slane %v2260_v12, 4  ;;  %v4858_v40 = vcombine.low %v2312_v11, %v2319_v37  ;;  %v4859_v43 = vcombine.high %v2312_v11, %v2319_v37 }
 0x342   : > { %v2297_v59 = vsel %vm901_vm1, %v9264_v39, %v2280_v35  ;;  %v2299_v16 = vsel %vm1637_vm0, %v2252_v26, %v2280_v35  ;;  %v2304_v33 = vsel %vm901_vm1, %v9266_v63, %v2284_v28  ;;  %v2306_v54 = vsel %vm1637_vm0, %v2260_v12, %v2284_v28  ;;  %4139 = vmatprep.subr.bf16.mxu0 %v4859_v43  ;;  %v9278_v35 = vld [vmem:[#allocation6_spill] sm:$0xff]  ;;  %v9279_v28 = vld [vmem:[#allocation11_spill] sm:$0xff] }
 0x343   : > { %v2298_v49 = vsel %vm1637_vm0, %v7788_v27, %v2297_v59  ;;  %2340 = vst.msk [vmem:[#allocation3 + $0x2b8] sm:$0xf] %vm9267_vm14, %v2299_v16  ;;  %v2305_v61 = vsel %vm1637_vm0, %v9265_v1, %v2304_v33  ;;  %v2088_v46 = vpop.permute.xlu0 %2087  ;;  %v2096_v38 = vpop.permute.xlu1 %2095  ;;  %5071 = vmatprep.subr.bf16.mxu1 %v4859_v43  ;;  %4140 = vmatpush2.bf16.msra.mxu0 %v4858_v40  ;;  %v9269_v27 = vrot.slane %v7865_v36, 4  ;;  %v9281_v59 = vld [vmem:[#allocation19_spill] sm:$0xff] }
 0x344   : > { %2344 = vst.msk [vmem:[#allocation3 + $0x2d4] sm:$0xf] %vm9268_vm7, %v2306_v54  ;;  %v2108_v22 = vrot.slane %v2088_v46, 4  ;;  %v2112_v23 = vrot.slane %v2096_v38, 4  ;;  %5087 = vmatpush2.bf16.msra.mxu1 %v4858_v40  ;;  %v4851_v25 = vcombine.low %v2298_v49, %v2305_v61  ;;  %v4852_v55 = vcombine.high %v2298_v49, %v2305_v61 }
 0x345   : > { %4903 = vmatmul.mubr.msk.bf16.gmra.mxu1 %vm3642_vm15, %v7879_v53  ;;  %v9280_v40 = vrot.slane %v9279_v28, 4  ;;  %v9282_v16 = vrot.slane %v9281_v59, 4 }
 0x346   : > { %v2132_v45 = vsel %vm901_vm1, %v9269_v27, %v2108_v22  ;;  %v2134_v32 = vsel %vm2114_vm5, %v2088_v46, %v2108_v22  ;;  %v2139_v44 = vsel %vm901_vm1, %v9270_v5, %v2112_v23  ;;  %v2141_v0 = vsel %vm2114_vm5, %v2096_v38, %v2112_v23  ;;  %4141 = vmatprep.subr.bf16.mxu0 %v4852_v55 }
 0x347   : > { %v2133_v6 = vsel %vm2114_vm5, %v7865_v36, %v2132_v45  ;;  %2169 = vst.msk [vmem:[#allocation3 + $0x280] sm:$0xf] %vm9244_vm2, %v2134_v32  ;;  %v2140_v53 = vsel %vm2114_vm5, %v7941_v47, %v2139_v44  ;;  %v2072_v8 = vpop.permute.xlu0 %2071  ;;  %v2080_v41 = vpop.permute.xlu1 %2079  ;;  %5072 = vmatprep.subr.bf16.mxu1 %v4852_v55  ;;  %4142 = vmatpush2.bf16.msra.mxu0 %v4851_v25  ;;  %v9273_v36 = vrot.slane %v9272_v7, 4  ;;  %v9274_v47 = vld [vmem:[#allocation26_spill] sm:$0xff]  ;;  %v9287_v32 = vld [vmem:[#allocation20_spill] sm:$0xff] }
 0x348   : > { %2173 = vst.msk [vmem:[#allocation3 + $0x29c] sm:$0xf] %vm9271_vm8, %v2141_v0  ;;  %v2100_v18 = vrot.slane %v2072_v8, 4  ;;  %v2104_v42 = vrot.slane %v2080_v41, 4  ;;  %5088 = vmatpush2.bf16.msra.mxu1 %v4851_v25  ;;  %v4844_v60 = vcombine.low %v2133_v6, %v2140_v53  ;;  %v4845_v58 = vcombine.high %v2133_v6, %v2140_v53  ;;  %4108 = vmatprep.mubr.bf16.mxu1 %v9132_v30  ;;  %v9285_v25 = vld [vmem:[#allocation4_spill] sm:$0xff] }
 0x349   : > { %v9275_v51 = vrot.slane %v9274_v47, 4  ;;  %v9286_v55 = vrot.slane %v9285_v25, 4  ;;  %v9288_v5 = vrot.slane %v9287_v32, 4 }
 0x34a   : > { %v2118_v62 = vsel %vm901_vm1, %v9273_v36, %v2100_v18  ;;  %v2120_v50 = vsel %vm2114_vm5, %v2072_v8, %v2100_v18  ;;  %v2127_v17 = vsel %vm2114_vm5, %v2080_v41, %v2104_v42  ;;  %4143 = vmatprep.subr.bf16.mxu0 %v4845_v58  ;;  %5073 = vmatprep.subr.bf16.mxu1 %v4845_v58  ;;  %v5164_v41 = vld [vmem:[#allocation3 + $0x360] ss:$28 sps:$4 sm:$0xff]   ;;  %v8444_v58 = vld [vmem:[%s6859_s22 + $0x1c] ss:$12 sps:$4 sm:$0xff]  }
 0x34b   : > { %v2125_v3 = vsel %vm901_vm1, %v9275_v51, %v2104_v42  ;;  %v2119_v31 = vsel %vm2114_vm5, %v9272_v7, %v2118_v62  ;;  %2161 = vst.msk [vmem:[#allocation3 + $0x248] sm:$0xf] %vm9276_vm4, %v2120_v50  ;;  %v1908_v9 = vpop.permute.xlu0 %1907  ;;  %v1916_v56 = vpop.permute.xlu1 %1915  ;;  %4144 = vmatpush2.bf16.msra.mxu0 %v4844_v60  ;;  %v5165_v18 = vld [vmem:[#allocation3 + $0x1a0] ss:$28 sps:$4 sm:$0xff]   ;;  %v5167_v7 = vld [vmem:[#allocation3 + $0x168] ss:$28 sps:$4 sm:$0xff]  }
 0x34c   : > { %v2126_v29 = vsel %vm2114_vm5, %v9274_v47, %v2125_v3  ;;  %2165 = vst.msk [vmem:[#allocation3 + $0x264] sm:$0xf] %vm9277_vm9, %v2127_v17  ;;  %v1928_v11 = vrot.slane %v1908_v9, 4  ;;  %v1932_v37 = vrot.slane %v1916_v56, 4  ;;  %5089 = vmatpush2.bf16.msra.mxu1 %v4844_v60  ;;  %vm9283_vm5 = vmmov %vm9244_vm2  ;;  %v8440_v42 = vld [vmem:[%s6859_s22] ss:$12 sps:$4 sm:$0xff]  }
 0x34d   : > { %v4837_v26 = vcombine.low %v2119_v31, %v2126_v29  ;;  %v4838_v12 = vcombine.high %v2119_v31, %v2126_v29  ;;  %4904 = vmatmul.mubr.msk.bf16.gmra.mxu1 %vm3642_vm15, %v9278_v35  ;;  %v5166_v60 = vld [vmem:[#allocation3 + $0x328] ss:$28 sps:$4 sm:$0xff]   ;;  %v5168_v36 = vld [vmem:[#allocation3 + $0x2f0] ss:$28 sps:$4 sm:$0xff]   ;;  %v5170_v50 = vld [vmem:[#allocation3 + $0x2b8] ss:$28 sps:$4 sm:$0xff]  }
 0x34e   : > { %v1951_v43 = vsel %vm901_vm1, %v9280_v40, %v1928_v11  ;;  %v1953_v39 = vsel %vm1637_vm0, %v1908_v9, %v1928_v11  ;;  %v1958_v1 = vsel %vm901_vm1, %v9282_v16, %v1932_v37  ;;  %v1960_v63 = vsel %vm1637_vm0, %v1916_v56, %v1932_v37  ;;  %4221 = vmatprep.mubr.bf16.mxu1 %v8114_v24  ;;  %v5169_v62 = vld [vmem:[#allocation3 + $0x130] ss:$28 sps:$4 sm:$0xff]   ;;  %v8450_v47 = vld [vmem:[%s6859_s22 + $0x18] ss:$12 sps:$4 sm:$0xff]   ;;  %v5173_v11 = vld [vmem:[#allocation3 + $0xc0] ss:$28 sps:$4 sm:$0xff]  }
 0x34f   : > { %4145 = vmatprep.subr.bf16.mxu0 %v4838_v12  ;;  %v1952_v33 = vsel %vm1637_vm0, %v9279_v28, %v1951_v43  ;;  %1988 = vst.msk [vmem:[#allocation3 + $0x210] sm:$0xf] %vm9283_vm5, %v1953_v39  ;;  %v1959_v54 = vsel %vm1637_vm0, %v9281_v59, %v1958_v1  ;;  %v1892_v49 = vpop.permute.xlu0 %1891  ;;  %v1900_v61 = vpop.permute.xlu1 %1899  ;;  %5074 = vmatprep.subr.bf16.mxu1 %v4838_v12  ;;  %v8454_v3 = vld [vmem:[%s6859_s22 + $0x34] ss:$12 sps:$4 sm:$0xff]   ;;  %v5171_v31 = vld [vmem:[#allocation3 + $0xf8] ss:$28 sps:$4 sm:$0xff]  }
 0x350   : > { %1992 = vst.msk [vmem:[#allocation3 + $0x22c] sm:$0xf] %vm9284_vm10, %v1960_v63  ;;  %4146 = vmatpush2.bf16.msra.mxu0 %v4837_v26  ;;  %v1920_v46 = vrot.slane %v1892_v49, 4  ;;  %v1924_v38 = vrot.slane %v1900_v61, 4  ;;  %5090 = vmatpush2.bf16.msra.mxu1 %v4837_v26  ;;  %v4830_v22 = vcombine.low %v1952_v33, %v1959_v54  ;;  %v4831_v23 = vcombine.high %v1952_v33, %v1959_v54  ;;  %v5172_v29 = vld [vmem:[#allocation3 + $0x280] ss:$28 sps:$4 sm:$0xff]  }
 0x351   : > { %v8458_v26 = vld [vmem:[%s6859_s22 + $0x30] ss:$12 sps:$4 sm:$0xff]   ;;  %v8464_v35 = vld [vmem:[%s6859_s22 + $0x4c] ss:$12 sps:$4 sm:$0xff]   ;;  %v8474_v63 = vld [vmem:[%s6859_s22 + $0x48] ss:$12 sps:$4 sm:$0xff]  }
 0x352   : > { %v1937_v27 = vsel %vm901_vm1, %v9286_v55, %v1920_v46  ;;  %v1939_v45 = vsel %vm1637_vm0, %v1892_v49, %v1920_v46  ;;  %v1944_v44 = vsel %vm901_vm1, %v9288_v5, %v1924_v38  ;;  %v1946_v0 = vsel %vm1637_vm0, %v1900_v61, %v1924_v38  ;;  %4147 = vmatprep.subr.bf16.mxu0 %v4831_v23  ;;  %v5175_v40 = vld [vmem:[#allocation3 + $0x88] ss:$28 sps:$4 sm:$0xff]   ;;  %v5177_v16 = vld [vmem:[#allocation3 + $0x50] ss:$28 sps:$4 sm:$0xff]   ;;  %v8478_v33 = vld [vmem:[%s6859_s22 + $0x64] ss:$12 sps:$4 sm:$0xff]  }
 0x353   : > { %v1938_v6 = vsel %vm1637_vm0, %v9285_v25, %v1937_v27  ;;  %1980 = vst.msk [vmem:[#allocation3 + $0x1d8] sm:$0xf] %vm9289_vm11, %v1939_v45  ;;  %v1945_v24 = vsel %vm1637_vm0, %v9287_v32, %v1944_v44  ;;  %5075 = vmatprep.subr.bf16.mxu1 %v4831_v23  ;;  %v5174_v37 = vld [vmem:[#allocation3 + $0x248] ss:$28 sps:$4 sm:$0xff]   ;;  %v5179_v49 = vld [vmem:[#allocation3 + $0x18] ss:$28 sps:$4 sm:$0xff]   ;;  %vm9291_vm0 = vmmov %vm9244_vm2 }
 0x354   : > { %1984 = vst.msk [vmem:[#allocation3 + $0x1f4] sm:$0xf] %vm9290_vm13, %v1946_v0  ;;  %4148 = vmatpush2.bf16.msra.mxu0 %v4830_v22  ;;  %5091 = vmatpush2.bf16.msra.mxu1 %v4830_v22  ;;  %v4823_v53 = vcombine.low %v1938_v6, %v1945_v24  ;;  %v4824_v8 = vcombine.high %v1938_v6, %v1945_v24  ;;  %v8488_v38 = vld [vmem:[%s6859_s22 + $0x60] ss:$12 sps:$4 sm:$0xff]   ;;  %v8494_v23 = vld [vmem:[%s6859_s22 + $0x7c] ss:$12 sps:$4 sm:$0xff]   ;;  %vm9292_vm12 = vmmov %vm9291_vm0 }
 0x355   : > { %vm9293_vm14 = vmmov %vm9291_vm0 }
 0x356   : > { %4149 = vmatprep.subr.bf16.mxu0 %v4824_v8  ;;  %5076 = vmatprep.subr.bf16.mxu1 %v4824_v8  ;;  %vm9294_vm7 = vmmov %vm9291_vm0 }
 0x357   : > { %v5176_v43 = vld [vmem:[#allocation3 + $0x210] ss:$28 sps:$4 sm:$0xff]  }
 0x358   : > { %4150 = vmatpush2.bf16.msra.mxu0 %v4823_v53  ;;  %5092 = vmatpush2.bf16.msra.mxu1 %v4823_v53 }
 0x359   : > { %4967 = vmatprep.subr.bf16.mxu0 %v5164_v41 }
 0x35b   : > { %4152 = vmatmul.mubr.bf16.vlgmr.msra.gmra.mxu0 %v8440_v42  ;;  %4222 = vmatmul.mubr.bf16.vlgmr.msra.gmra.mxu1 %v8135_v52  ;;  %v5178_v1 = vld [vmem:[#allocation3 + $0x1d8] ss:$28 sps:$4 sm:$0xff]  }
 0x35c   : > { %4968 = vmatpush3.bf16.msra.mxu0 %v5165_v18  ;;  %4161 = vmatprep.mubr.bf16.mxu0 %v8444_v58 }
 0x35d   : > { %4969 = vmatprep.subr.bf16.mxu0 %v5166_v60  ;;  %4264 = vmatprep.mubr.bf16.mxu1 %v9132_v30 }
 0x360   : > { %4970 = vmatpush3.bf16.msra.mxu0 %v5167_v7 }
 0x361   : > { %4971 = vmatprep.subr.bf16.mxu0 %v5168_v36  ;;  %v3814_v51 = vpop.f32.mrf.mxu0 }
 0x363   : > { %4162 = vmatmul.mubr.bf16.gmra.mxu0 %v8450_v47  ;;  %v3816_v17 = vpop.f32.mrf.mxu0 }
 0x364   : > { %4972 = vmatpush3.bf16.msra.mxu0 %v5169_v62  ;;  %4171 = vmatprep.mubr.bf16.mxu0 %v8454_v3 }
 0x365   : > { %4973 = vmatprep.subr.bf16.mxu0 %v5170_v50  ;;  %v3818_v9 = vpop.f32.mrf.mxu0 }
 0x367   : > { %v3820_v56 = vpop.f32.mrf.mxu0 }
 0x368   : > { %4974 = vmatpush3.bf16.msra.mxu0 %v5171_v31  ;;  %v5194_v31 = vld [vmem:[%s6859_s22 + $0x4] ss:$12 sps:$4 sm:$0xff]  }
 0x369   : > { %4975 = vmatprep.subr.bf16.mxu0 %v5172_v29  ;;  %v8461_v12 = vpop.f32.mrf.mxu0 }
 0x36b   : > { %4172 = vmatmul.mubr.bf16.gmra.mxu0 %v8458_v26  ;;  %v8467_v28 = vpop.f32.mrf.mxu0 }
 0x36c   : > { %4976 = vmatpush3.bf16.msra.mxu0 %v5173_v11  ;;  %4181 = vmatprep.mubr.bf16.mxu0 %v8464_v35 }
 0x36d   : > { %4977 = vmatprep.subr.bf16.mxu0 %v5174_v37  ;;  %v8469_v39 = vpop.f32.mrf.mxu0 }
 0x36f   : > { %v8471_v59 = vpop.f32.mrf.mxu0 }
 0x370   : > { %4978 = vmatpush3.bf16.msra.mxu0 %v5175_v40 }
 0x371   : > { %4979 = vmatprep.subr.bf16.mxu0 %v5176_v43  ;;  %v8481_v54 = vpop.f32.mrf.mxu0 }
 0x373   : > { %4182 = vmatmul.mubr.bf16.gmra.mxu0 %v8474_v63  ;;  %v8483_v61 = vpop.f32.mrf.mxu0 }
 0x374   : > { %4980 = vmatpush3.bf16.msra.mxu0 %v5177_v16  ;;  %4191 = vmatprep.mubr.bf16.mxu0 %v8478_v33 }
 0x375   : > { %4981 = vmatprep.subr.bf16.mxu0 %v5178_v1  ;;  %v8485_v46 = vpop.f32.mrf.mxu0 }
 0x377   : > { %v8491_v22 = vpop.f32.mrf.mxu0 }
 0x378   : > { %4982 = vmatpush3.bf16.msra.mxu0 %v5179_v49 }
 0x379   : > { %v8497_v25 = vpop.f32.mrf.mxu0 }
 0x37b   : > { %4192 = vmatmul.mubr.bf16.gmra.mxu0 %v8488_v38  ;;  %v8500_v55 = vpop.f32.mrf.mxu0 }
 0x37c   : > { %4201 = vmatprep.mubr.bf16.mxu0 %v8494_v23 }
 0x37d   : > { %v8502_v27 = vpop.f32.mrf.mxu0 }
 0x37f   : > { %v8510_v32 = vpop.f32.mrf.mxu0 }
 0x381   : > { %v3701_v45 = vpop.f32.mrf.mxu1 }
 0x382   : > { %v3815_v5 = vadd.f32 %v3814_v51, %v3701_v45 }
 0x383   : > { %4202 = vmatmul.mubr.bf16.gmra.mxu0 %v8073_v21  ;;  %v3703_v44 = vpop.f32.mrf.mxu1  ;;  %v8513_v0 = vpop.f32.mrf.mxu0 }
 0x384   : > { %4211 = vmatprep.mubr.bf16.mxu0 %v8076_v2  ;;  %4539 = vst [vmem:[%s8507_s24] sm:$0xff] %v3815_v5  ;;  %v3817_v6 = vadd.f32 %v3816_v17, %v3703_v44 }
 0x385   : > { %v3705_v24 = vpop.f32.mrf.mxu1  ;;  %v8516_v53 = vpop.f32.mrf.mxu0 }
 0x386   : > { %4540 = vst [vmem:[%s8507_s24 + $0x8] sm:$0xff] %v3817_v6  ;;  %v3819_v8 = vadd.f32 %v3818_v9, %v3705_v24  ;;  %v2620_v41 = vpop.permute.xlu1 %2619 }
 0x387   : > { %v3707_v18 = vpop.f32.mrf.mxu1  ;;  %v2612_v60 = vpop.permute.xlu0 %2611  ;;  %v2636_v7 = vrot.slane %v2620_v41, 4 }
 0x388   : > { %4547 = vst [vmem:[%s8507_s24 + $0x38] sm:$0xff] %v3819_v8  ;;  %v3821_v36 = vadd.f32 %v3820_v56, %v3707_v18  ;;  %v8520_v2 = vpop.f32.mrf.mxu0  ;;  %v2632_v62 = vrot.slane %v2612_v60, 4 }
 0x389   : > { %v2663_v51 = vsel %vm901_vm1, %v2635_v13, %v2636_v7  ;;  %v2665_v17 = vsel %vm2638_vm3, %v2620_v41, %v2636_v7 }
 0x38a   : > { %v3711_v50 = vpop.f32.mrf.mxu1  ;;  %4548 = vst [vmem:[%s8507_s24 + $0x40] sm:$0xff] %v3821_v36  ;;  %v8530_v9 = vpop.f32.mrf.mxu0  ;;  %v2656_v56 = vsel %vm901_vm1, %v2631_v4, %v2632_v62  ;;  %v2658_v11 = vsel %vm2638_vm3, %v2612_v60, %v2632_v62  ;;  %v2664_v37 = vsel %vm2638_vm3, %v8146_v34, %v2663_v51  ;;  %2697 = vst.msk [vmem:[#allocation3 + $0x3ec] sm:$0xf] %vm9291_vm0, %v2665_v17 }
 0x38b   : > { %4212 = vmatmul.mubr.bf16.gmra.mxu0 %v8111_v48  ;;  %v3825_v29 = vadd.f32 %v8461_v12, %v3711_v50  ;;  %v2604_v13 = vpop.permute.xlu1 %2603  ;;  %v2657_v43 = vsel %vm2638_vm3, %v8148_v57, %v2656_v56  ;;  %2693 = vst.msk [vmem:[#allocation3 + $0x3d0] sm:$0xf] %vm9292_vm12, %v2658_v11  ;;  %v2596_v12 = vpop.permute.xlu0 %2595 }
 0x38c   : > { %4377 = vmatprep.mubr.bf16.mxu0 %v5194_v31  ;;  %v3713_v40 = vpop.f32.mrf.mxu1  ;;  %v2628_v16 = vrot.slane %v2604_v13, 4  ;;  %v8544_v1 = vpop.f32.mrf.mxu0  ;;  %v2624_v49 = vrot.slane %v2596_v12, 4  ;;  %v4886_v45 = vcombine.low %v2657_v43, %v2664_v37  ;;  %v4887_v34 = vcombine.high %v2657_v43, %v2664_v37 }
 0x38d   : > { %4554 = vst [vmem:[%s8507_s24 + $0x70] sm:$0xff] %v3825_v29  ;;  %v3827_v4 = vadd.f32 %v8467_v28, %v3713_v40 }
 0x38e   : > { %v3715_v5 = vpop.f32.mrf.mxu1  ;;  %v2649_v44 = vsel %vm901_vm1, %v2627_v15, %v2628_v16  ;;  %v2651_v57 = vsel %vm2638_vm3, %v2604_v13, %v2628_v16  ;;  %v8552_v24 = vpop.f32.mrf.mxu0  ;;  %v2642_v28 = vsel %vm901_vm1, %v2623_v20, %v2624_v49  ;;  %v2644_v8 = vsel %vm2638_vm3, %v2596_v12, %v2624_v49  ;;  %4244 = vmatprep.subr.bf16.mxu1 %v4887_v34 }
 0x38f   : > { %4555 = vst [vmem:[%s8507_s24 + $0x78] sm:$0xff] %v3827_v4  ;;  %v3829_v6 = vadd.f32 %v8469_v39, %v3715_v5  ;;  %v2650_v41 = vsel %vm2638_vm3, %v8167_v19, %v2649_v44  ;;  %2689 = vst.msk [vmem:[#allocation3 + $0x3b4] sm:$0xf] %vm9293_vm14, %v2651_v57  ;;  %v2643_v18 = vsel %vm2638_vm3, %v8185_v10, %v2642_v28  ;;  %4245 = vmatpush1.bf16.msra.mxu1 %v4886_v45 }
 0x390   : > { %v3717_v15 = vpop.f32.mrf.mxu1  ;;  %2685 = vst.msk [vmem:[#allocation3 + $0x398] sm:$0xf] %vm9294_vm7, %v2644_v8  ;;  %v8566_v39 = vpop.f32.mrf.mxu0  ;;  %v4879_v60 = vcombine.low %v2643_v18, %v2650_v41  ;;  %v4880_v7 = vcombine.high %v2643_v18, %v2650_v41 }
 0x391   : > { %4561 = vst [vmem:[%s8507_s24 + $0xa8] sm:$0xff] %v3829_v6  ;;  %v3831_v20 = vadd.f32 %v8471_v59, %v3717_v15 }
 0x392   : > { %v3721_v19 = vpop.f32.mrf.mxu1  ;;  %v8572_v36 = vpop.f32.mrf.mxu0  ;;  %4246 = vmatprep.subr.bf16.mxu1 %v4880_v7  ;;  %v5180_v62 = vld [vmem:[#allocation3 + $0x3d0] ss:$28 sps:$4 sm:$0xff]  }
 0x393   : > { %4378 = vmatmul.mubr.bf16.vlgmr.msra.gmra.mxu0 %v8440_v42  ;;  %4562 = vst [vmem:[%s8507_s24 + $0xb0] sm:$0xff] %v3831_v20  ;;  %v3835_v10 = vadd.f32 %v8481_v54, %v3721_v19  ;;  %4247 = vmatpush1.bf16.msra.mxu1 %v4879_v60  ;;  %v8583_v54 = vld [vmem:[%s6859_s22 + $0x8] ss:$12 sps:$4 sm:$0xff]  }
 0x394   : > { %4385 = vmatprep.mubr.bf16.mxu0 %v8444_v58  ;;  %v3723_v50 = vpop.f32.mrf.mxu1  ;;  %v8576_v51 = vpop.f32.mrf.mxu0  ;;  %5041 = vmatprep.subr.bf16.mxu1 %v5180_v62 }
 0x395   : > { %4568 = vst [vmem:[%s8507_s24 + $0xe0] sm:$0xff] %v3835_v10  ;;  %v3837_v59 = vadd.f32 %v8483_v61, %v3723_v50 }
 0x396   : > { %v3725_v42 = vpop.f32.mrf.mxu1  ;;  %v8580_v17 = vpop.f32.mrf.mxu0  ;;  %4905 = vmatmul.mubr.msk.bf16.vlgmr.msra.gmra.mxu1 %vm3642_vm15, %v8583_v54 }
 0x397   : > { %4569 = vst [vmem:[%s8507_s24 + $0xe8] sm:$0xff] %v3837_v59  ;;  %v3839_v58 = vadd.f32 %v8485_v46, %v3725_v42  ;;  %v5181_v31 = vld [vmem:[#allocation3 + $0x398] ss:$28 sps:$4 sm:$0xff]   ;;  %5042 = vmatpush3.bf16.msra.mxu1 %v5180_v62  ;;  %4274 = vmatprep.mubr.bf16.mxu1 %v9132_v30 }
 0x398   : > { %v3727_v29 = vpop.f32.mrf.mxu1  ;;  %5043 = vmatprep.subr.bf16.mxu1 %v5181_v31  ;;  %v8591_v56 = vpop.f32.mrf.mxu0 }
 0x399   : > { %4575 = vst [vmem:[%s8507_s24 + $0x118] sm:$0xff] %v3839_v58  ;;  %v3841_v61 = vadd.f32 %v8491_v22, %v3727_v29 }
 0x39a   : > { %v3731_v46 = vpop.f32.mrf.mxu1  ;;  %v8598_v22 = vpop.f32.mrf.mxu0 }
 0x39b   : > { %4386 = vmatmul.mubr.bf16.gmra.mxu0 %v8450_v47  ;;  %4576 = vst [vmem:[%s8507_s24 + $0x120] sm:$0xff] %v3841_v61  ;;  %v3845_v11 = vadd.f32 %v8497_v25, %v3731_v46  ;;  %5044 = vmatpush3.bf16.msra.mxu1 %v5181_v31 }
 0x39c   : > { %4393 = vmatprep.mubr.bf16.mxu0 %v8454_v3  ;;  %v3733_v37 = vpop.f32.mrf.mxu1  ;;  %v8608_v43 = vpop.f32.mrf.mxu0 }
 0x39d   : > { %4582 = vst [vmem:[%s8507_s24 + $0x150] sm:$0xff] %v3845_v11  ;;  %v3847_v13 = vadd.f32 %v8500_v55, %v3733_v37 }
 0x39e   : > { %v3735_v40 = vpop.f32.mrf.mxu1  ;;  %4906 = vmatmul.mubr.msk.bf16.gmra.mxu1 %vm3642_vm15, %v8288_v14  ;;  %v3886_v49 = vpop.f32.mrf.mxu0 }
 0x39f   : > { %4583 = vst [vmem:[%s8507_s24 + $0x158] sm:$0xff] %v3847_v13  ;;  %v3849_v47 = vadd.f32 %v8502_v27, %v3735_v40  ;;  %4284 = vmatprep.mubr.bf16.mxu1 %v9132_v30  ;;  %v5202_v13 = vld [vmem:[%s6859_s22 + $0x98] ss:$12 sps:$4 sm:$0xff]  }
 0x3a0   : > { %v3737_v3 = vpop.f32.mrf.mxu1  ;;  %v3888_v45 = vpop.f32.mrf.mxu0 }
 0x3a1   : > { %4589 = vst [vmem:[%s8507_s24 + $0x188] sm:$0xff] %v3849_v47  ;;  %v3851_v25 = vadd.f32 %v8510_v32, %v3737_v3  ;;  %v8618_v32 = vld [vmem:[%s6859_s22 + $0x38] ss:$12 sps:$4 sm:$0xff]  }
 0x3a2   : > { %v3741_v55 = vpop.f32.mrf.mxu1  ;;  %v3890_v57 = vpop.f32.mrf.mxu0 }
 0x3a3   : > { %4394 = vmatmul.mubr.bf16.gmra.mxu0 %v8458_v26  ;;  %4590 = vst [vmem:[%s8507_s24 + $0x190] sm:$0xff] %v3851_v25  ;;  %v3855_v27 = vadd.f32 %v8513_v0, %v3741_v55 }
 0x3a4   : > { %4401 = vmatprep.mubr.bf16.mxu0 %v8464_v35  ;;  %v3743_v12 = vpop.f32.mrf.mxu1 }
 0x3a5   : > { %4596 = vst [vmem:[%s8507_s24 + $0x1c0] sm:$0xff] %v3855_v27  ;;  %v3857_v16 = vadd.f32 %v8516_v53, %v3743_v12 }
 0x3a6   : > { %v3745_v4 = vpop.f32.mrf.mxu1  ;;  %4907 = vmatmul.mubr.msk.bf16.gmra.mxu1 %vm3642_vm15, %v8618_v32 }
 0x3a7   : > { %4597 = vst [vmem:[%s8507_s24 + $0x1c8] sm:$0xff] %v3857_v16  ;;  %v3859_v26 = vadd.f32 %v8520_v2, %v3745_v4  ;;  %4294 = vmatprep.mubr.bf16.mxu1 %v9132_v30 }
 0x3a8   : > { %v3747_v35 = vpop.f32.mrf.mxu1 }
 0x3a9   : > { %4603 = vst [vmem:[%s8507_s24 + $0x1f8] sm:$0xff] %v3859_v26  ;;  %v3861_v0 = vadd.f32 %v8530_v9, %v3747_v35 }
 0x3aa   : > { %v3751_v53 = vpop.f32.mrf.mxu1 }
 0x3ab   : > { %4402 = vmatmul.mubr.bf16.gmra.mxu0 %v8474_v63  ;;  %4604 = vst [vmem:[%s8507_s24 + $0x200] sm:$0xff] %v3861_v0  ;;  %v3865_v2 = vadd.f32 %v8544_v1, %v3751_v53  ;;  %v8634_v63 = vld [vmem:[%s6859_s22 + $0x50] ss:$12 sps:$4 sm:$0xff]  }
 0x3ac   : > { %4409 = vmatprep.mubr.bf16.mxu0 %v8478_v33  ;;  %v3753_v34 = vpop.f32.mrf.mxu1 }
 0x3ad   : > { %4610 = vst [vmem:[%s8507_s24 + $0x230] sm:$0xff] %v3865_v2  ;;  %v3867_v5 = vadd.f32 %v8552_v24, %v3753_v34 }
 0x3ae   : > { %v3755_v44 = vpop.f32.mrf.mxu1  ;;  %4908 = vmatmul.mubr.msk.bf16.gmra.mxu1 %vm3642_vm15, %v8634_v63 }
 0x3af   : > { %4611 = vst [vmem:[%s8507_s24 + $0x238] sm:$0xff] %v3867_v5  ;;  %v3869_v9 = vadd.f32 %v8566_v39, %v3755_v44  ;;  %4304 = vmatprep.mubr.bf16.mxu1 %v9132_v30  ;;  %v8650_v39 = vld [vmem:[%s6859_s22 + $0x68] ss:$12 sps:$4 sm:$0xff]  }
 0x3b0   : > { %v3757_v33 = vpop.f32.mrf.mxu1 }
 0x3b1   : > { %4617 = vst [vmem:[%s8507_s24 + $0x268] sm:$0xff] %v3869_v9  ;;  %v3871_v1 = vadd.f32 %v8572_v36, %v3757_v33  ;;  %v5199_v36 = vld [vmem:[%s6859_s22 + $0x94] ss:$12 sps:$4 sm:$0xff]  }
 0x3b2   : > { %v3761_v6 = vpop.f32.mrf.mxu1  ;;  %v3927_v24 = vpop.f32.mrf.mxu0 }
 0x3b3   : > { %4410 = vmatmul.mubr.bf16.gmra.mxu0 %v8488_v38  ;;  %4618 = vst [vmem:[%s8507_s24 + $0x270] sm:$0xff] %v3871_v1  ;;  %v3875_v28 = vadd.f32 %v8576_v51, %v3761_v6 }
 0x3b4   : > { %4417 = vmatprep.mubr.bf16.mxu0 %v8494_v23  ;;  %v3763_v8 = vpop.f32.mrf.mxu1  ;;  %v3929_v41 = vpop.f32.mrf.mxu0 }
 0x3b5   : > { %4624 = vst [vmem:[%s8507_s24 + $0x2a0] sm:$0xff] %v3875_v28  ;;  %v3877_v15 = vadd.f32 %v8580_v17, %v3763_v8 }
 0x3b6   : > { %v3765_v18 = vpop.f32.mrf.mxu1  ;;  %v3931_v20 = vpop.f32.mrf.mxu0  ;;  %4909 = vmatmul.mubr.msk.bf16.gmra.mxu1 %vm3642_vm15, %v8650_v39 }
 0x3b7   : > { %4625 = vst [vmem:[%s8507_s24 + $0x2a8] sm:$0xff] %v3877_v15  ;;  %v3879_v38 = vadd.f32 %v8591_v56, %v3765_v18  ;;  %4314 = vmatprep.mubr.bf16.mxu1 %v9132_v30  ;;  %v5201_v56 = vld [vmem:[%s6859_s22 + $0xac] ss:$12 sps:$4 sm:$0xff]  }
 0x3b8   : > { %v3767_v23 = vpop.f32.mrf.mxu1  ;;  %v3933_v60 = vpop.f32.mrf.mxu0 }
 0x3b9   : > { %4631 = vst [vmem:[%s8507_s24 + $0x2d8] sm:$0xff] %v3879_v38  ;;  %v3881_v7 = vadd.f32 %v8598_v22, %v3767_v23 }
 0x3ba   : > { %v3771_v19 = vpop.f32.mrf.mxu1  ;;  %v3937_v10 = vpop.f32.mrf.mxu0 }
 0x3bb   : > { %4418 = vmatmul.mubr.bf16.gmra.mxu0 %v8073_v21  ;;  %4632 = vst [vmem:[%s8507_s24 + $0x2e0] sm:$0xff] %v3881_v7  ;;  %v3885_v62 = vadd.f32 %v8608_v43, %v3771_v19  ;;  %v5200_v21 = vld [vmem:[%s6859_s22 + $0x80] ss:$12 sps:$4 sm:$0xff]  }
 0x3bc   : > { %4425 = vmatprep.mubr.bf16.mxu0 %v5199_v36  ;;  %v3773_v50 = vpop.f32.mrf.mxu1  ;;  %v3939_v59 = vpop.f32.mrf.mxu0 }
 0x3bd   : > { %4638 = vst [vmem:[%s8507_s24 + $0x310] sm:$0xff] %v3885_v62  ;;  %v3887_v51 = vadd.f32 %v3886_v49, %v3773_v50 }
 0x3be   : > { %v3775_v42 = vpop.f32.mrf.mxu1  ;;  %v3941_v58 = vpop.f32.mrf.mxu0  ;;  %4910 = vmatmul.mubr.msk.bf16.gmra.mxu1 %vm3642_vm15, %v5200_v21 }
 0x3bf   : > { %4639 = vst [vmem:[%s8507_s24 + $0x318] sm:$0xff] %v3887_v51  ;;  %v3889_v17 = vadd.f32 %v3888_v45, %v3775_v42  ;;  %4324 = vmatprep.mubr.bf16.mxu1 %v9132_v30 }
 0x3c0   : > { %v3777_v31 = vpop.f32.mrf.mxu1  ;;  %v3943_v29 = vpop.f32.mrf.mxu0 }
 0x3c1   : > { %4645 = vst [vmem:[%s8507_s24 + $0x348] sm:$0xff] %v3889_v17  ;;  %v3891_v61 = vadd.f32 %v3890_v57, %v3777_v31 }
 0x3c2   : > { %v3947_v46 = vpop.f32.mrf.mxu0 }
 0x3c3   : > { %4426 = vmatmul.mubr.bf16.gmra.mxu0 %v8111_v48  ;;  %4646 = vst [vmem:[%s8507_s24 + $0x350] sm:$0xff] %v3891_v61  ;;  %v5203_v48 = vld [vmem:[%s6859_s22 + $0xb0] ss:$12 sps:$4 sm:$0xff]  }
 0x3c4   : > { %4433 = vmatprep.mubr.bf16.mxu0 %v5201_v56  ;;  %v3949_v11 = vpop.f32.mrf.mxu0 }
 0x3c6   : > { %v3951_v37 = vpop.f32.mrf.mxu0  ;;  %4911 = vmatmul.mubr.msk.bf16.gmra.mxu1 %vm3642_vm15, %v5202_v13 }
 0x3c7   : > { %4334 = vmatprep.mubr.bf16.mxu1 %v9132_v30 }
 0x3c8   : > { %v3953_v40 = vpop.f32.mrf.mxu0 }
 0x3ca   : > { %v3957_v22 = vpop.f32.mrf.mxu0 }
 0x3cb   : > { %4434 = vmatmul.mubr.bf16.gmra.mxu0 %v8135_v52 }
 0x3cc   : > { %v3959_v47 = vpop.f32.mrf.mxu0 }
 0x3ce   : > { %v8674_v3 = vpop.f32.mrf.mxu0  ;;  %4912 = vmatmul.mubr.msk.bf16.gmra.mxu1 %vm3642_vm15, %v5203_v48 }
 0x3cf   : > { %5045 = vmatprep.mubr.msk.bf16.mxu1 %vm3642_vm15, %v8583_v54 }
 0x3d0   : > { %v3963_v25 = vpop.f32.mrf.mxu0 }
 0x3d1   : > { %v4040_v55 = vpop.f32.mrf.mxu1 }
 0x3d2   : > { %v4041_v43 = vadd.f32 %v4040_v55, %v3927_v24  ;;  %v3967_v12 = vpop.f32.mrf.mxu0 }
 0x3d3   : > { %v4042_v27 = vpop.f32.mrf.mxu1 }
 0x3d4   : > { %4541 = vst [vmem:[%s8507_s24 + $0x10] sm:$0xff] %v4041_v43  ;;  %v4043_v30 = vadd.f32 %v4042_v27, %v3929_v41  ;;  %v3969_v49 = vpop.f32.mrf.mxu0 }
 0x3d5   : > { %v4044_v52 = vpop.f32.mrf.mxu1 }
 0x3d6   : > { %4542 = vst [vmem:[%s8507_s24 + $0x18] sm:$0xff] %v4043_v30  ;;  %v4045_v16 = vadd.f32 %v4044_v52, %v3931_v20  ;;  %5046 = vmatmul.mubr.msk.bf16.vlgmr.msra.gmra.mxu1 %vm3642_vm15, %v8288_v14  ;;  %v3971_v35 = vpop.f32.mrf.mxu0 }
 0x3d7   : > { %v4046_v4 = vpop.f32.mrf.mxu1  ;;  %5049 = vmatprep.mubr.msk.bf16.mxu1 %vm3642_vm15, %v8618_v32 }
 0x3d8   : > { %4549 = vst [vmem:[%s8507_s24 + $0x48] sm:$0xff] %v4045_v16  ;;  %v4047_v54 = vadd.f32 %v4046_v4, %v3933_v60  ;;  %v3973_v45 = vpop.f32.mrf.mxu0 }
 0x3da   : > { %4550 = vst [vmem:[%s8507_s24 + $0x50] sm:$0xff] %v4047_v54 }
 0x3db   : > { %v4050_v26 = vpop.f32.mrf.mxu1 }
 0x3dc   : > { %v4051_v0 = vadd.f32 %v4050_v26, %v3937_v10  ;;  %v3977_v57 = vpop.f32.mrf.mxu0 }
 0x3dd   : > { %v4052_v53 = vpop.f32.mrf.mxu1 }
 0x3de   : > { %5050 = vmatmul.mubr.msk.bf16.gmra.mxu1 %vm3642_vm15, %v8634_v63  ;;  %4556 = vst [vmem:[%s8507_s24 + $0x80] sm:$0xff] %v4051_v0  ;;  %v4053_v14 = vadd.f32 %v4052_v53, %v3939_v59  ;;  %v3979_v6 = vpop.f32.mrf.mxu0 }
 0x3df   : > { %5053 = vmatprep.mubr.msk.bf16.mxu1 %vm3642_vm15, %v8650_v39  ;;  %v4054_v32 = vpop.f32.mrf.mxu1 }
 0x3e0   : > { %4557 = vst [vmem:[%s8507_s24 + $0x88] sm:$0xff] %v4053_v14  ;;  %v4055_v2 = vadd.f32 %v4054_v32, %v3941_v58  ;;  %v3981_v15 = vpop.f32.mrf.mxu0 }
 0x3e1   : > { %v4056_v34 = vpop.f32.mrf.mxu1 }
 0x3e2   : > { %4563 = vst [vmem:[%s8507_s24 + $0xb8] sm:$0xff] %v4055_v2  ;;  %v4057_v5 = vadd.f32 %v4056_v34, %v3943_v29  ;;  %v3983_v23 = vpop.f32.mrf.mxu0 }
 0x3e3   : > { %v4060_v44 = vpop.f32.mrf.mxu1 }
 0x3e4   : > { %4564 = vst [vmem:[%s8507_s24 + $0xc0] sm:$0xff] %v4057_v5  ;;  %v4061_v9 = vadd.f32 %v4060_v44, %v3947_v46  ;;  %v3987_v36 = vpop.f32.mrf.mxu0 }
 0x3e5   : > { %v4062_v63 = vpop.f32.mrf.mxu1 }
 0x3e6   : > { %5054 = vmatmul.mubr.msk.bf16.gmra.mxu1 %vm3642_vm15, %v5200_v21  ;;  %4570 = vst [vmem:[%s8507_s24 + $0xf0] sm:$0xff] %v4061_v9  ;;  %v4063_v33 = vadd.f32 %v4062_v63, %v3949_v11  ;;  %v3989_v42 = vpop.f32.mrf.mxu0 }
 0x3e7   : > { %5057 = vmatprep.mubr.msk.bf16.mxu1 %vm3642_vm15, %v5202_v13  ;;  %v4064_v1 = vpop.f32.mrf.mxu1 }
 0x3e8   : > { %4571 = vst [vmem:[%s8507_s24 + $0xf8] sm:$0xff] %v4063_v33  ;;  %v4065_v24 = vadd.f32 %v4064_v1, %v3951_v37  ;;  %v3991_v29 = vpop.f32.mrf.mxu0 }
 0x3e9   : > { %v4066_v28 = vpop.f32.mrf.mxu1 }
 0x3ea   : > { %4577 = vst [vmem:[%s8507_s24 + $0x128] sm:$0xff] %v4065_v24  ;;  %v4067_v8 = vadd.f32 %v4066_v28, %v3953_v40  ;;  %v3993_v37 = vpop.f32.mrf.mxu0 }
 0x3eb   : > { %v4070_v41 = vpop.f32.mrf.mxu1 }
 0x3ec   : > { %4578 = vst [vmem:[%s8507_s24 + $0x130] sm:$0xff] %v4067_v8  ;;  %v4071_v18 = vadd.f32 %v4070_v41, %v3957_v22 }
 0x3ed   : > { %v4072_v20 = vpop.f32.mrf.mxu1 }
 0x3ee   : > { %5058 = vmatmul.mubr.msk.bf16.gmra.mxu1 %vm3642_vm15, %v5203_v48  ;;  %4584 = vst [vmem:[%s8507_s24 + $0x160] sm:$0xff] %v4071_v18  ;;  %v4073_v38 = vadd.f32 %v4072_v20, %v3959_v47 }
 0x3ef   : > { %v4074_v39 = vpop.f32.mrf.mxu1 }
 0x3f0   : > { %4585 = vst [vmem:[%s8507_s24 + $0x168] sm:$0xff] %v4073_v38  ;;  %v4075_v60 = vadd.f32 %v4074_v39, %v8674_v3  ;;  %v3997_v3 = vpop.f32.mrf.mxu0 }
 0x3f1   : > { %v4076_v7 = vpop.f32.mrf.mxu1 }
 0x3f2   : > { %4591 = vst [vmem:[%s8507_s24 + $0x198] sm:$0xff] %v4075_v60  ;;  %v4077_v19 = vadd.f32 %v4076_v7, %v3963_v25  ;;  %v3999_v27 = vpop.f32.mrf.mxu0 }
 0x3f3   : > { %v4080_v10 = vpop.f32.mrf.mxu1 }
 0x3f4   : > { %4592 = vst [vmem:[%s8507_s24 + $0x1a0] sm:$0xff] %v4077_v19  ;;  %v4081_v62 = vadd.f32 %v4080_v10, %v3967_v12  ;;  %v4001_v4 = vpop.f32.mrf.mxu0 }
 0x3f5   : > { %v4082_v50 = vpop.f32.mrf.mxu1 }
 0x3f6   : > { %4598 = vst [vmem:[%s8507_s24 + $0x1d0] sm:$0xff] %v4081_v62  ;;  %v4083_v59 = vadd.f32 %v4082_v50, %v3969_v49  ;;  %v4003_v0 = vpop.f32.mrf.mxu0 }
 0x3f7   : > { %v4084_v51 = vpop.f32.mrf.mxu1 }
 0x3f8   : > { %4599 = vst [vmem:[%s8507_s24 + $0x1d8] sm:$0xff] %v4083_v59  ;;  %v4085_v58 = vadd.f32 %v4084_v51, %v3971_v35 }
 0x3f9   : > { %v4086_v17 = vpop.f32.mrf.mxu1 }
 0x3fa   : > { %4605 = vst [vmem:[%s8507_s24 + $0x208] sm:$0xff] %v4085_v58  ;;  %v4087_v21 = vadd.f32 %v4086_v17, %v3973_v45 }
 0x3fc   : > { %v4090_v31 = vpop.f32.mrf.mxu1  ;;  %4606 = vst [vmem:[%s8507_s24 + $0x210] sm:$0xff] %v4087_v21 }
 0x3fd   : > { %v4091_v61 = vadd.f32 %v4090_v31, %v3977_v57 }
 0x3fe   : > { %v4092_v46 = vpop.f32.mrf.mxu1 }
 0x3ff   : > { %4612 = vst [vmem:[%s8507_s24 + $0x240] sm:$0xff] %v4091_v61  ;;  %v4093_v56 = vadd.f32 %v4092_v46, %v3979_v6 }
 0x400   : > { %v4094_v11 = vpop.f32.mrf.mxu1 }
 0x401   : > { %4613 = vst [vmem:[%s8507_s24 + $0x248] sm:$0xff] %v4093_v56  ;;  %v4095_v13 = vadd.f32 %v4094_v11, %v3981_v15 }
 0x402   : > { %v4096_v40 = vpop.f32.mrf.mxu1 }
 0x403   : > { %4619 = vst [vmem:[%s8507_s24 + $0x278] sm:$0xff] %v4095_v13  ;;  %v4097_v22 = vadd.f32 %v4096_v40, %v3983_v23 }
 0x405   : > { %v4100_v47 = vpop.f32.mrf.mxu1  ;;  %4620 = vst [vmem:[%s8507_s24 + $0x280] sm:$0xff] %v4097_v22 }
 0x406   : > { %v4101_v48 = vadd.f32 %v4100_v47, %v3987_v36 }
 0x407   : > { %v4102_v25 = vpop.f32.mrf.mxu1 }
 0x408   : > { %4626 = vst [vmem:[%s8507_s24 + $0x2b0] sm:$0xff] %v4101_v48  ;;  %v4103_v55 = vadd.f32 %v4102_v25, %v3989_v42 }
 0x409   : > { %v4104_v43 = vpop.f32.mrf.mxu1 }
 0x40a   : > { %4627 = vst [vmem:[%s8507_s24 + $0x2b8] sm:$0xff] %v4103_v55  ;;  %v4105_v30 = vadd.f32 %v4104_v43, %v3991_v29 }
 0x40b   : > { %v4106_v12 = vpop.f32.mrf.mxu1 }
 0x40c   : > { %4633 = vst [vmem:[%s8507_s24 + $0x2e8] sm:$0xff] %v4105_v30  ;;  %v4107_v52 = vadd.f32 %v4106_v12, %v3993_v37 }
 0x40d   : > { %v4110_v16 = vpop.f32.mrf.mxu1 }
 0x40e   : > { %4634 = vst [vmem:[%s8507_s24 + $0x2f0] sm:$0xff] %v4107_v52  ;;  %v4111_v54 = vadd.f32 %v4110_v16, %v3997_v3 }
 0x40f   : > { %v4112_v49 = vpop.f32.mrf.mxu1 }
 0x410   : > { %4640 = vst [vmem:[%s8507_s24 + $0x320] sm:$0xff] %v4111_v54  ;;  %v4113_v26 = vadd.f32 %v4112_v49, %v3999_v27 }
 0x411   : > { %v4114_v35 = vpop.f32.mrf.mxu1 }
 0x412   : > { %4641 = vst [vmem:[%s8507_s24 + $0x328] sm:$0xff] %v4113_v26  ;;  %v4115_v53 = vadd.f32 %v4114_v35, %v4001_v4 }
 0x413   : > { %v4116_v14 = vpop.f32.mrf.mxu1 }
 0x414   : > { %4647 = vst [vmem:[%s8507_s24 + $0x358] sm:$0xff] %v4115_v53  ;;  %v4117_v32 = vadd.f32 %v4116_v14, %v4003_v0 }
 0x416   : > { %4648 = vst [vmem:[%s8507_s24 + $0x360] sm:$0xff] %v4117_v32 }
 0x41b   : > { %v4153_v45 = vpop.f32.mrf.mxu0  ;;  %v8754_v10 = vpop.f32.mrf.mxu1 }
 0x41d   : > { %v4155_v2 = vpop.f32.mrf.mxu0  ;;  %v8760_v50 = vpop.f32.mrf.mxu1 }
 0x41f   : > { %v4157_v34 = vpop.f32.mrf.mxu0  ;;  %v8766_v42 = vpop.f32.mrf.mxu1 }
 0x421   : > { %v4159_v5 = vpop.f32.mrf.mxu0  ;;  %v8772_v21 = vpop.f32.mrf.mxu1 }
 0x423   : > { %v4163_v44 = vpop.f32.mrf.mxu0 }
 0x425   : > { %v4165_v57 = vpop.f32.mrf.mxu0 }
 0x427   : > { %v4167_v9 = vpop.f32.mrf.mxu0 }
 0x429   : > { %v4169_v63 = vpop.f32.mrf.mxu0 }
 0x42b   : > { %v4173_v33 = vpop.f32.mrf.mxu0 }
 0x42d   : > { %v8724_v1 = vpop.f32.mrf.mxu0 }
 0x42f   : > { %v8726_v6 = vpop.f32.mrf.mxu0 }
 0x431   : > { %v8728_v24 = vpop.f32.mrf.mxu0 }
 0x433   : > { %v8730_v28 = vpop.f32.mrf.mxu0 }
 0x435   : > { %v8732_v8 = vpop.f32.mrf.mxu0 }
 0x437   : > { %v8734_v41 = vpop.f32.mrf.mxu0 }
 0x439   : > { %v8736_v15 = vpop.f32.mrf.mxu0 }
 0x43b   : > { %v8738_v18 = vpop.f32.mrf.mxu0 }
 0x43d   : > { %v8740_v20 = vpop.f32.mrf.mxu0 }
 0x43f   : > { %v8742_v38 = vpop.f32.mrf.mxu0 }
 0x441   : > { %v8744_v39 = vpop.f32.mrf.mxu0 }
 0x443   : > { %v8746_v23 = vpop.f32.mrf.mxu0 }
 0x445   : > { %v8748_v60 = vpop.f32.mrf.mxu0 }
 0x447   : > { %v8750_v7 = vpop.f32.mrf.mxu0 }
 0x449   : > { %v8752_v19 = vpop.f32.mrf.mxu0 }
 0x44b   : > { %v8756_v36 = vpop.f32.mrf.mxu0 }
 0x44d   : > { %v8758_v62 = vpop.f32.mrf.mxu0 }
 0x44f   : > { %v8762_v59 = vpop.f32.mrf.mxu0 }
 0x451   : > { %v8764_v51 = vpop.f32.mrf.mxu0 }
 0x453   : > { %v8768_v58 = vpop.f32.mrf.mxu0 }
 0x455   : > { %v8770_v17 = vpop.f32.mrf.mxu0 }
 0x456   : > { %v4266_v29 = vpop.f32.mrf.mxu1 }
 0x457   : > { %v8774_v31 = vpop.f32.mrf.mxu0  ;;  %v4267_v46 = vadd.f32 %v4266_v29, %v4153_v45 }
 0x458   : > { %v4268_v56 = vpop.f32.mrf.mxu1 }
 0x459   : > { %v8776_v61 = vpop.f32.mrf.mxu0  ;;  %4543 = vst [vmem:[%s8507_s24 + $0x20] sm:$0xff] %v4267_v46  ;;  %v4269_v37 = vadd.f32 %v4268_v56, %v4155_v2 }
 0x45a   : > { %v4270_v13 = vpop.f32.mrf.mxu1 }
 0x45b   : > { %v8778_v11 = vpop.f32.mrf.mxu0  ;;  %4544 = vst [vmem:[%s8507_s24 + $0x28] sm:$0xff] %v4269_v37  ;;  %v4271_v22 = vadd.f32 %v4270_v13, %v4157_v34 }
 0x45c   : > { %v4272_v47 = vpop.f32.mrf.mxu1 }
 0x45d   : > { %v8781_v40 = vpop.f32.mrf.mxu0  ;;  %4551 = vst [vmem:[%s8507_s24 + $0x58] sm:$0xff] %v4271_v22  ;;  %v4273_v48 = vadd.f32 %v4272_v47, %v4159_v5 }
 0x45e   : > { %v4276_v25 = vpop.f32.mrf.mxu1 }
 0x45f   : > { %v8784_v3 = vpop.f32.mrf.mxu0  ;;  %4552 = vst [vmem:[%s8507_s24 + $0x60] sm:$0xff] %v4273_v48  ;;  %v4277_v43 = vadd.f32 %v4276_v25, %v4163_v44 }
 0x460   : > { %v4278_v27 = vpop.f32.mrf.mxu1 }
 0x461   : > { %v8787_v55 = vpop.f32.mrf.mxu0  ;;  %4558 = vst [vmem:[%s8507_s24 + $0x90] sm:$0xff] %v4277_v43  ;;  %v4279_v12 = vadd.f32 %v4278_v27, %v4165_v57 }
 0x462   : > { %v4280_v52 = vpop.f32.mrf.mxu1 }
 0x463   : > { %v8790_v30 = vpop.f32.mrf.mxu0  ;;  %4559 = vst [vmem:[%s8507_s24 + $0x98] sm:$0xff] %v4279_v12  ;;  %v4281_v4 = vadd.f32 %v4280_v52, %v4167_v9 }
 0x464   : > { %v4282_v54 = vpop.f32.mrf.mxu1 }
 0x465   : > { %v8793_v16 = vpop.f32.mrf.mxu0  ;;  %4565 = vst [vmem:[%s8507_s24 + $0xc8] sm:$0xff] %v4281_v4  ;;  %v4283_v26 = vadd.f32 %v4282_v54, %v4169_v63 }
 0x466   : > { %v4286_v35 = vpop.f32.mrf.mxu1 }
 0x467   : > { %v8796_v49 = vpop.f32.mrf.mxu0  ;;  %4566 = vst [vmem:[%s8507_s24 + $0xd0] sm:$0xff] %v4283_v26  ;;  %v4287_v53 = vadd.f32 %v4286_v35, %v4173_v33 }
 0x468   : > { %v4288_v14 = vpop.f32.mrf.mxu1 }
 0x469   : > { %v8799_v0 = vpop.f32.mrf.mxu0  ;;  %4572 = vst [vmem:[%s8507_s24 + $0x100] sm:$0xff] %v4287_v53  ;;  %v4289_v45 = vadd.f32 %v4288_v14, %v8724_v1 }
 0x46a   : > { %v4290_v2 = vpop.f32.mrf.mxu1 }
 0x46b   : > { %v8802_v32 = vpop.f32.mrf.mxu0  ;;  %4573 = vst [vmem:[%s8507_s24 + $0x108] sm:$0xff] %v4289_v45  ;;  %v4291_v5 = vadd.f32 %v4290_v2, %v8726_v6 }
 0x46c   : > { %v4292_v44 = vpop.f32.mrf.mxu1 }
 0x46d   : > { %v8806_v34 = vpop.f32.mrf.mxu0  ;;  %4579 = vst [vmem:[%s8507_s24 + $0x138] sm:$0xff] %v4291_v5  ;;  %v4293_v9 = vadd.f32 %v4292_v44, %v8728_v24 }
 0x46e   : > { %v4296_v63 = vpop.f32.mrf.mxu1 }
 0x46f   : > { %v8810_v57 = vpop.f32.mrf.mxu0  ;;  %4580 = vst [vmem:[%s8507_s24 + $0x140] sm:$0xff] %v4293_v9  ;;  %v4297_v1 = vadd.f32 %v4296_v63, %v8730_v28 }
 0x470   : > { %v4298_v29 = vpop.f32.mrf.mxu1 }
 0x471   : > { %v8814_v33 = vpop.f32.mrf.mxu0  ;;  %4586 = vst [vmem:[%s8507_s24 + $0x170] sm:$0xff] %v4297_v1  ;;  %v4299_v46 = vadd.f32 %v4298_v29, %v8732_v8 }
 0x472   : > { %v4300_v6 = vpop.f32.mrf.mxu1 }
 0x473   : > { %v8820_v56 = vpop.f32.mrf.mxu0  ;;  %4587 = vst [vmem:[%s8507_s24 + $0x178] sm:$0xff] %v4299_v46  ;;  %v4301_v37 = vadd.f32 %v4300_v6, %v8734_v41 }
 0x474   : > { %v4302_v24 = vpop.f32.mrf.mxu1 }
 0x475   : > { %4593 = vst [vmem:[%s8507_s24 + $0x1a8] sm:$0xff] %v4301_v37  ;;  %v4303_v13 = vadd.f32 %v4302_v24, %v8736_v15  ;;  %v8826_v28 = vpop.f32.mrf.mxu0 }
 0x476   : > { %v4306_v22 = vpop.f32.mrf.mxu1 }
 0x477   : > { %4594 = vst [vmem:[%s8507_s24 + $0x1b0] sm:$0xff] %v4303_v13  ;;  %v4307_v47 = vadd.f32 %v4306_v22, %v8738_v18  ;;  %v8832_v41 = vpop.f32.mrf.mxu0 }
 0x478   : > { %v4308_v8 = vpop.f32.mrf.mxu1 }
 0x479   : > { %4600 = vst [vmem:[%s8507_s24 + $0x1e0] sm:$0xff] %v4307_v47  ;;  %v4309_v48 = vadd.f32 %v4308_v8, %v8740_v20  ;;  %v8838_v18 = vpop.f32.mrf.mxu0 }
 0x47a   : > { %v4310_v25 = vpop.f32.mrf.mxu1 }
 0x47b   : > { %4601 = vst [vmem:[%s8507_s24 + $0x1e8] sm:$0xff] %v4309_v48  ;;  %v4311_v43 = vadd.f32 %v4310_v25, %v8742_v38  ;;  %v8844_v38 = vpop.f32.mrf.mxu0  ;;  %v4997_v25 = vadd.f32 %v8793_v16, %v8790_v30 }
 0x47c   : > { %v4312_v15 = vpop.f32.mrf.mxu1 }
 0x47d   : > { %4607 = vst [vmem:[%s8507_s24 + $0x218] sm:$0xff] %v4311_v43  ;;  %v4313_v27 = vadd.f32 %v4312_v15, %v8744_v39  ;;  %v5006_v43 = vadd.f32 %v8814_v33, %v8810_v57 }
 0x47e   : > { %v4316_v12 = vpop.f32.mrf.mxu1 }
 0x47f   : > { %4608 = vst [vmem:[%s8507_s24 + $0x220] sm:$0xff] %v4313_v27  ;;  %v4317_v52 = vadd.f32 %v4316_v12, %v8746_v23  ;;  %v5014_v23 = vpop.f32.mrf.mxu0  ;;  %v5000_v27 = vadd.f32 %v8799_v0, %v8796_v49 }
 0x480   : > { %v4318_v20 = vpop.f32.mrf.mxu1  ;;  %v5015_v12 = vadd.f32 %v5014_v23, %v8844_v38 }
 0x481   : > { %4614 = vst [vmem:[%s8507_s24 + $0x250] sm:$0xff] %v4317_v52  ;;  %v4319_v4 = vadd.f32 %v4318_v20, %v8748_v60  ;;  %v8854_v5 = vpop.f32.mrf.mxu0  ;;  %v5009_v20 = vadd.f32 %v8826_v28, %v8820_v56 }
 0x482   : > { %v4320_v54 = vpop.f32.mrf.mxu1 }
 0x483   : > { %4615 = vst [vmem:[%s8507_s24 + $0x258] sm:$0xff] %v4319_v4  ;;  %v4321_v26 = vadd.f32 %v4320_v54, %v8750_v7  ;;  %v5017_v63 = vpop.f32.mrf.mxu0 }
 0x484   : > { %v4322_v39 = vpop.f32.mrf.mxu1  ;;  %v5018_v0 = vadd.f32 %v5017_v63, %v8854_v5 }
 0x485   : > { %4621 = vst [vmem:[%s8507_s24 + $0x288] sm:$0xff] %v4321_v26  ;;  %v4323_v35 = vadd.f32 %v4322_v39, %v8752_v19  ;;  %v8864_v46 = vpop.f32.mrf.mxu0  ;;  %v5012_v39 = vadd.f32 %v8838_v18, %v8832_v41 }
 0x486   : > { %v4326_v53 = vpop.f32.mrf.mxu1 }
 0x487   : > { %4622 = vst [vmem:[%s8507_s24 + $0x290] sm:$0xff] %v4323_v35  ;;  %v4327_v14 = vadd.f32 %v4326_v53, %v8756_v36  ;;  %v5020_v24 = vpop.f32.mrf.mxu0 }
 0x488   : > { %v4328_v60 = vpop.f32.mrf.mxu1 }
 0x489   : > { %4628 = vst [vmem:[%s8507_s24 + $0x2c0] sm:$0xff] %v4327_v14  ;;  %v4329_v45 = vadd.f32 %v4328_v60, %v8758_v62  ;;  %v5021_v60 = vadd.f32 %v5020_v24, %v8864_v46 }
 0x48a   : > { %v4330_v2 = vpop.f32.mrf.mxu1 }
 0x48b   : > { %4629 = vst [vmem:[%s8507_s24 + $0x2c8] sm:$0xff] %v4329_v45  ;;  %v4331_v7 = vadd.f32 %v4330_v2, %v8762_v59 }
 0x48c   : > { %v4332_v44 = vpop.f32.mrf.mxu1 }
 0x48d   : > { %4635 = vst [vmem:[%s8507_s24 + $0x2f8] sm:$0xff] %v4331_v7  ;;  %v4333_v19 = vadd.f32 %v4332_v44, %v8764_v51  ;;  %v4991_v51 = vadd.f32 %v8781_v40, %v8778_v11  ;;  %v5022_v40 = vpop.f32.mrf.mxu0 }
 0x48e   : > { %v4336_v9 = vpop.f32.mrf.mxu1 }
 0x48f   : > { %4636 = vst [vmem:[%s8507_s24 + $0x300] sm:$0xff] %v4333_v19  ;;  %v4337_v36 = vadd.f32 %v4336_v9, %v8754_v10  ;;  %v5023_v48 = vpop.f32.mrf.mxu0 }
 0x490   : > { %v4338_v1 = vpop.f32.mrf.mxu1  ;;  %v5024_v7 = vadd.f32 %v5023_v48, %v5022_v40 }
 0x491   : > { %4642 = vst [vmem:[%s8507_s24 + $0x330] sm:$0xff] %v4337_v36  ;;  %v4339_v62 = vadd.f32 %v4338_v1, %v8760_v50  ;;  %v4985_v50 = vadd.f32 %v8770_v17, %v8768_v58  ;;  %v5003_v17 = vadd.f32 %v8806_v34, %v8802_v32  ;;  %v5025_v15 = vpop.f32.mrf.mxu0 }
 0x492   : > { %v4340_v29 = vpop.f32.mrf.mxu1 }
 0x493   : > { %4643 = vst [vmem:[%s8507_s24 + $0x338] sm:$0xff] %v4339_v62  ;;  %v4341_v59 = vadd.f32 %v4340_v29, %v8766_v42  ;;  %v4994_v42 = vadd.f32 %v8787_v55, %v8784_v3  ;;  %v5026_v33 = vpop.f32.mrf.mxu0 }
 0x494   : > { %v4342_v6 = vpop.f32.mrf.mxu1  ;;  %v5027_v35 = vadd.f32 %v5026_v33, %v5025_v15 }
 0x495   : > { %4649 = vst [vmem:[%s8507_s24 + $0x368] sm:$0xff] %v4341_v59  ;;  %v4343_v37 = vadd.f32 %v4342_v6, %v8772_v21  ;;  %v4988_v21 = vadd.f32 %v8776_v61, %v8774_v31  ;;  %v5028_v26 = vpop.f32.mrf.mxu0 }
 0x496   : > { %v5047_v10 = vpop.f32.mrf.mxu1 }
 0x497   : > { %4650 = vst [vmem:[%s8507_s24 + $0x370] sm:$0xff] %v4343_v37  ;;  %v4485_v13 = vadd.f32 %v5047_v10, %v4991_v51  ;;  %v5029_v23 = vpop.f32.mrf.mxu0 }
 0x498   : > { %v4476_v22 = vpop.f32.mrf.mxu1  ;;  %v5030_v41 = vadd.f32 %v5029_v23, %v5028_v26 }
 0x499   : > { %4560 = vst.msk [vmem:[%s8507_s24 + $0xa0] sm:$0xff] %vm899_vm6, %v4485_v13  ;;  %v4477_v47 = vadd.f32 %v4985_v50, %v4476_v22 }
 0x49a   : > { %v5048_v11 = vpop.f32.mrf.mxu1 }
 0x49b   : > { %4546 = vst.msk [vmem:[%s8507_s24 + $0x30] sm:$0xff] %vm899_vm6, %v4477_v47  ;;  %v4488_v8 = vadd.f32 %v5048_v11, %v4994_v42 }
 0x49c   : > { %v4479_v58 = vpop.f32.mrf.mxu1 }
 0x49d   : > { %4567 = vst.msk [vmem:[%s8507_s24 + $0xd8] sm:$0xff] %vm899_vm6, %v4488_v8  ;;  %v4480_v3 = vadd.f32 %v4988_v21, %v4479_v58 }
 0x49e   : > { %v5051_v55 = vpop.f32.mrf.mxu1 }
 0x49f   : > { %4553 = vst.msk [vmem:[%s8507_s24 + $0x68] sm:$0xff] %vm899_vm6, %v4480_v3  ;;  %v4501_v31 = vadd.f32 %v5051_v55, %v5003_v17 }
 0x4a0   : > { %v4492_v61 = vpop.f32.mrf.mxu1 }
 0x4a1   : > { %4588 = vst.msk [vmem:[%s8507_s24 + $0x180] sm:$0xff] %vm899_vm6, %v4501_v31  ;;  %v4493_v32 = vadd.f32 %v4997_v25, %v4492_v61 }
 0x4a2   : > { %v5052_v34 = vpop.f32.mrf.mxu1 }
 0x4a3   : > { %4574 = vst.msk [vmem:[%s8507_s24 + $0x110] sm:$0xff] %vm899_vm6, %v4493_v32  ;;  %v4504_v30 = vadd.f32 %v5052_v34, %v5006_v43 }
 0x4a4   : > { %v4495_v16 = vpop.f32.mrf.mxu1 }
 0x4a5   : > { %4595 = vst.msk [vmem:[%s8507_s24 + $0x1b8] sm:$0xff] %vm899_vm6, %v4504_v30  ;;  %v4496_v52 = vadd.f32 %v5000_v27, %v4495_v16 }
 0x4a6   : > { %v5055_v57 = vpop.f32.mrf.mxu1 }
 0x4a7   : > { %4581 = vst.msk [vmem:[%s8507_s24 + $0x148] sm:$0xff] %vm899_vm6, %v4496_v52  ;;  %v4517_v4 = vadd.f32 %v5055_v57, %v5015_v12 }
 0x4a8   : > { %v4508_v49 = vpop.f32.mrf.mxu1 }
 0x4a9   : > { %4616 = vst.msk [vmem:[%s8507_s24 + $0x260] sm:$0xff] %vm899_vm6, %v4517_v4  ;;  %v4509_v54 = vadd.f32 %v5009_v20, %v4508_v49 }
 0x4aa   : > { %v5056_v38 = vpop.f32.mrf.mxu1 }
 0x4ab   : > { %4602 = vst.msk [vmem:[%s8507_s24 + $0x1f0] sm:$0xff] %vm899_vm6, %v4509_v54  ;;  %v4520_v56 = vadd.f32 %v5056_v38, %v5018_v0 }
 0x4ac   : > { %v4511_v28 = vpop.f32.mrf.mxu1 }
 0x4ad   : > { %4623 = vst.msk [vmem:[%s8507_s24 + $0x298] sm:$0xff] %vm899_vm6, %v4520_v56  ;;  %v4512_v53 = vadd.f32 %v5012_v39, %v4511_v28 }
 0x4ae   : > { %v5059_v14 = vpop.f32.mrf.mxu1 }
 0x4af   : > { %4609 = vst.msk [vmem:[%s8507_s24 + $0x228] sm:$0xff] %vm899_vm6, %v4512_v53  ;;  %v4533_v45 = vadd.f32 %v5059_v14, %v5027_v35 }
 0x4b0   : > { %v4524_v2 = vpop.f32.mrf.mxu1 }
 0x4b1   : > { %4644 = vst.msk [vmem:[%s8507_s24 + $0x340] sm:$0xff] %vm899_vm6, %v4533_v45  ;;  %v4525_v18 = vadd.f32 %v5021_v60, %v4524_v2 }
 0x4b2   : > { %v5060_v5 = vpop.f32.mrf.mxu1 }
 0x4b3   : > { %4630 = vst.msk [vmem:[%s8507_s24 + $0x2d0] sm:$0xff] %vm899_vm6, %v4525_v18  ;;  %v4536_v44 = vadd.f32 %v5060_v5, %v5030_v41 }
 0x4b4   : > { %v4527_v19 = vpop.f32.mrf.mxu1 }
 0x4b5   : > { %4651 = vst.msk [vmem:[%s8507_s24 + $0x378] sm:$0xff] %vm899_vm6, %v4536_v44  ;;  %v4528_v9 = vadd.f32 %v5024_v7, %v4527_v19 }
 0x4b7   : > { %4637 = vst.msk [vmem:[%s8507_s24 + $0x308] sm:$0xff] %vm899_vm6, %v4528_v9 }
 0x4b8 PF: > { %s13_s12 = sadd.s32 1, %s5210_s12  }
 0x4b9   : > { %p10_p4 = scmp.ge.s32.totalorder %s13_s12, 4  }
 0x4bb   :  { %12 = sbr.rel (!%p10_p4) target bundleno = 1 (0x1), region = 62 }

</bundles_post_ra>
